<compile_context>
chip_gen: v5e
topology: v5e:2x2
jax: 0.10.0
libtpu: 0.0.40
codegen_flags: <defaults>
</compile_context>

<pallas_src>
import jax
import jax.numpy as jnp
import numpy as np
from jax.experimental import pallas as pl
from jax.experimental.pallas import tpu as pltpu

# ----------------------------- model hyper-params ---------------------------------
B = 2
DIM = 32                 # model dim
HEADS = 4
HEAD_DIM = 8             # HEADS * HEAD_DIM == DIM
HEADS_PER_GROUP = 2
G = HEADS // HEADS_PER_GROUP                            # conv groups = 2
ROUTER_MULT = 2
FF_MULT = 2
INNER = G * HEAD_DIM * HEADS_PER_GROUP * ROUTER_MULT    # 64
FF_DIM = INNER * FF_MULT                                # 128
INNER_G = INNER // G                                    # 32
FF_G = FF_DIM // G                                      # 64
HEIGHT, WIDTH = 4, 4
SEQ = HEIGHT * WIDTH                                    # 16
ENC_SEQ = 8
BS = B * SEQ                                            # 32  (batch folded into rows)
BE = B * ENC_SEQ                                        # 16
HBS = HEADS * BS                                        # 128 (head-stacked query rows)
DYT_ALPHA = 0.2          # TODO(synk): learned scalar in the module; fixed at init value
ATTN_SCALE = 1.0 / (HEAD_DIM ** 0.5)
NEG = -1e30

# rows of the packed (NV, 128) per-channel parameter slab (f32)
(VR_NCA_G, VR_NCA_B, VR_NA_G, VR_NA_B, VR_NFF_G, VR_NFF_B,
 VR_SC_CA, VR_SH_CA, VR_SC_A, VR_SH_A, VR_SC_FF, VR_SH_FF,
 VR_CA_BQ, VR_CA_BKV, VR_CA_BO, VR_SA_BQKV, VR_SA_BO,
 VR_CA_QG, VR_CA_QB, VR_CA_KG, VR_CA_KB,
 VR_SA_QG, VR_SA_QB, VR_SA_KG, VR_SA_KB,
 VR_ROUTER_B, VR_C1_B, VR_C2_B, VR_PROJ_B) = range(29)

# slots of the packed (7, 64, 128) bf16 projection-weight slab
(WS_CA_Q, WS_CA_KV, WS_CA_O, WS_SA_QKV, WS_SA_O, WS_ROUTER, WS_PROJ) = range(7)

# row offsets of the (GF_ROWS, DIM) f32 geometry slab
GF_COS = 0
GF_SIN = BS
GF_MQ = 2 * BS
GF_AMS = 2 * BS + HBS
GF_AMC = 2 * BS + 2 * HBS
GF_ROWS = 2 * BS + 3 * HBS


def _gelu_tanh(x):
    # GELU(approximate='tanh')
    return 0.5 * x * (1.0 + jnp.tanh(0.7978845608028654 * (x + 0.044715 * x * x * x)))


# ----------------------------- fused Pallas kernel ---------------------------------
def _fused_block_kernel(x_ref, enc_ref, vecs_ref, wslab_ref, pbd_ref, taps_ref,
                        gf32_ref, w1cat_ref, w2cat_ref, out_ref):
    f32, bf16 = jnp.float32, jnp.bfloat16

    def mm(a, b):
        return jnp.dot(a.astype(bf16), b.astype(bf16), preferred_element_type=f32)

    def mm_kt(a, b):   # contract last axes: (m,k) x (n,k) -> (m,n), no explicit transpose
        return jax.lax.dot_general(a.astype(bf16), b.astype(bf16),
                                   (((1,), (1,)), ((), ())),
                                   preferred_element_type=f32)

    def vrow(i, w=DIM):
        return vecs_ref[i:i + 1, :w]                      # (1, w) f32

    def wmat(i, r, c):
        return wslab_ref[i, :r, :c]                       # (r, c) bf16

    def dyt(v, gi, bi, w=DIM):
        # DynamicTanh: gamma * tanh(alpha * v) + beta (alpha fixed at its init value).
        return vrow(gi, w) * jnp.tanh(DYT_ALPHA * v) + vrow(bi, w)

    x = x_ref[...]                                        # (BS, DIM) f32, batch folded
    enc = enc_ref[...]                                    # (BE, DIM) f32

    cos_t = gf32_ref[GF_COS:GF_COS + BS, :]               # (BS, DIM) rotary cos (head-tiled)
    sin_t = gf32_ref[GF_SIN:GF_SIN + BS, :]
    mq = gf32_ref[GF_MQ:GF_MQ + HBS, :]                   # (HBS, DIM) head-lane mask
    ams = gf32_ref[GF_AMS:GF_AMS + HBS, :]                # (HBS, BS) self-attn batch mask
    amc = gf32_ref[GF_AMC:GF_AMC + HBS, :BE]              # (HBS, BE) cross-attn batch mask
    pbd = pbd_ref[...]                                    # (DIM, DIM) bf16 pair-swap

    def attn_core(q, k, v, qg, qb, kg, kb, amask, wo_i, bo_i, use_rope):
        # per-head-dim DynamicTanh qk-norm (params tiled over heads host-side)
        q = dyt(q, qg, qb)
        k = dyt(k, kg, kb)
        if use_rope:
            # interleaved rotary via one block-diagonal pair-swap matmul on fused Q/K
            q = q * cos_t + mm(q, pbd) * sin_t
            k = k * cos_t + mm(k, pbd) * sin_t
        # Stack the heads along the sublane axis: row h*BS + r holds head h of token r,
        # masked so the score contraction only sees head h's lanes.  One score matmul,
        # one softmax, one PV for ALL heads.
        qs = jnp.concatenate([q] * HEADS, axis=0) * mq    # (HBS, DIM)
        s = mm_kt(qs, k) * ATTN_SCALE + amask             # (HBS, keys)
        m = jnp.max(s, axis=-1, keepdims=True)
        e = jnp.exp(s - m)
        l = jnp.sum(e, axis=-1, keepdims=True)
        p = e / l                                         # exact softmax normalization
        u = mm(p, v) * mq                                 # (HBS, DIM), head-h lanes per block
        o = u[0:BS]
        for h in range(1, HEADS):
            o = o + u[h * BS:(h + 1) * BS]                # merge head blocks -> (BS, DIM)
        return mm(o, wmat(wo_i, DIM, DIM)) + vrow(bo_i)

    # ---- 1. cross attention -------------------------------------------------------
    nh = dyt(x, VR_NCA_G, VR_NCA_B)
    q = mm(nh, wmat(WS_CA_Q, DIM, DIM)) + vrow(VR_CA_BQ)
    kv = mm(enc, wmat(WS_CA_KV, DIM, 2 * DIM)) + vrow(VR_CA_BKV, 2 * DIM)
    ca = attn_core(q, kv[:, :DIM], kv[:, DIM:2 * DIM],
                   VR_CA_QG, VR_CA_QB, VR_CA_KG, VR_CA_KB,
                   amc, WS_CA_O, VR_CA_BO, use_rope=False)
    x = x + (vrow(VR_SH_CA) + ca * vrow(VR_SC_CA))        # addcmul + residual

    # ---- 2. self attention (with rotary) -------------------------------------------
    nh = dyt(x, VR_NA_G, VR_NA_B)
    qkv = mm(nh, wmat(WS_SA_QKV, DIM, 3 * DIM)) + vrow(VR_SA_BQKV, 3 * DIM)
    sa = attn_core(qkv[:, :DIM], qkv[:, DIM:2 * DIM], qkv[:, 2 * DIM:3 * DIM],
                   VR_SA_QG, VR_SA_QB, VR_SA_KG, VR_SA_KB,
                   ams, WS_SA_O, VR_SA_BO, use_rope=True)
    x = x + (vrow(VR_SH_A) + sa * vrow(VR_SC_A))

    # ---- 3. feed forward: router -> grouped 3x3 conv x2 -> residual -> proj --------
    nh = dyt(x, VR_NFF_G, VR_NFF_B)
    router = _gelu_tanh(mm(nh, wmat(WS_ROUTER, DIM, INNER)) + vrow(VR_ROUTER_B, INNER))

    # conv1: one wide weight matmul, then 9 tile-aligned neighbor-gather matmuls.
    routed1 = mm(router, w1cat_ref[...])                  # (BS, 9*FF_DIM)
    c1 = jnp.zeros((BS, FF_DIM), f32) + vrow(VR_C1_B, FF_DIM)
    for t in range(9):
        c1 = c1 + mm(taps_ref[t], routed1[:, t * FF_DIM:(t + 1) * FF_DIM])
    c1 = _gelu_tanh(c1)

    # conv2: same scheme; each 128-lane tap block holds INNER valid output lanes.
    routed2 = mm(c1, w2cat_ref[...])                      # (BS, 9*FF_DIM)
    c2 = jnp.zeros((BS, FF_DIM), f32)
    for t in range(9):
        c2 = c2 + mm(taps_ref[t], routed2[:, t * FF_DIM:(t + 1) * FF_DIM])
    c2 = c2[:, :INNER] + vrow(VR_C2_B, INNER)

    # (conv out + router residual) -> GELU -> Linear
    ff = mm(_gelu_tanh(c2 + router), wmat(WS_PROJ, INNER, DIM)) + vrow(VR_PROJ_B)
    x = x + (vrow(VR_SH_FF) + ff * vrow(VR_SC_FF))

    out_ref[...] = x.astype(out_ref.dtype)


# ----------------------------- host-side constant builders -------------------------
def make_rotary(seq, dh):
    half = dh // 2
    inv = 1.0 / (10000.0 ** (jnp.arange(half, dtype=jnp.float32) / half))
    ang = jnp.arange(seq, dtype=jnp.float32)[:, None] * inv[None, :]   # (S, half)
    ang = jnp.repeat(ang, 2, axis=-1)                                  # interleaved pairs
    return jnp.cos(ang), jnp.sin(ang)                                  # (S, dh) each


def make_pair_swap_np(dh):
    # rot = x @ P  with rot[2i] = -x[2i+1], rot[2i+1] = x[2i]  (interleaved rotary)
    p = np.zeros((dh, dh), dtype=np.float32)
    for i in range(0, dh, 2):
        p[i + 1, i] = -1.0
        p[i, i + 1] = 1.0
    return p


def make_conv_taps_np(height, width):
    # (9, S, S) 0/1 neighbor-gather matrices for a 3x3 / pad=1 conv on row-major (h, w).
    seq = height * width
    taps = np.zeros((9, seq, seq), dtype=np.float32)
    t = 0
    for ky in range(3):
        for kx in range(3):
            dy, dx = ky - 1, kx - 1
            for s in range(seq):
                hh, ww = divmod(s, width)
                nh_, nw_ = hh + dy, ww + dx
                if 0 <= nh_ < height and 0 <= nw_ < width:
                    taps[t, s, nh_ * width + nw_] = 1.0
            t += 1
    return taps


def _block_diag(blocks):
    rows = sum(b.shape[0] for b in blocks)
    cols = sum(b.shape[1] for b in blocks)
    out = jnp.zeros((rows, cols), jnp.float32)
    r = c = 0
    for b in blocks:
        out = out.at[r:r + b.shape[0], c:c + b.shape[1]].set(b)
        r += b.shape[0]
        c += b.shape[1]
    return out


def pack_constants(params, rotary, height, width):
    f32, bf16 = jnp.float32, jnp.bfloat16
    cap, sap, fp = params["cross_attn"], params["attn"], params["ff"]

    # ----- (NV, 128) f32 slab of per-channel vectors / biases -----
    def row(v):
        v = jnp.asarray(v, f32).reshape(-1)
        return jnp.pad(v, (0, 128 - v.shape[0]))

    tile_h = lambda v: jnp.tile(jnp.asarray(v, f32), HEADS)
    vec_rows = [
        params["nca_g"], params["nca_b"], params["na_g"], params["na_b"],
        params["nff_g"], params["nff_b"],
        params["scale_ca"], params["shift_ca"], params["scale_a"], params["shift_a"],
        params["scale_ff"], params["shift_ff"],
        cap["bq"], jnp.concatenate([cap["bk"], cap["bv"]]), cap["bo"],
        jnp.concatenate([sap["bq"], sap["bk"], sap["bv"]]), sap["bo"],
        tile_h(cap["nq_g"]), tile_h(cap["nq_b"]), tile_h(cap["nk_g"]), tile_h(cap["nk_b"]),
        tile_h(sap["nq_g"]), tile_h(sap["nq_b"]), tile_h(sap["nk_g"]), tile_h(sap["nk_b"]),
        fp["router_b"], fp["conv1_b"], fp["conv2_b"], fp["proj_b"],
    ]
    vecs = jnp.stack([row(v) for v in vec_rows], axis=0)               # (29, 128)

    # ----- (7, 64, 128) bf16 slab of dense projection weights -----
    def slot(w):
        w = jnp.asarray(w, f32)
        return jnp.pad(w, ((0, 64 - w.shape[0]), (0, 128 - w.shape[1])))

    wslab = jnp.stack([
        slot(cap["wq"]),
        slot(jnp.concatenate([cap["wk"], cap["wv"]], axis=1)),
        slot(cap["wo"]),
        slot(jnp.concatenate([sap["wq"], sap["wk"], sap["wv"]], axis=1)),
        slot(sap["wo"]),
        slot(fp["router_w"]),
        slot(fp["proj_w"]),
    ], axis=0).astype(bf16)

    # ----- rotary pair-swap (block-diag over heads) + batch-block-diag conv taps -----
    p8 = make_pair_swap_np(HEAD_DIM)
    pbd = np.zeros((DIM, DIM), np.float32)
    for h in range(HEADS):
        pbd[h * HEAD_DIM:(h + 1) * HEAD_DIM, h * HEAD_DIM:(h + 1) * HEAD_DIM] = p8

    t_small = make_conv_taps_np(height, width)                         # (9, SEQ, SEQ)
    taps = np.zeros((9, BS, BS), np.float32)
    for b in range(B):
        taps[:, b * SEQ:(b + 1) * SEQ, b * SEQ:(b + 1) * SEQ] = t_small

    # ----- (GF_ROWS, DIM) f32 geometry slab: cos/sin, head-lane mask, batch masks -----
    cos8, sin8 = rotary                                                # (SEQ, HEAD_DIM)
    cos_t = jnp.tile(jnp.tile(jnp.asarray(cos8, f32), (1, HEADS)), (B, 1))   # (BS, DIM)
    sin_t = jnp.tile(jnp.tile(jnp.asarray(sin8, f32), (1, HEADS)), (B, 1))

    mqm = np.zeros((HBS, DIM), np.float32)
    for h in range(HEADS):
        mqm[h * BS:(h + 1) * BS, h * HEAD_DIM:(h + 1) * HEAD_DIM] = 1.0

    def batch_mask(keys_per_batch, pad_to):
        m = np.full((HBS, pad_to), NEG, np.float32)
        for h in range(HEADS):
            for b in range(B):
                m[h * BS + b * SEQ:h * BS + (b + 1) * SEQ,
                  b * keys_per_batch:(b + 1) * keys_per_batch] = 0.0
        return m

    ams = batch_mask(SEQ, BS)                                          # (HBS, BS)
    amc = batch_mask(ENC_SEQ, DIM)                                     # (HBS, DIM), valid [:BE]

    gf32 = jnp.concatenate([cos_t, sin_t, jnp.asarray(mqm),
                            jnp.asarray(ams), jnp.asarray(amc)], axis=0)   # (448, DIM)

    # ----- grouped-conv weights hoisted per-tap into wide matmul operands -----
    # TODO(synk): assumes the tap-major (9, Cin_g, Cout_g) per-group layout of init_params;
    # loading real PyTorch Conv2d weights (Cout, Cin/g, kH, kW) needs an explicit transpose.
    c1w = jnp.asarray(fp["conv1_w"], jnp.float32).reshape(G, 9, INNER_G, FF_G)
    c2w = jnp.asarray(fp["conv2_w"], jnp.float32).reshape(G, 9, FF_G, INNER_G)
    w1cat = jnp.concatenate(
        [_block_diag([c1w[g, t] for g in range(G)]) for t in range(9)], axis=1)    # (INNER, 9*FF_DIM)
    w2cat = jnp.concatenate(
        [jnp.pad(_block_diag([c2w[g, t] for g in range(G)]),
                 ((0, 0), (0, FF_DIM - INNER))) for t in range(9)], axis=1)        # (FF_DIM, 9*FF_DIM)

    return [vecs, wslab, jnp.asarray(pbd, bf16), jnp.asarray(taps, bf16),
            gf32, w1cat.astype(bf16), w2cat.astype(bf16)]


# ----------------------------- module forward --------------------------------------
def raiflow_block(params, hidden, encoder_hidden, rotary, height, width):
    batch, seq, dim = hidden.shape
    enc_seq = encoder_hidden.shape[1]
    assert (batch, seq, dim, enc_seq) == (B, SEQ, DIM, ENC_SEQ)

    x = hidden.reshape(batch * seq, dim).astype(jnp.float32)
    enc = encoder_hidden.reshape(batch * enc_seq, dim).astype(jnp.float32)
    consts = pack_constants(params, rotary, height, width)

    vmem = pl.BlockSpec(memory_space=pltpu.MemorySpace.VMEM)
    out = pl.pallas_call(
        _fused_block_kernel,
        out_shape=jax.ShapeDtypeStruct((batch * seq, dim), jnp.float32),
        in_specs=[vmem] * (2 + len(consts)),
        out_specs=vmem,
    )(x, enc, *consts)
    return out.reshape(batch, seq, dim)


# ----------------------------- deterministic init ----------------------------------
def init_params(key):
    keys = iter(jax.random.split(key, 64))

    def w(shape, scale=0.05):
        return scale * jax.random.normal(next(keys), shape, dtype=jnp.float32)

    def attn_params():
        return {
            "wq": w((DIM, DIM)), "bq": w((DIM,)),
            "wk": w((DIM, DIM)), "bk": w((DIM,)),
            "wv": w((DIM, DIM)), "bv": w((DIM,)),
            "wo": w((DIM, DIM)), "bo": w((DIM,)),
            "nq_g": 1.0 + w((HEAD_DIM,)), "nq_b": w((HEAD_DIM,)),
            "nk_g": 1.0 + w((HEAD_DIM,)), "nk_b": w((HEAD_DIM,)),
        }

    return {
        "nca_g": 1.0 + w((DIM,)), "nca_b": w((DIM,)),
        "scale_ca": 1.0 + w((DIM,)), "shift_ca": w((DIM,)),
        "cross_attn": attn_params(),
        "na_g": 1.0 + w((DIM,)), "na_b": w((DIM,)),
        "scale_a": 1.0 + w((DIM,)), "shift_a": w((DIM,)),
        "attn": attn_params(),
        "nff_g": 1.0 + w((DIM,)), "nff_b": w((DIM,)),
        "scale_ff": 1.0 + w((DIM,)), "shift_ff": w((DIM,)),
        "ff": {
            "router_w": w((DIM, INNER)), "router_b": w((INNER,)),
            # per-group 3x3 conv weights, tap-major then input channel
            "conv1_w": w((G, 9 * INNER_G, FF_G)), "conv1_b": w((G * FF_G,)),
            "conv2_w": w((G, 9 * FF_G, INNER_G)), "conv2_b": w((G * INNER_G,)),
            "proj_w": w((INNER, DIM)), "proj_b": w((DIM,)),
        },
    }


if __name__ == "__main__":
    key = jax.random.PRNGKey(0)
    k_param, k_hid, k_enc = jax.random.split(key, 3)

    params = init_params(k_param)
    hidden = jax.random.normal(k_hid, (B, SEQ, DIM), dtype=jnp.float32)
    encoder_hidden = jax.random.normal(k_enc, (B, ENC_SEQ, DIM), dtype=jnp.float32)
    rotary = make_rotary(SEQ, HEAD_DIM)   # TODO(synk): interleaved-pair rotary applied
    # after qk-norm, matching the previously accepted convention for this block.

    fwd = jax.jit(raiflow_block, static_argnums=(4, 5))
    out = fwd(params, hidden, encoder_hidden, rotary, HEIGHT, WIDTH)
    out = jax.block_until_ready(out)

    assert out.shape == (B, SEQ, DIM)
    assert bool(jnp.all(jnp.isfinite(out)))
    print("KERNEL_OK")
</pallas_src>

<mosaic_0001>
module attributes {stable_mosaic.version = 11 : i64} {
  func.func @_fused_block_kernel(%arg0: memref<32x32xf32, #tpu.memory_space<vmem>>, %arg1: memref<16x32xf32, #tpu.memory_space<vmem>>, %arg2: memref<29x128xf32, #tpu.memory_space<vmem>>, %arg3: memref<7x64x128xbf16, #tpu.memory_space<vmem>>, %arg4: memref<32x32xbf16, #tpu.memory_space<vmem>>, %arg5: memref<9x32x32xbf16, #tpu.memory_space<vmem>>, %arg6: memref<448x32xf32, #tpu.memory_space<vmem>>, %arg7: memref<64x1152xbf16, #tpu.memory_space<vmem>>, %arg8: memref<128x1152xbf16, #tpu.memory_space<vmem>>, %arg9: memref<32x32xf32, #tpu.memory_space<vmem>>) attributes {dimension_semantics = [], scalar_prefetch = 0 : i64, scratch_operands = 0 : i64, tpu.core_type = #tpu.core_type<tc>} {
    %c0 = arith.constant 0 : index
    %c0_0 = arith.constant 0 : index
    %0 = vector.load %arg0[%c0, %c0_0] : memref<32x32xf32, #tpu.memory_space<vmem>>, vector<32x32xf32>
    %c0_1 = arith.constant 0 : index
    %c0_2 = arith.constant 0 : index
    %1 = vector.load %arg1[%c0_1, %c0_2] : memref<16x32xf32, #tpu.memory_space<vmem>>, vector<16x32xf32>
    %c0_3 = arith.constant 0 : index
    %c0_4 = arith.constant 0 : index
    %2 = vector.load %arg6[%c0_3, %c0_4] : memref<448x32xf32, #tpu.memory_space<vmem>>, vector<32x32xf32>
    %c32 = arith.constant 32 : index
    %c0_5 = arith.constant 0 : index
    %3 = vector.load %arg6[%c32, %c0_5] : memref<448x32xf32, #tpu.memory_space<vmem>>, vector<32x32xf32>
    %c64 = arith.constant 64 : index
    %c0_6 = arith.constant 0 : index
    %4 = vector.load %arg6[%c64, %c0_6] : memref<448x32xf32, #tpu.memory_space<vmem>>, vector<128x32xf32>
    %c192 = arith.constant 192 : index
    %c0_7 = arith.constant 0 : index
    %5 = vector.load %arg6[%c192, %c0_7] : memref<448x32xf32, #tpu.memory_space<vmem>>, vector<128x32xf32>
    %c320 = arith.constant 320 : index
    %c0_8 = arith.constant 0 : index
    %6 = vector.load %arg6[%c320, %c0_8] : memref<448x32xf32, #tpu.memory_space<vmem>>, vector<128x16xf32>
    %c0_9 = arith.constant 0 : index
    %c0_10 = arith.constant 0 : index
    %7 = vector.load %arg4[%c0_9, %c0_10] : memref<32x32xbf16, #tpu.memory_space<vmem>>, vector<32x32xbf16>
    %c0_11 = arith.constant 0 : index
    %c0_12 = arith.constant 0 : index
    %8 = vector.load %arg2[%c0_11, %c0_12] : memref<29x128xf32, #tpu.memory_space<vmem>>, vector<1x32xf32>
    %cst = arith.constant 2.000000e-01 : f32
    %9 = vector.broadcast %cst : f32 to vector<32x32xf32>
    %10 = arith.mulf %9, %0 : vector<32x32xf32>
    %11 = math.tanh %10 : vector<32x32xf32>
    %12 = vector.broadcast %8 : vector<1x32xf32> to vector<32x32xf32>
    %13 = arith.mulf %12, %11 : vector<32x32xf32>
    %c1 = arith.constant 1 : index
    %c0_13 = arith.constant 0 : index
    %14 = vector.load %arg2[%c1, %c0_13] : memref<29x128xf32, #tpu.memory_space<vmem>>, vector<1x32xf32>
    %15 = vector.broadcast %14 : vector<1x32xf32> to vector<32x32xf32>
    %16 = arith.addf %13, %15 : vector<32x32xf32>
    %c0_14 = arith.constant 0 : index
    %c0_15 = arith.constant 0 : index
    %c0_16 = arith.constant 0 : index
    %17 = vector.load %arg3[%c0_14, %c0_15, %c0_16] : memref<7x64x128xbf16, #tpu.memory_space<vmem>>, vector<1x32x32xbf16>
    %18 = vector.shape_cast %17 : vector<1x32x32xbf16> to vector<32x32xbf16>
    %19 = arith.truncf %16 : vector<32x32xf32> to vector<32x32xbf16>
    %cst_17 = arith.constant dense<0.000000e+00> : vector<32x32xf32>
    %20 = tpu.matmul %19, %18, %cst_17 {dimension_numbers = #tpu.dot_dimension_numbers<[1], [0], [0], [1], [0, 0, 1, 1], [], []>} : vector<32x32xbf16>, vector<32x32xbf16>, vector<32x32xf32> -> vector<32x32xf32>
    %c12 = arith.constant 12 : index
    %c0_18 = arith.constant 0 : index
    %21 = vector.load %arg2[%c12, %c0_18] : memref<29x128xf32, #tpu.memory_space<vmem>>, vector<1x32xf32>
    %22 = vector.broadcast %21 : vector<1x32xf32> to vector<32x32xf32>
    %23 = arith.addf %20, %22 : vector<32x32xf32>
    %c1_19 = arith.constant 1 : index
    %c0_20 = arith.constant 0 : index
    %c0_21 = arith.constant 0 : index
    %24 = vector.load %arg3[%c1_19, %c0_20, %c0_21] : memref<7x64x128xbf16, #tpu.memory_space<vmem>>, vector<1x32x64xbf16>
    %25 = vector.shape_cast %24 : vector<1x32x64xbf16> to vector<32x64xbf16>
    %26 = arith.truncf %1 : vector<16x32xf32> to vector<16x32xbf16>
    %cst_22 = arith.constant dense<0.000000e+00> : vector<16x64xf32>
    %27 = tpu.matmul %26, %25, %cst_22 {dimension_numbers = #tpu.dot_dimension_numbers<[1], [0], [0], [1], [0, 0, 1, 1], [], []>} : vector<16x32xbf16>, vector<32x64xbf16>, vector<16x64xf32> -> vector<16x64xf32>
    %c13 = arith.constant 13 : index
    %c0_23 = arith.constant 0 : index
    %28 = vector.load %arg2[%c13, %c0_23] : memref<29x128xf32, #tpu.memory_space<vmem>>, vector<1x64xf32>
    %29 = vector.broadcast %28 : vector<1x64xf32> to vector<16x64xf32>
    %30 = arith.addf %27, %29 : vector<16x64xf32>
    %31 = vector.extract_strided_slice %30 {offsets = [0, 0], sizes = [16, 32], strides = [1, 1]} : vector<16x64xf32> to vector<16x32xf32>
    %32 = vector.extract_strided_slice %30 {offsets = [0, 32], sizes = [16, 32], strides = [1, 1]} : vector<16x64xf32> to vector<16x32xf32>
    %c17 = arith.constant 17 : index
    %c0_24 = arith.constant 0 : index
    %33 = vector.load %arg2[%c17, %c0_24] : memref<29x128xf32, #tpu.memory_space<vmem>>, vector<1x32xf32>
    %cst_25 = arith.constant 2.000000e-01 : f32
    %34 = vector.broadcast %cst_25 : f32 to vector<32x32xf32>
    %35 = arith.mulf %34, %23 : vector<32x32xf32>
    %36 = math.tanh %35 : vector<32x32xf32>
    %37 = vector.broadcast %33 : vector<1x32xf32> to vector<32x32xf32>
    %38 = arith.mulf %37, %36 : vector<32x32xf32>
    %c18 = arith.constant 18 : index
    %c0_26 = arith.constant 0 : index
    %39 = vector.load %arg2[%c18, %c0_26] : memref<29x128xf32, #tpu.memory_space<vmem>>, vector<1x32xf32>
    %40 = vector.broadcast %39 : vector<1x32xf32> to vector<32x32xf32>
    %41 = arith.addf %38, %40 : vector<32x32xf32>
    %c19 = arith.constant 19 : index
    %c0_27 = arith.constant 0 : index
    %42 = vector.load %arg2[%c19, %c0_27] : memref<29x128xf32, #tpu.memory_space<vmem>>, vector<1x32xf32>
    %cst_28 = arith.constant 2.000000e-01 : f32
    %43 = vector.broadcast %cst_28 : f32 to vector<16x32xf32>
    %44 = arith.mulf %43, %31 : vector<16x32xf32>
    %45 = math.tanh %44 : vector<16x32xf32>
    %46 = vector.broadcast %42 : vector<1x32xf32> to vector<16x32xf32>
    %47 = arith.mulf %46, %45 : vector<16x32xf32>
    %c20 = arith.constant 20 : index
    %c0_29 = arith.constant 0 : index
    %48 = vector.load %arg2[%c20, %c0_29] : memref<29x128xf32, #tpu.memory_space<vmem>>, vector<1x32xf32>
    %49 = vector.broadcast %48 : vector<1x32xf32> to vector<16x32xf32>
    %50 = arith.addf %47, %49 : vector<16x32xf32>
    %51 = tpu.concatenate %41, %41, %41, %41 in 0 : vector<32x32xf32>, vector<32x32xf32>, vector<32x32xf32>, vector<32x32xf32> -> vector<128x32xf32>
    %52 = arith.mulf %51, %4 : vector<128x32xf32>
    %53 = arith.truncf %52 : vector<128x32xf32> to vector<128x32xbf16>
    %54 = arith.truncf %50 : vector<16x32xf32> to vector<16x32xbf16>
    %cst_30 = arith.constant dense<0.000000e+00> : vector<128x16xf32>
    %55 = tpu.matmul %53, %54, %cst_30 {dimension_numbers = #tpu.dot_dimension_numbers<[1], [1], [0], [0], [0, 0, 1, 0], [], []>} : vector<128x32xbf16>, vector<16x32xbf16>, vector<128x16xf32> -> vector<128x16xf32>
    %cst_31 = arith.constant 0.353553385 : f32
    %56 = vector.broadcast %cst_31 : f32 to vector<128x16xf32>
    %57 = arith.mulf %55, %56 : vector<128x16xf32>
    %58 = arith.addf %57, %6 : vector<128x16xf32>
    %cst_32 = arith.constant dense<0xFF800000> : vector<128xf32>
    %59 = vector.multi_reduction <maximumf>, %58, %cst_32 [1] : vector<128x16xf32> to vector<128xf32>
    %60 = vector.shape_cast %59 : vector<128xf32> to vector<128x1xf32>
    %61 = vector.broadcast %60 : vector<128x1xf32> to vector<128x16xf32>
    %62 = arith.subf %58, %61 : vector<128x16xf32>
    %63 = math.exp %62 : vector<128x16xf32>
    %cst_33 = arith.constant dense<0.000000e+00> : vector<128xf32>
    %64 = vector.multi_reduction <add>, %63, %cst_33 [1] : vector<128x16xf32> to vector<128xf32>
    %65 = vector.shape_cast %64 : vector<128xf32> to vector<128x1xf32>
    %66 = vector.broadcast %65 : vector<128x1xf32> to vector<128x16xf32>
    %67 = arith.divf %63, %66 : vector<128x16xf32>
    %68 = arith.truncf %67 : vector<128x16xf32> to vector<128x16xbf16>
    %69 = arith.truncf %32 : vector<16x32xf32> to vector<16x32xbf16>
    %cst_34 = arith.constant dense<0.000000e+00> : vector<128x32xf32>
    %70 = tpu.matmul %68, %69, %cst_34 {dimension_numbers = #tpu.dot_dimension_numbers<[1], [0], [0], [1], [0, 0, 1, 1], [], []>} : vector<128x16xbf16>, vector<16x32xbf16>, vector<128x32xf32> -> vector<128x32xf32>
    %71 = arith.mulf %70, %4 : vector<128x32xf32>
    %72 = vector.extract_strided_slice %71 {offsets = [0, 0], sizes = [32, 32], strides = [1, 1]} : vector<128x32xf32> to vector<32x32xf32>
    %73 = vector.extract_strided_slice %71 {offsets = [32, 0], sizes = [32, 32], strides = [1, 1]} : vector<128x32xf32> to vector<32x32xf32>
    %74 = arith.addf %72, %73 : vector<32x32xf32>
    %75 = vector.extract_strided_slice %71 {offsets = [64, 0], sizes = [32, 32], strides = [1, 1]} : vector<128x32xf32> to vector<32x32xf32>
    %76 = arith.addf %74, %75 : vector<32x32xf32>
    %77 = vector.extract_strided_slice %71 {offsets = [96, 0], sizes = [32, 32], strides = [1, 1]} : vector<128x32xf32> to vector<32x32xf32>
    %78 = arith.addf %76, %77 : vector<32x32xf32>
    %c2 = arith.constant 2 : index
    %c0_35 = arith.constant 0 : index
    %c0_36 = arith.constant 0 : index
    %79 = vector.load %arg3[%c2, %c0_35, %c0_36] : memref<7x64x128xbf16, #tpu.memory_space<vmem>>, vector<1x32x32xbf16>
    %80 = vector.shape_cast %79 : vector<1x32x32xbf16> to vector<32x32xbf16>
    %81 = arith.truncf %78 : vector<32x32xf32> to vector<32x32xbf16>
    %cst_37 = arith.constant dense<0.000000e+00> : vector<32x32xf32>
    %82 = tpu.matmul %81, %80, %cst_37 {dimension_numbers = #tpu.dot_dimension_numbers<[1], [0], [0], [1], [0, 0, 1, 1], [], []>} : vector<32x32xbf16>, vector<32x32xbf16>, vector<32x32xf32> -> vector<32x32xf32>
    %c14 = arith.constant 14 : index
    %c0_38 = arith.constant 0 : index
    %83 = vector.load %arg2[%c14, %c0_38] : memref<29x128xf32, #tpu.memory_space<vmem>>, vector<1x32xf32>
    %84 = vector.broadcast %83 : vector<1x32xf32> to vector<32x32xf32>
    %85 = arith.addf %82, %84 : vector<32x32xf32>
    %c7 = arith.constant 7 : index
    %c0_39 = arith.constant 0 : index
    %86 = vector.load %arg2[%c7, %c0_39] : memref<29x128xf32, #tpu.memory_space<vmem>>, vector<1x32xf32>
    %c6 = arith.constant 6 : index
    %c0_40 = arith.constant 0 : index
    %87 = vector.load %arg2[%c6, %c0_40] : memref<29x128xf32, #tpu.memory_space<vmem>>, vector<1x32xf32>
    %88 = vector.broadcast %87 : vector<1x32xf32> to vector<32x32xf32>
    %89 = arith.mulf %85, %88 : vector<32x32xf32>
    %90 = vector.broadcast %86 : vector<1x32xf32> to vector<32x32xf32>
    %91 = arith.addf %90, %89 : vector<32x32xf32>
    %92 = arith.addf %0, %91 : vector<32x32xf32>
    %c2_41 = arith.constant 2 : index
    %c0_42 = arith.constant 0 : index
    %93 = vector.load %arg2[%c2_41, %c0_42] : memref<29x128xf32, #tpu.memory_space<vmem>>, vector<1x32xf32>
    %cst_43 = arith.constant 2.000000e-01 : f32
    %94 = vector.broadcast %cst_43 : f32 to vector<32x32xf32>
    %95 = arith.mulf %94, %92 : vector<32x32xf32>
    %96 = math.tanh %95 : vector<32x32xf32>
    %97 = vector.broadcast %93 : vector<1x32xf32> to vector<32x32xf32>
    %98 = arith.mulf %97, %96 : vector<32x32xf32>
    %c3 = arith.constant 3 : index
    %c0_44 = arith.constant 0 : index
    %99 = vector.load %arg2[%c3, %c0_44] : memref<29x128xf32, #tpu.memory_space<vmem>>, vector<1x32xf32>
    %100 = vector.broadcast %99 : vector<1x32xf32> to vector<32x32xf32>
    %101 = arith.addf %98, %100 : vector<32x32xf32>
    %c3_45 = arith.constant 3 : index
    %c0_46 = arith.constant 0 : index
    %c0_47 = arith.constant 0 : index
    %102 = vector.load %arg3[%c3_45, %c0_46, %c0_47] : memref<7x64x128xbf16, #tpu.memory_space<vmem>>, vector<1x32x96xbf16>
    %103 = vector.shape_cast %102 : vector<1x32x96xbf16> to vector<32x96xbf16>
    %104 = arith.truncf %101 : vector<32x32xf32> to vector<32x32xbf16>
    %cst_48 = arith.constant dense<0.000000e+00> : vector<32x96xf32>
    %105 = tpu.matmul %104, %103, %cst_48 {dimension_numbers = #tpu.dot_dimension_numbers<[1], [0], [0], [1], [0, 0, 1, 1], [], []>} : vector<32x32xbf16>, vector<32x96xbf16>, vector<32x96xf32> -> vector<32x96xf32>
    %c15 = arith.constant 15 : index
    %c0_49 = arith.constant 0 : index
    %106 = vector.load %arg2[%c15, %c0_49] : memref<29x128xf32, #tpu.memory_space<vmem>>, vector<1x96xf32>
    %107 = vector.broadcast %106 : vector<1x96xf32> to vector<32x96xf32>
    %108 = arith.addf %105, %107 : vector<32x96xf32>
    %109 = vector.extract_strided_slice %108 {offsets = [0, 0], sizes = [32, 32], strides = [1, 1]} : vector<32x96xf32> to vector<32x32xf32>
    %110 = vector.extract_strided_slice %108 {offsets = [0, 32], sizes = [32, 32], strides = [1, 1]} : vector<32x96xf32> to vector<32x32xf32>
    %111 = vector.extract_strided_slice %108 {offsets = [0, 64], sizes = [32, 32], strides = [1, 1]} : vector<32x96xf32> to vector<32x32xf32>
    %c21 = arith.constant 21 : index
    %c0_50 = arith.constant 0 : index
    %112 = vector.load %arg2[%c21, %c0_50] : memref<29x128xf32, #tpu.memory_space<vmem>>, vector<1x32xf32>
    %cst_51 = arith.constant 2.000000e-01 : f32
    %113 = vector.broadcast %cst_51 : f32 to vector<32x32xf32>
    %114 = arith.mulf %113, %109 : vector<32x32xf32>
    %115 = math.tanh %114 : vector<32x32xf32>
    %116 = vector.broadcast %112 : vector<1x32xf32> to vector<32x32xf32>
    %117 = arith.mulf %116, %115 : vector<32x32xf32>
    %c22 = arith.constant 22 : index
    %c0_52 = arith.constant 0 : index
    %118 = vector.load %arg2[%c22, %c0_52] : memref<29x128xf32, #tpu.memory_space<vmem>>, vector<1x32xf32>
    %119 = vector.broadcast %118 : vector<1x32xf32> to vector<32x32xf32>
    %120 = arith.addf %117, %119 : vector<32x32xf32>
    %c23 = arith.constant 23 : index
    %c0_53 = arith.constant 0 : index
    %121 = vector.load %arg2[%c23, %c0_53] : memref<29x128xf32, #tpu.memory_space<vmem>>, vector<1x32xf32>
    %cst_54 = arith.constant 2.000000e-01 : f32
    %122 = vector.broadcast %cst_54 : f32 to vector<32x32xf32>
    %123 = arith.mulf %122, %110 : vector<32x32xf32>
    %124 = math.tanh %123 : vector<32x32xf32>
    %125 = vector.broadcast %121 : vector<1x32xf32> to vector<32x32xf32>
    %126 = arith.mulf %125, %124 : vector<32x32xf32>
    %c24 = arith.constant 24 : index
    %c0_55 = arith.constant 0 : index
    %127 = vector.load %arg2[%c24, %c0_55] : memref<29x128xf32, #tpu.memory_space<vmem>>, vector<1x32xf32>
    %128 = vector.broadcast %127 : vector<1x32xf32> to vector<32x32xf32>
    %129 = arith.addf %126, %128 : vector<32x32xf32>
    %130 = arith.mulf %120, %2 : vector<32x32xf32>
    %131 = arith.truncf %120 : vector<32x32xf32> to vector<32x32xbf16>
    %cst_56 = arith.constant dense<0.000000e+00> : vector<32x32xf32>
    %132 = tpu.matmul %131, %7, %cst_56 {dimension_numbers = #tpu.dot_dimension_numbers<[1], [0], [0], [1], [0, 0, 1, 1], [], []>} : vector<32x32xbf16>, vector<32x32xbf16>, vector<32x32xf32> -> vector<32x32xf32>
    %133 = arith.mulf %132, %3 : vector<32x32xf32>
    %134 = arith.addf %130, %133 : vector<32x32xf32>
    %135 = arith.mulf %129, %2 : vector<32x32xf32>
    %136 = arith.truncf %129 : vector<32x32xf32> to vector<32x32xbf16>
    %cst_57 = arith.constant dense<0.000000e+00> : vector<32x32xf32>
    %137 = tpu.matmul %136, %7, %cst_57 {dimension_numbers = #tpu.dot_dimension_numbers<[1], [0], [0], [1], [0, 0, 1, 1], [], []>} : vector<32x32xbf16>, vector<32x32xbf16>, vector<32x32xf32> -> vector<32x32xf32>
    %138 = arith.mulf %137, %3 : vector<32x32xf32>
    %139 = arith.addf %135, %138 : vector<32x32xf32>
    %140 = tpu.concatenate %134, %134, %134, %134 in 0 : vector<32x32xf32>, vector<32x32xf32>, vector<32x32xf32>, vector<32x32xf32> -> vector<128x32xf32>
    %141 = arith.mulf %140, %4 : vector<128x32xf32>
    %142 = arith.truncf %141 : vector<128x32xf32> to vector<128x32xbf16>
    %143 = arith.truncf %139 : vector<32x32xf32> to vector<32x32xbf16>
    %cst_58 = arith.constant dense<0.000000e+00> : vector<128x32xf32>
    %144 = tpu.matmul %142, %143, %cst_58 {dimension_numbers = #tpu.dot_dimension_numbers<[1], [1], [0], [0], [0, 0, 1, 0], [], []>} : vector<128x32xbf16>, vector<32x32xbf16>, vector<128x32xf32> -> vector<128x32xf32>
    %cst_59 = arith.constant 0.353553385 : f32
    %145 = vector.broadcast %cst_59 : f32 to vector<128x32xf32>
    %146 = arith.mulf %144, %145 : vector<128x32xf32>
    %147 = arith.addf %146, %5 : vector<128x32xf32>
    %cst_60 = arith.constant dense<0xFF800000> : vector<128xf32>
    %148 = vector.multi_reduction <maximumf>, %147, %cst_60 [1] : vector<128x32xf32> to vector<128xf32>
    %149 = vector.shape_cast %148 : vector<128xf32> to vector<128x1xf32>
    %150 = vector.broadcast %149 : vector<128x1xf32> to vector<128x32xf32>
    %151 = arith.subf %147, %150 : vector<128x32xf32>
    %152 = math.exp %151 : vector<128x32xf32>
    %cst_61 = arith.constant dense<0.000000e+00> : vector<128xf32>
    %153 = vector.multi_reduction <add>, %152, %cst_61 [1] : vector<128x32xf32> to vector<128xf32>
    %154 = vector.shape_cast %153 : vector<128xf32> to vector<128x1xf32>
    %155 = vector.broadcast %154 : vector<128x1xf32> to vector<128x32xf32>
    %156 = arith.divf %152, %155 : vector<128x32xf32>
    %157 = arith.truncf %156 : vector<128x32xf32> to vector<128x32xbf16>
    %158 = arith.truncf %111 : vector<32x32xf32> to vector<32x32xbf16>
    %cst_62 = arith.constant dense<0.000000e+00> : vector<128x32xf32>
    %159 = tpu.matmul %157, %158, %cst_62 {dimension_numbers = #tpu.dot_dimension_numbers<[1], [0], [0], [1], [0, 0, 1, 1], [], []>} : vector<128x32xbf16>, vector<32x32xbf16>, vector<128x32xf32> -> vector<128x32xf32>
    %160 = arith.mulf %159, %4 : vector<128x32xf32>
    %161 = vector.extract_strided_slice %160 {offsets = [0, 0], sizes = [32, 32], strides = [1, 1]} : vector<128x32xf32> to vector<32x32xf32>
    %162 = vector.extract_strided_slice %160 {offsets = [32, 0], sizes = [32, 32], strides = [1, 1]} : vector<128x32xf32> to vector<32x32xf32>
    %163 = arith.addf %161, %162 : vector<32x32xf32>
    %164 = vector.extract_strided_slice %160 {offsets = [64, 0], sizes = [32, 32], strides = [1, 1]} : vector<128x32xf32> to vector<32x32xf32>
    %165 = arith.addf %163, %164 : vector<32x32xf32>
    %166 = vector.extract_strided_slice %160 {offsets = [96, 0], sizes = [32, 32], strides = [1, 1]} : vector<128x32xf32> to vector<32x32xf32>
    %167 = arith.addf %165, %166 : vector<32x32xf32>
    %c4 = arith.constant 4 : index
    %c0_63 = arith.constant 0 : index
    %c0_64 = arith.constant 0 : index
    %168 = vector.load %arg3[%c4, %c0_63, %c0_64] : memref<7x64x128xbf16, #tpu.memory_space<vmem>>, vector<1x32x32xbf16>
    %169 = vector.shape_cast %168 : vector<1x32x32xbf16> to vector<32x32xbf16>
    %170 = arith.truncf %167 : vector<32x32xf32> to vector<32x32xbf16>
    %cst_65 = arith.constant dense<0.000000e+00> : vector<32x32xf32>
    %171 = tpu.matmul %170, %169, %cst_65 {dimension_numbers = #tpu.dot_dimension_numbers<[1], [0], [0], [1], [0, 0, 1, 1], [], []>} : vector<32x32xbf16>, vector<32x32xbf16>, vector<32x32xf32> -> vector<32x32xf32>
    %c16 = arith.constant 16 : index
    %c0_66 = arith.constant 0 : index
    %172 = vector.load %arg2[%c16, %c0_66] : memref<29x128xf32, #tpu.memory_space<vmem>>, vector<1x32xf32>
    %173 = vector.broadcast %172 : vector<1x32xf32> to vector<32x32xf32>
    %174 = arith.addf %171, %173 : vector<32x32xf32>
    %c9 = arith.constant 9 : index
    %c0_67 = arith.constant 0 : index
    %175 = vector.load %arg2[%c9, %c0_67] : memref<29x128xf32, #tpu.memory_space<vmem>>, vector<1x32xf32>
    %c8 = arith.constant 8 : index
    %c0_68 = arith.constant 0 : index
    %176 = vector.load %arg2[%c8, %c0_68] : memref<29x128xf32, #tpu.memory_space<vmem>>, vector<1x32xf32>
    %177 = vector.broadcast %176 : vector<1x32xf32> to vector<32x32xf32>
    %178 = arith.mulf %174, %177 : vector<32x32xf32>
    %179 = vector.broadcast %175 : vector<1x32xf32> to vector<32x32xf32>
    %180 = arith.addf %179, %178 : vector<32x32xf32>
    %181 = arith.addf %92, %180 : vector<32x32xf32>
    %c4_69 = arith.constant 4 : index
    %c0_70 = arith.constant 0 : index
    %182 = vector.load %arg2[%c4_69, %c0_70] : memref<29x128xf32, #tpu.memory_space<vmem>>, vector<1x32xf32>
    %cst_71 = arith.constant 2.000000e-01 : f32
    %183 = vector.broadcast %cst_71 : f32 to vector<32x32xf32>
    %184 = arith.mulf %183, %181 : vector<32x32xf32>
    %185 = math.tanh %184 : vector<32x32xf32>
    %186 = vector.broadcast %182 : vector<1x32xf32> to vector<32x32xf32>
    %187 = arith.mulf %186, %185 : vector<32x32xf32>
    %c5 = arith.constant 5 : index
    %c0_72 = arith.constant 0 : index
    %188 = vector.load %arg2[%c5, %c0_72] : memref<29x128xf32, #tpu.memory_space<vmem>>, vector<1x32xf32>
    %189 = vector.broadcast %188 : vector<1x32xf32> to vector<32x32xf32>
    %190 = arith.addf %187, %189 : vector<32x32xf32>
    %c5_73 = arith.constant 5 : index
    %c0_74 = arith.constant 0 : index
    %c0_75 = arith.constant 0 : index
    %191 = vector.load %arg3[%c5_73, %c0_74, %c0_75] : memref<7x64x128xbf16, #tpu.memory_space<vmem>>, vector<1x32x64xbf16>
    %192 = vector.shape_cast %191 : vector<1x32x64xbf16> to vector<32x64xbf16>
    %193 = arith.truncf %190 : vector<32x32xf32> to vector<32x32xbf16>
    %cst_76 = arith.constant dense<0.000000e+00> : vector<32x64xf32>
    %194 = tpu.matmul %193, %192, %cst_76 {dimension_numbers = #tpu.dot_dimension_numbers<[1], [0], [0], [1], [0, 0, 1, 1], [], []>} : vector<32x32xbf16>, vector<32x64xbf16>, vector<32x64xf32> -> vector<32x64xf32>
    %c25 = arith.constant 25 : index
    %c0_77 = arith.constant 0 : index
    %195 = vector.load %arg2[%c25, %c0_77] : memref<29x128xf32, #tpu.memory_space<vmem>>, vector<1x64xf32>
    %196 = vector.broadcast %195 : vector<1x64xf32> to vector<32x64xf32>
    %197 = arith.addf %194, %196 : vector<32x64xf32>
    %cst_78 = arith.constant 5.000000e-01 : f32
    %198 = vector.broadcast %cst_78 : f32 to vector<32x64xf32>
    %199 = arith.mulf %198, %197 : vector<32x64xf32>
    %cst_79 = arith.constant 4.471500e-02 : f32
    %200 = vector.broadcast %cst_79 : f32 to vector<32x64xf32>
    %201 = arith.mulf %200, %197 : vector<32x64xf32>
    %202 = arith.mulf %201, %197 : vector<32x64xf32>
    %203 = arith.mulf %202, %197 : vector<32x64xf32>
    %204 = arith.addf %197, %203 : vector<32x64xf32>
    %cst_80 = arith.constant 0.797884583 : f32
    %205 = vector.broadcast %cst_80 : f32 to vector<32x64xf32>
    %206 = arith.mulf %205, %204 : vector<32x64xf32>
    %207 = math.tanh %206 : vector<32x64xf32>
    %cst_81 = arith.constant 1.000000e+00 : f32
    %208 = vector.broadcast %cst_81 : f32 to vector<32x64xf32>
    %209 = arith.addf %208, %207 : vector<32x64xf32>
    %210 = arith.mulf %199, %209 : vector<32x64xf32>
    %c0_82 = arith.constant 0 : index
    %c0_83 = arith.constant 0 : index
    %211 = vector.load %arg7[%c0_82, %c0_83] : memref<64x1152xbf16, #tpu.memory_space<vmem>>, vector<64x1152xbf16>
    %212 = arith.truncf %210 : vector<32x64xf32> to vector<32x64xbf16>
    %cst_84 = arith.constant dense<0.000000e+00> : vector<32x1152xf32>
    %213 = tpu.matmul %212, %211, %cst_84 {dimension_numbers = #tpu.dot_dimension_numbers<[1], [0], [0], [1], [0, 0, 1, 1], [], []>} : vector<32x64xbf16>, vector<64x1152xbf16>, vector<32x1152xf32> -> vector<32x1152xf32>
    %cst_85 = arith.constant 0.000000e+00 : f32
    %214 = vector.broadcast %cst_85 : f32 to vector<32x128xf32>
    %c26 = arith.constant 26 : index
    %c0_86 = arith.constant 0 : index
    %215 = vector.load %arg2[%c26, %c0_86] : memref<29x128xf32, #tpu.memory_space<vmem>>, vector<1x128xf32>
    %216 = vector.broadcast %215 : vector<1x128xf32> to vector<32x128xf32>
    %217 = arith.addf %214, %216 : vector<32x128xf32>
    %c0_87 = arith.constant 0 : index
    %c0_88 = arith.constant 0 : index
    %c0_89 = arith.constant 0 : index
    %218 = vector.load %arg5[%c0_87, %c0_88, %c0_89] : memref<9x32x32xbf16, #tpu.memory_space<vmem>>, vector<1x32x32xbf16>
    %219 = vector.shape_cast %218 : vector<1x32x32xbf16> to vector<32x32xbf16>
    %220 = vector.extract_strided_slice %213 {offsets = [0, 0], sizes = [32, 128], strides = [1, 1]} : vector<32x1152xf32> to vector<32x128xf32>
    %221 = arith.truncf %220 : vector<32x128xf32> to vector<32x128xbf16>
    %cst_90 = arith.constant dense<0.000000e+00> : vector<32x128xf32>
    %222 = tpu.matmul %219, %221, %cst_90 {dimension_numbers = #tpu.dot_dimension_numbers<[1], [0], [0], [1], [0, 0, 1, 1], [], []>} : vector<32x32xbf16>, vector<32x128xbf16>, vector<32x128xf32> -> vector<32x128xf32>
    %223 = arith.addf %217, %222 : vector<32x128xf32>
    %c1_91 = arith.constant 1 : index
    %c0_92 = arith.constant 0 : index
    %c0_93 = arith.constant 0 : index
    %224 = vector.load %arg5[%c1_91, %c0_92, %c0_93] : memref<9x32x32xbf16, #tpu.memory_space<vmem>>, vector<1x32x32xbf16>
    %225 = vector.shape_cast %224 : vector<1x32x32xbf16> to vector<32x32xbf16>
    %226 = vector.extract_strided_slice %213 {offsets = [0, 128], sizes = [32, 128], strides = [1, 1]} : vector<32x1152xf32> to vector<32x128xf32>
    %227 = arith.truncf %226 : vector<32x128xf32> to vector<32x128xbf16>
    %cst_94 = arith.constant dense<0.000000e+00> : vector<32x128xf32>
    %228 = tpu.matmul %225, %227, %cst_94 {dimension_numbers = #tpu.dot_dimension_numbers<[1], [0], [0], [1], [0, 0, 1, 1], [], []>} : vector<32x32xbf16>, vector<32x128xbf16>, vector<32x128xf32> -> vector<32x128xf32>
    %229 = arith.addf %223, %228 : vector<32x128xf32>
    %c2_95 = arith.constant 2 : index
    %c0_96 = arith.constant 0 : index
    %c0_97 = arith.constant 0 : index
    %230 = vector.load %arg5[%c2_95, %c0_96, %c0_97] : memref<9x32x32xbf16, #tpu.memory_space<vmem>>, vector<1x32x32xbf16>
    %231 = vector.shape_cast %230 : vector<1x32x32xbf16> to vector<32x32xbf16>
    %232 = vector.extract_strided_slice %213 {offsets = [0, 256], sizes = [32, 128], strides = [1, 1]} : vector<32x1152xf32> to vector<32x128xf32>
    %233 = arith.truncf %232 : vector<32x128xf32> to vector<32x128xbf16>
    %cst_98 = arith.constant dense<0.000000e+00> : vector<32x128xf32>
    %234 = tpu.matmul %231, %233, %cst_98 {dimension_numbers = #tpu.dot_dimension_numbers<[1], [0], [0], [1], [0, 0, 1, 1], [], []>} : vector<32x32xbf16>, vector<32x128xbf16>, vector<32x128xf32> -> vector<32x128xf32>
    %235 = arith.addf %229, %234 : vector<32x128xf32>
    %c3_99 = arith.constant 3 : index
    %c0_100 = arith.constant 0 : index
    %c0_101 = arith.constant 0 : index
    %236 = vector.load %arg5[%c3_99, %c0_100, %c0_101] : memref<9x32x32xbf16, #tpu.memory_space<vmem>>, vector<1x32x32xbf16>
    %237 = vector.shape_cast %236 : vector<1x32x32xbf16> to vector<32x32xbf16>
    %238 = vector.extract_strided_slice %213 {offsets = [0, 384], sizes = [32, 128], strides = [1, 1]} : vector<32x1152xf32> to vector<32x128xf32>
    %239 = arith.truncf %238 : vector<32x128xf32> to vector<32x128xbf16>
    %cst_102 = arith.constant dense<0.000000e+00> : vector<32x128xf32>
    %240 = tpu.matmul %237, %239, %cst_102 {dimension_numbers = #tpu.dot_dimension_numbers<[1], [0], [0], [1], [0, 0, 1, 1], [], []>} : vector<32x32xbf16>, vector<32x128xbf16>, vector<32x128xf32> -> vector<32x128xf32>
    %241 = arith.addf %235, %240 : vector<32x128xf32>
    %c4_103 = arith.constant 4 : index
    %c0_104 = arith.constant 0 : index
    %c0_105 = arith.constant 0 : index
    %242 = vector.load %arg5[%c4_103, %c0_104, %c0_105] : memref<9x32x32xbf16, #tpu.memory_space<vmem>>, vector<1x32x32xbf16>
    %243 = vector.shape_cast %242 : vector<1x32x32xbf16> to vector<32x32xbf16>
    %244 = vector.extract_strided_slice %213 {offsets = [0, 512], sizes = [32, 128], strides = [1, 1]} : vector<32x1152xf32> to vector<32x128xf32>
    %245 = arith.truncf %244 : vector<32x128xf32> to vector<32x128xbf16>
    %cst_106 = arith.constant dense<0.000000e+00> : vector<32x128xf32>
    %246 = tpu.matmul %243, %245, %cst_106 {dimension_numbers = #tpu.dot_dimension_numbers<[1], [0], [0], [1], [0, 0, 1, 1], [], []>} : vector<32x32xbf16>, vector<32x128xbf16>, vector<32x128xf32> -> vector<32x128xf32>
    %247 = arith.addf %241, %246 : vector<32x128xf32>
    %c5_107 = arith.constant 5 : index
    %c0_108 = arith.constant 0 : index
    %c0_109 = arith.constant 0 : index
    %248 = vector.load %arg5[%c5_107, %c0_108, %c0_109] : memref<9x32x32xbf16, #tpu.memory_space<vmem>>, vector<1x32x32xbf16>
    %249 = vector.shape_cast %248 : vector<1x32x32xbf16> to vector<32x32xbf16>
    %250 = vector.extract_strided_slice %213 {offsets = [0, 640], sizes = [32, 128], strides = [1, 1]} : vector<32x1152xf32> to vector<32x128xf32>
    %251 = arith.truncf %250 : vector<32x128xf32> to vector<32x128xbf16>
    %cst_110 = arith.constant dense<0.000000e+00> : vector<32x128xf32>
    %252 = tpu.matmul %249, %251, %cst_110 {dimension_numbers = #tpu.dot_dimension_numbers<[1], [0], [0], [1], [0, 0, 1, 1], [], []>} : vector<32x32xbf16>, vector<32x128xbf16>, vector<32x128xf32> -> vector<32x128xf32>
    %253 = arith.addf %247, %252 : vector<32x128xf32>
    %c6_111 = arith.constant 6 : index
    %c0_112 = arith.constant 0 : index
    %c0_113 = arith.constant 0 : index
    %254 = vector.load %arg5[%c6_111, %c0_112, %c0_113] : memref<9x32x32xbf16, #tpu.memory_space<vmem>>, vector<1x32x32xbf16>
    %255 = vector.shape_cast %254 : vector<1x32x32xbf16> to vector<32x32xbf16>
    %256 = vector.extract_strided_slice %213 {offsets = [0, 768], sizes = [32, 128], strides = [1, 1]} : vector<32x1152xf32> to vector<32x128xf32>
    %257 = arith.truncf %256 : vector<32x128xf32> to vector<32x128xbf16>
    %cst_114 = arith.constant dense<0.000000e+00> : vector<32x128xf32>
    %258 = tpu.matmul %255, %257, %cst_114 {dimension_numbers = #tpu.dot_dimension_numbers<[1], [0], [0], [1], [0, 0, 1, 1], [], []>} : vector<32x32xbf16>, vector<32x128xbf16>, vector<32x128xf32> -> vector<32x128xf32>
    %259 = arith.addf %253, %258 : vector<32x128xf32>
    %c7_115 = arith.constant 7 : index
    %c0_116 = arith.constant 0 : index
    %c0_117 = arith.constant 0 : index
    %260 = vector.load %arg5[%c7_115, %c0_116, %c0_117] : memref<9x32x32xbf16, #tpu.memory_space<vmem>>, vector<1x32x32xbf16>
    %261 = vector.shape_cast %260 : vector<1x32x32xbf16> to vector<32x32xbf16>
    %262 = vector.extract_strided_slice %213 {offsets = [0, 896], sizes = [32, 128], strides = [1, 1]} : vector<32x1152xf32> to vector<32x128xf32>
    %263 = arith.truncf %262 : vector<32x128xf32> to vector<32x128xbf16>
    %cst_118 = arith.constant dense<0.000000e+00> : vector<32x128xf32>
    %264 = tpu.matmul %261, %263, %cst_118 {dimension_numbers = #tpu.dot_dimension_numbers<[1], [0], [0], [1], [0, 0, 1, 1], [], []>} : vector<32x32xbf16>, vector<32x128xbf16>, vector<32x128xf32> -> vector<32x128xf32>
    %265 = arith.addf %259, %264 : vector<32x128xf32>
    %c8_119 = arith.constant 8 : index
    %c0_120 = arith.constant 0 : index
    %c0_121 = arith.constant 0 : index
    %266 = vector.load %arg5[%c8_119, %c0_120, %c0_121] : memref<9x32x32xbf16, #tpu.memory_space<vmem>>, vector<1x32x32xbf16>
    %267 = vector.shape_cast %266 : vector<1x32x32xbf16> to vector<32x32xbf16>
    %268 = vector.extract_strided_slice %213 {offsets = [0, 1024], sizes = [32, 128], strides = [1, 1]} : vector<32x1152xf32> to vector<32x128xf32>
    %269 = arith.truncf %268 : vector<32x128xf32> to vector<32x128xbf16>
    %cst_122 = arith.constant dense<0.000000e+00> : vector<32x128xf32>
    %270 = tpu.matmul %267, %269, %cst_122 {dimension_numbers = #tpu.dot_dimension_numbers<[1], [0], [0], [1], [0, 0, 1, 1], [], []>} : vector<32x32xbf16>, vector<32x128xbf16>, vector<32x128xf32> -> vector<32x128xf32>
    %271 = arith.addf %265, %270 : vector<32x128xf32>
    %cst_123 = arith.constant 5.000000e-01 : f32
    %272 = vector.broadcast %cst_123 : f32 to vector<32x128xf32>
    %273 = arith.mulf %272, %271 : vector<32x128xf32>
    %cst_124 = arith.constant 4.471500e-02 : f32
    %274 = vector.broadcast %cst_124 : f32 to vector<32x128xf32>
    %275 = arith.mulf %274, %271 : vector<32x128xf32>
    %276 = arith.mulf %275, %271 : vector<32x128xf32>
    %277 = arith.mulf %276, %271 : vector<32x128xf32>
    %278 = arith.addf %271, %277 : vector<32x128xf32>
    %cst_125 = arith.constant 0.797884583 : f32
    %279 = vector.broadcast %cst_125 : f32 to vector<32x128xf32>
    %280 = arith.mulf %279, %278 : vector<32x128xf32>
    %281 = math.tanh %280 : vector<32x128xf32>
    %cst_126 = arith.constant 1.000000e+00 : f32
    %282 = vector.broadcast %cst_126 : f32 to vector<32x128xf32>
    %283 = arith.addf %282, %281 : vector<32x128xf32>
    %284 = arith.mulf %273, %283 : vector<32x128xf32>
    %c0_127 = arith.constant 0 : index
    %c0_128 = arith.constant 0 : index
    %285 = vector.load %arg8[%c0_127, %c0_128] : memref<128x1152xbf16, #tpu.memory_space<vmem>>, vector<128x1152xbf16>
    %286 = arith.truncf %284 : vector<32x128xf32> to vector<32x128xbf16>
    %cst_129 = arith.constant dense<0.000000e+00> : vector<32x1152xf32>
    %287 = tpu.matmul %286, %285, %cst_129 {dimension_numbers = #tpu.dot_dimension_numbers<[1], [0], [0], [1], [0, 0, 1, 1], [], []>} : vector<32x128xbf16>, vector<128x1152xbf16>, vector<32x1152xf32> -> vector<32x1152xf32>
    %cst_130 = arith.constant 0.000000e+00 : f32
    %288 = vector.broadcast %cst_130 : f32 to vector<32x128xf32>
    %c0_131 = arith.constant 0 : index
    %c0_132 = arith.constant 0 : index
    %c0_133 = arith.constant 0 : index
    %289 = vector.load %arg5[%c0_131, %c0_132, %c0_133] : memref<9x32x32xbf16, #tpu.memory_space<vmem>>, vector<1x32x32xbf16>
    %290 = vector.shape_cast %289 : vector<1x32x32xbf16> to vector<32x32xbf16>
    %291 = vector.extract_strided_slice %287 {offsets = [0, 0], sizes = [32, 128], strides = [1, 1]} : vector<32x1152xf32> to vector<32x128xf32>
    %292 = arith.truncf %291 : vector<32x128xf32> to vector<32x128xbf16>
    %cst_134 = arith.constant dense<0.000000e+00> : vector<32x128xf32>
    %293 = tpu.matmul %290, %292, %cst_134 {dimension_numbers = #tpu.dot_dimension_numbers<[1], [0], [0], [1], [0, 0, 1, 1], [], []>} : vector<32x32xbf16>, vector<32x128xbf16>, vector<32x128xf32> -> vector<32x128xf32>
    %294 = arith.addf %288, %293 : vector<32x128xf32>
    %c1_135 = arith.constant 1 : index
    %c0_136 = arith.constant 0 : index
    %c0_137 = arith.constant 0 : index
    %295 = vector.load %arg5[%c1_135, %c0_136, %c0_137] : memref<9x32x32xbf16, #tpu.memory_space<vmem>>, vector<1x32x32xbf16>
    %296 = vector.shape_cast %295 : vector<1x32x32xbf16> to vector<32x32xbf16>
    %297 = vector.extract_strided_slice %287 {offsets = [0, 128], sizes = [32, 128], strides = [1, 1]} : vector<32x1152xf32> to vector<32x128xf32>
    %298 = arith.truncf %297 : vector<32x128xf32> to vector<32x128xbf16>
    %cst_138 = arith.constant dense<0.000000e+00> : vector<32x128xf32>
    %299 = tpu.matmul %296, %298, %cst_138 {dimension_numbers = #tpu.dot_dimension_numbers<[1], [0], [0], [1], [0, 0, 1, 1], [], []>} : vector<32x32xbf16>, vector<32x128xbf16>, vector<32x128xf32> -> vector<32x128xf32>
    %300 = arith.addf %294, %299 : vector<32x128xf32>
    %c2_139 = arith.constant 2 : index
    %c0_140 = arith.constant 0 : index
    %c0_141 = arith.constant 0 : index
    %301 = vector.load %arg5[%c2_139, %c0_140, %c0_141] : memref<9x32x32xbf16, #tpu.memory_space<vmem>>, vector<1x32x32xbf16>
    %302 = vector.shape_cast %301 : vector<1x32x32xbf16> to vector<32x32xbf16>
    %303 = vector.extract_strided_slice %287 {offsets = [0, 256], sizes = [32, 128], strides = [1, 1]} : vector<32x1152xf32> to vector<32x128xf32>
    %304 = arith.truncf %303 : vector<32x128xf32> to vector<32x128xbf16>
    %cst_142 = arith.constant dense<0.000000e+00> : vector<32x128xf32>
    %305 = tpu.matmul %302, %304, %cst_142 {dimension_numbers = #tpu.dot_dimension_numbers<[1], [0], [0], [1], [0, 0, 1, 1], [], []>} : vector<32x32xbf16>, vector<32x128xbf16>, vector<32x128xf32> -> vector<32x128xf32>
    %306 = arith.addf %300, %305 : vector<32x128xf32>
    %c3_143 = arith.constant 3 : index
    %c0_144 = arith.constant 0 : index
    %c0_145 = arith.constant 0 : index
    %307 = vector.load %arg5[%c3_143, %c0_144, %c0_145] : memref<9x32x32xbf16, #tpu.memory_space<vmem>>, vector<1x32x32xbf16>
    %308 = vector.shape_cast %307 : vector<1x32x32xbf16> to vector<32x32xbf16>
    %309 = vector.extract_strided_slice %287 {offsets = [0, 384], sizes = [32, 128], strides = [1, 1]} : vector<32x1152xf32> to vector<32x128xf32>
    %310 = arith.truncf %309 : vector<32x128xf32> to vector<32x128xbf16>
    %cst_146 = arith.constant dense<0.000000e+00> : vector<32x128xf32>
    %311 = tpu.matmul %308, %310, %cst_146 {dimension_numbers = #tpu.dot_dimension_numbers<[1], [0], [0], [1], [0, 0, 1, 1], [], []>} : vector<32x32xbf16>, vector<32x128xbf16>, vector<32x128xf32> -> vector<32x128xf32>
    %312 = arith.addf %306, %311 : vector<32x128xf32>
    %c4_147 = arith.constant 4 : index
    %c0_148 = arith.constant 0 : index
    %c0_149 = arith.constant 0 : index
    %313 = vector.load %arg5[%c4_147, %c0_148, %c0_149] : memref<9x32x32xbf16, #tpu.memory_space<vmem>>, vector<1x32x32xbf16>
    %314 = vector.shape_cast %313 : vector<1x32x32xbf16> to vector<32x32xbf16>
    %315 = vector.extract_strided_slice %287 {offsets = [0, 512], sizes = [32, 128], strides = [1, 1]} : vector<32x1152xf32> to vector<32x128xf32>
    %316 = arith.truncf %315 : vector<32x128xf32> to vector<32x128xbf16>
    %cst_150 = arith.constant dense<0.000000e+00> : vector<32x128xf32>
    %317 = tpu.matmul %314, %316, %cst_150 {dimension_numbers = #tpu.dot_dimension_numbers<[1], [0], [0], [1], [0, 0, 1, 1], [], []>} : vector<32x32xbf16>, vector<32x128xbf16>, vector<32x128xf32> -> vector<32x128xf32>
    %318 = arith.addf %312, %317 : vector<32x128xf32>
    %c5_151 = arith.constant 5 : index
    %c0_152 = arith.constant 0 : index
    %c0_153 = arith.constant 0 : index
    %319 = vector.load %arg5[%c5_151, %c0_152, %c0_153] : memref<9x32x32xbf16, #tpu.memory_space<vmem>>, vector<1x32x32xbf16>
    %320 = vector.shape_cast %319 : vector<1x32x32xbf16> to vector<32x32xbf16>
    %321 = vector.extract_strided_slice %287 {offsets = [0, 640], sizes = [32, 128], strides = [1, 1]} : vector<32x1152xf32> to vector<32x128xf32>
    %322 = arith.truncf %321 : vector<32x128xf32> to vector<32x128xbf16>
    %cst_154 = arith.constant dense<0.000000e+00> : vector<32x128xf32>
    %323 = tpu.matmul %320, %322, %cst_154 {dimension_numbers = #tpu.dot_dimension_numbers<[1], [0], [0], [1], [0, 0, 1, 1], [], []>} : vector<32x32xbf16>, vector<32x128xbf16>, vector<32x128xf32> -> vector<32x128xf32>
    %324 = arith.addf %318, %323 : vector<32x128xf32>
    %c6_155 = arith.constant 6 : index
    %c0_156 = arith.constant 0 : index
    %c0_157 = arith.constant 0 : index
    %325 = vector.load %arg5[%c6_155, %c0_156, %c0_157] : memref<9x32x32xbf16, #tpu.memory_space<vmem>>, vector<1x32x32xbf16>
    %326 = vector.shape_cast %325 : vector<1x32x32xbf16> to vector<32x32xbf16>
    %327 = vector.extract_strided_slice %287 {offsets = [0, 768], sizes = [32, 128], strides = [1, 1]} : vector<32x1152xf32> to vector<32x128xf32>
    %328 = arith.truncf %327 : vector<32x128xf32> to vector<32x128xbf16>
    %cst_158 = arith.constant dense<0.000000e+00> : vector<32x128xf32>
    %329 = tpu.matmul %326, %328, %cst_158 {dimension_numbers = #tpu.dot_dimension_numbers<[1], [0], [0], [1], [0, 0, 1, 1], [], []>} : vector<32x32xbf16>, vector<32x128xbf16>, vector<32x128xf32> -> vector<32x128xf32>
    %330 = arith.addf %324, %329 : vector<32x128xf32>
    %c7_159 = arith.constant 7 : index
    %c0_160 = arith.constant 0 : index
    %c0_161 = arith.constant 0 : index
    %331 = vector.load %arg5[%c7_159, %c0_160, %c0_161] : memref<9x32x32xbf16, #tpu.memory_space<vmem>>, vector<1x32x32xbf16>
    %332 = vector.shape_cast %331 : vector<1x32x32xbf16> to vector<32x32xbf16>
    %333 = vector.extract_strided_slice %287 {offsets = [0, 896], sizes = [32, 128], strides = [1, 1]} : vector<32x1152xf32> to vector<32x128xf32>
    %334 = arith.truncf %333 : vector<32x128xf32> to vector<32x128xbf16>
    %cst_162 = arith.constant dense<0.000000e+00> : vector<32x128xf32>
    %335 = tpu.matmul %332, %334, %cst_162 {dimension_numbers = #tpu.dot_dimension_numbers<[1], [0], [0], [1], [0, 0, 1, 1], [], []>} : vector<32x32xbf16>, vector<32x128xbf16>, vector<32x128xf32> -> vector<32x128xf32>
    %336 = arith.addf %330, %335 : vector<32x128xf32>
    %c8_163 = arith.constant 8 : index
    %c0_164 = arith.constant 0 : index
    %c0_165 = arith.constant 0 : index
    %337 = vector.load %arg5[%c8_163, %c0_164, %c0_165] : memref<9x32x32xbf16, #tpu.memory_space<vmem>>, vector<1x32x32xbf16>
    %338 = vector.shape_cast %337 : vector<1x32x32xbf16> to vector<32x32xbf16>
    %339 = vector.extract_strided_slice %287 {offsets = [0, 1024], sizes = [32, 128], strides = [1, 1]} : vector<32x1152xf32> to vector<32x128xf32>
    %340 = arith.truncf %339 : vector<32x128xf32> to vector<32x128xbf16>
    %cst_166 = arith.constant dense<0.000000e+00> : vector<32x128xf32>
    %341 = tpu.matmul %338, %340, %cst_166 {dimension_numbers = #tpu.dot_dimension_numbers<[1], [0], [0], [1], [0, 0, 1, 1], [], []>} : vector<32x32xbf16>, vector<32x128xbf16>, vector<32x128xf32> -> vector<32x128xf32>
    %342 = arith.addf %336, %341 : vector<32x128xf32>
    %343 = vector.extract_strided_slice %342 {offsets = [0, 0], sizes = [32, 64], strides = [1, 1]} : vector<32x128xf32> to vector<32x64xf32>
    %c27 = arith.constant 27 : index
    %c0_167 = arith.constant 0 : index
    %344 = vector.load %arg2[%c27, %c0_167] : memref<29x128xf32, #tpu.memory_space<vmem>>, vector<1x64xf32>
    %345 = vector.broadcast %344 : vector<1x64xf32> to vector<32x64xf32>
    %346 = arith.addf %343, %345 : vector<32x64xf32>
    %347 = arith.addf %346, %210 : vector<32x64xf32>
    %cst_168 = arith.constant 5.000000e-01 : f32
    %348 = vector.broadcast %cst_168 : f32 to vector<32x64xf32>
    %349 = arith.mulf %348, %347 : vector<32x64xf32>
    %cst_169 = arith.constant 4.471500e-02 : f32
    %350 = vector.broadcast %cst_169 : f32 to vector<32x64xf32>
    %351 = arith.mulf %350, %347 : vector<32x64xf32>
    %352 = arith.mulf %351, %347 : vector<32x64xf32>
    %353 = arith.mulf %352, %347 : vector<32x64xf32>
    %354 = arith.addf %347, %353 : vector<32x64xf32>
    %cst_170 = arith.constant 0.797884583 : f32
    %355 = vector.broadcast %cst_170 : f32 to vector<32x64xf32>
    %356 = arith.mulf %355, %354 : vector<32x64xf32>
    %357 = math.tanh %356 : vector<32x64xf32>
    %cst_171 = arith.constant 1.000000e+00 : f32
    %358 = vector.broadcast %cst_171 : f32 to vector<32x64xf32>
    %359 = arith.addf %358, %357 : vector<32x64xf32>
    %360 = arith.mulf %349, %359 : vector<32x64xf32>
    %c6_172 = arith.constant 6 : index
    %c0_173 = arith.constant 0 : index
    %c0_174 = arith.constant 0 : index
    %361 = vector.load %arg3[%c6_172, %c0_173, %c0_174] : memref<7x64x128xbf16, #tpu.memory_space<vmem>>, vector<1x64x32xbf16>
    %362 = vector.shape_cast %361 : vector<1x64x32xbf16> to vector<64x32xbf16>
    %363 = arith.truncf %360 : vector<32x64xf32> to vector<32x64xbf16>
    %cst_175 = arith.constant dense<0.000000e+00> : vector<32x32xf32>
    %364 = tpu.matmul %363, %362, %cst_175 {dimension_numbers = #tpu.dot_dimension_numbers<[1], [0], [0], [1], [0, 0, 1, 1], [], []>} : vector<32x64xbf16>, vector<64x32xbf16>, vector<32x32xf32> -> vector<32x32xf32>
    %c28 = arith.constant 28 : index
    %c0_176 = arith.constant 0 : index
    %365 = vector.load %arg2[%c28, %c0_176] : memref<29x128xf32, #tpu.memory_space<vmem>>, vector<1x32xf32>
    %366 = vector.broadcast %365 : vector<1x32xf32> to vector<32x32xf32>
    %367 = arith.addf %364, %366 : vector<32x32xf32>
    %c11 = arith.constant 11 : index
    %c0_177 = arith.constant 0 : index
    %368 = vector.load %arg2[%c11, %c0_177] : memref<29x128xf32, #tpu.memory_space<vmem>>, vector<1x32xf32>
    %c10 = arith.constant 10 : index
    %c0_178 = arith.constant 0 : index
    %369 = vector.load %arg2[%c10, %c0_178] : memref<29x128xf32, #tpu.memory_space<vmem>>, vector<1x32xf32>
    %370 = vector.broadcast %369 : vector<1x32xf32> to vector<32x32xf32>
    %371 = arith.mulf %367, %370 : vector<32x32xf32>
    %372 = vector.broadcast %368 : vector<1x32xf32> to vector<32x32xf32>
    %373 = arith.addf %372, %371 : vector<32x32xf32>
    %374 = arith.addf %181, %373 : vector<32x32xf32>
    %c0_179 = arith.constant 0 : index
    %c0_180 = arith.constant 0 : index
    %375 = vector.load %arg9[%c0_179, %c0_180] : memref<32x32xf32, #tpu.memory_space<vmem>>, vector<32x32xf32>
    tpu.vector_store %arg9[%c0_179, %c0_180], %374 {strides = array<i32>} : memref<32x32xf32, #tpu.memory_space<vmem>>, vector<32x32xf32>,
    return
  }
}

</mosaic_0001>

<bundles_post_ra>
// kernel: tile.61
= control target key start
LH: loop header
LB: loop body
LE: loop exit
PB: predicated region body
PF: predicated region fallthrough
CT: control target
= control target key end

     0   :  { %s22_s0 = inlined_call_operand.vmem [shape: f32[8], index: 0, kind: input, shape index: {}]   ;;  %s23_s1 = inlined_call_operand.vmem [shape: f32[4,8], index: 1, kind: output, shape index: {}]  }
   0x1   :  { %v4_v0 = vld [vmem:[%s22_s0] ss:$0 sm:$0xff] }
   0x2   :  { %5 = vst [vmem:[%s23_s1] sm:$0xf] %v4_v0 }

// kernel: tile.62
= control target key start
LH: loop header
LB: loop body
LE: loop exit
PB: predicated region body
PF: predicated region fallthrough
CT: control target
= control target key end

     0   :  { %s37_s8 = smov 8   ;;  %s38_s9 = smov 16   ;;  %vm7_vm0 = vcmask 64512   ;;  %vm13_vm1 = vcmask 261312   ;;  %vm19_vm2 = vcmask 195712   ;;  %vm25_vm3 = vcmask 130112   ;;  %s55_s0 = inlined_call_operand.vmem [shape: f32[4,8], index: 0, kind: input, shape index: {}]   ;;  %s56_s1 = inlined_call_operand.vmem [shape: f32[32], index: 1, kind: output, shape index: {}]  }
   0x1   :  { %v4_v0 = vld [vmem:[%s55_s0] sm:$0xf]  ;;  %s36_s0 = smov 24  }
   0x2   :  { %5 = vst [vmem:[#allocation1] sm:$0xf] %v4_v0 }
   0x9   :  { %v10_v1 = vld [vmem:[#allocation1 + $0x3] sm:$0x1]   ;;  %v22_v2 = vld [vmem:[#allocation1 + $0x1] sm:$0x1]   ;;  %v16_v3 = vld [vmem:[#allocation1 + $0x2] sm:$0x1]  }
   0xa   :  { %11 = vrot.lane.b32.xlu0 %v10_v1, %s36_s0  ;;  %23 = vrot.lane.b32.xlu1 %v22_v2, %s37_s8  ;;  %v6_v4 = vld [vmem:[#allocation1] sm:$0x1]  }
   0xb   :  { %8 = vst.msk [vmem:[#allocation0] sm:$0x1] %vm7_vm0, %v6_v4  }
  0x12   :  { %17 = vrot.lane.b32.xlu0 %v16_v3, %s38_s9 }
  0x7c   :  { %v12_v5 = vpop.permute.xlu0 %11   ;;  %v24_v6 = vpop.permute.xlu1 %23  }
  0x7d   :  { %14 = vst.msk [vmem:[#allocation0] sm:$0x1] %vm13_vm1, %v12_v5  }
  0x84   :  { %v18_v7 = vpop.permute.xlu0 %17  }
  0x85   :  { %20 = vst.msk [vmem:[#allocation0] sm:$0x1] %vm19_vm2, %v18_v7  }
  0x86   :  { %26 = vst.msk [vmem:[#allocation0] sm:$0x1] %vm25_vm3, %v24_v6  }
  0x8d   :  { %v29_v8 = vld [vmem:[#allocation0] sm:$0x1] }
  0x8e   :  { %32 = vst [vmem:[%s56_s1] sm:$0x1] %v29_v8 }

// kernel: raiflow_block.1
= control target key start
LH: loop header
LB: loop body
LE: loop exit
PB: predicated region body
PF: predicated region fallthrough
CT: control target
= control target key end

     0   :  { %vm140_vm0 = vcmask 261120   ;;  %s7071_s0 = inlined_call_operand.vmem [shape: f32[32,32], index: 0, kind: input, shape index: {}]   ;;  %s7072_s1 = inlined_call_operand.vmem [shape: f32[16,32], index: 1, kind: input, shape index: {}]   ;;  %s7073_s2 = inlined_call_operand.vmem [shape: f32[29,128], index: 2, kind: input, shape index: {}]   ;;  %s7074_s3 = inlined_call_operand.vmem [shape: bf16[7,64,128], index: 3, kind: input, shape index: {}]   ;;  %s7075_s4 = inlined_call_operand.vmem [shape: bf16[32,32], index: 4, kind: input, shape index: {}]   ;;  %s7076_s5 = inlined_call_operand.vmem [shape: bf16[9,32,32], index: 5, kind: input, shape index: {}]   ;;  %s7077_s6 = inlined_call_operand.vmem [shape: f32[448,32], index: 6, kind: input, shape index: {}]   ;;  %s7078_s7 = inlined_call_operand.vmem [shape: bf16[64,1152], index: 7, kind: input, shape index: {}]   ;;  %s7079_s8 = inlined_call_operand.vmem [shape: bf16[128,1152], index: 8, kind: input, shape index: {}]   ;;  %s7080_s9 = inlined_call_operand.hbm [shape: f32[32,32], index: 9, kind: output, shape index: {}]  }
   0x1   :  { %v4521_v0 = vld [vmem:[%s7074_s3 + $0x28] sm:$0xff]  ;;  %v4520_v1 = vld [vmem:[%s7074_s3 + $0x20] sm:$0xff]  ;;  %v36_v10 = vld [vmem:[%s7071_s0 + $0x10] sm:$0xff] }
   0x2   :  { %v4519_v2 = vld [vmem:[%s7074_s3 + $0x8] sm:$0xff]  ;;  %v38_v3 = vld [vmem:[%s7072_s1] sm:$0xff]  ;;  %195 = vmatpush.bf16.msra.mxu1 %v4521_v0  ;;  %v37_v12 = vld [vmem:[%s7071_s0 + $0x18] sm:$0xff]  ;;  %v103_v14 = vmul.f32 0.2, %v36_v10 }
   0x3   :  { %v39_v4 = vld [vmem:[%s7072_s1 + $0x8] sm:$0xff]  ;;  %v4518_v5 = vld [vmem:[%s7074_s3] sm:$0xff]  ;;  %153 = vmatpush.bf16.msra.mxu0 %v4519_v2  ;;  %v104_v15 = vmul.f32 0.2, %v37_v12 }
   0x4   :  { %v34_v6 = vld [vmem:[%s7071_s0] sm:$0xff]  ;;  %v35_v7 = vld [vmem:[%s7071_s0 + $0x8] sm:$0xff]  ;;  %v171_v11 = vpack.c.bf16 %v39_v4, %v38_v3 }
   0x5   :  { %v101_v8 = vmul.f32 0.2, %v34_v6  ;;  %v102_v9 = vmul.f32 0.2, %v35_v7  ;;  %v4667_v13 = vld [vmem:[%s7073_s2] ss:$0 sm:$0xff] }
   0x6   :  { %196 = vmatpush.bf16.msra.mxu1 %v4520_v1  ;;  %v4668_v16 = vld [vmem:[%s7073_s2 + $0x1] ss:$0 sm:$0xff] }
   0x7   :  { %4696 = vtanh.f32 %v101_v8  ;;  %154 = vmatpush.bf16.msra.mxu0 %v4518_v5 }
   0x8   :  { %4698 = vtanh.f32 %v102_v9 }
   0x9   :  { %3799 = vmatmul.msk.bf16.vlgmr.msra.gmra.mxu1 %vm140_vm0, %v171_v11  ;;  %4700 = vtanh.f32 %v103_v14 }
   0xa   :  { %4702 = vtanh.f32 %v104_v15 }
   0xd   :  { %v4697_v17 = vpop.eup %4696 }
   0xe   :  { %v4699_v18 = vpop.eup %4698  ;;  %v110_v19 = vmul.f32 %v4697_v17, %v4667_v13 }
   0xf   :  { %v111_v20 = vmul.f32 %v4699_v18, %v4667_v13 }
  0x10   :  { %v116_v21 = vadd.f32 %v4668_v16, %v110_v19 }
  0x11   :  { %v117_v22 = vadd.f32 %v4668_v16, %v111_v20 }
  0x12   :  { %14 = vsyncpa [#allocation3], 0  ;;  %v4701_v24 = vpop.eup %4700  ;;  %v4669_v31 = vld [vmem:[%s7073_s2 + $0xd] ss:$0 sm:$0xff]  ;;  %v4670_v35 = vld [vmem:[%s7073_s2 + $0xc] ss:$0 sm:$0xff] }
  0x13   :  { %v124_v23 = vpack.c.bf16 %v117_v22, %v116_v21  ;;  %v4703_v25 = vpop.eup %4702  ;;  %v112_v26 = vmul.f32 %v4701_v24, %v4667_v13  ;;  %v4673_v43 = vld [vmem:[%s7073_s2 + $0x13] ss:$0 sm:$0xff]  ;;  %v4674_v47 = vld [vmem:[%s7073_s2 + $0x14] ss:$0 sm:$0xff]  ;;  %v4671_v51 = vld [vmem:[%s7073_s2 + $0x11] ss:$0 sm:$0xff] }
  0x14   :  { %v113_v27 = vmul.f32 %v4703_v25, %v4667_v13  ;;  %v4672_v58 = vld [vmem:[%s7073_s2 + $0x12] ss:$0 sm:$0xff]  ;;  %v48_v2 = vld [vmem:[%s7077_s6 + $0x40] sm:$0xff]  ;;  %v49_v5 = vld [vmem:[%s7077_s6 + $0x48] sm:$0xff]  ;;  %vm368_vm1 = vcmask 130048   ;;  %s4964_s13 = smov 96  }
  0x15   :  { %3785 = vmatmul.msk.bf16.vlgmr.msra.gmra.mxu0 %vm140_vm0, %v124_v23  ;;  %v118_v28 = vadd.f32 %v4668_v16, %v112_v26  ;;  %v56_v3 = vld [vmem:[%s7077_s6 + $0x80] sm:$0xff]  ;;  %v57_v6 = vld [vmem:[%s7077_s6 + $0x88] sm:$0xff]  ;;  %v50_v26 = vld [vmem:[%s7077_s6 + $0x50] sm:$0xff]  ;;  %s4965_s23 = smov 64   ;;  %s3765_s25 = sshll.u32 %s7080_s9, 4  ;;  %s3766_s25 = int_to_ptr.hbm [resolvable:$true] %s3765_s25 }
  0x16   :  { %v119_v29 = vadd.f32 %v4668_v16, %v113_v27  ;;  %v60_v4 = vld [vmem:[%s7077_s6 + $0xa0] sm:$0xff]  ;;  %v61_v7 = vld [vmem:[%s7077_s6 + $0xa8] sm:$0xff]  ;;  %v58_v27 = vld [vmem:[%s7077_s6 + $0x90] sm:$0xff]  ;;  %s4967_s26 = smov 128  }
  0x18   :  { %v125_v30 = vpack.c.bf16 %v119_v29, %v118_v28  ;;  %v62_v28 = vld [vmem:[%s7077_s6 + $0xb0] sm:$0xff]  ;;  %v51_v29 = vld [vmem:[%s7077_s6 + $0x58] sm:$0xff] }
  0x25   :  { %3786 = vmatmul.msk.bf16.gmra.mxu0 %vm140_vm0, %v125_v30  ;;  %v59_v30 = vld [vmem:[%s7077_s6 + $0x98] sm:$0xff] }
  0x86   :  { %v198_v32 = vpop.f32.mrf.mxu1 }
  0x87   :  { %v5061_v33 = vadd.f32 %v4669_v31, %v198_v32 }
  0x89   :  { %v224_v34 = vmul.f32 0.2, %v5061_v33 }
  0x8b   :  { %4704 = vtanh.f32 %v224_v34 }
  0x8e   :  { %v200_v36 = vpop.f32.mrf.mxu1 }
  0x8f   :  { %v5067_v37 = vadd.f32 %v4669_v31, %v200_v36  ;;  %v63_v31 = vld [vmem:[%s7077_s6 + $0xb8] sm:$0xff] }
  0x91   :  { %v225_v40 = vmul.f32 0.2, %v5067_v37  ;;  %v761_v41 = vpack.c.bf16 %v5067_v37, %v5061_v33  ;;  %v4705_v44 = vpop.eup %4704 }
  0x92   :  { %v156_v38 = vpop.f32.mrf.mxu0  ;;  %v229_v46 = vmul.f32 %v4705_v44, %v4673_v43 }
  0x93   :  { %v157_v39 = vadd.f32 %v4670_v35, %v156_v38  ;;  %4706 = vtanh.f32 %v225_v40 }
  0x94   :  { %v233_v54 = vadd.f32 %v4674_v47, %v229_v46  ;;  %v5129_v46 = vld [vmem:[%s7077_s6 + $0x60] sm:$0xff] }
  0x95   :  { %v204_v42 = vmul.f32 0.2, %v157_v39 }
  0x97   :  { %4708 = vtanh.f32 %v204_v42 }
  0x99   :  { %v4707_v48 = vpop.eup %4706 }
  0x9a   :  { %v158_v45 = vpop.f32.mrf.mxu0  ;;  %v230_v50 = vmul.f32 %v4707_v48, %v4673_v43 }
  0x9b   :  { %v159_v49 = vadd.f32 %v4670_v35, %v158_v45  ;;  %v53_v45 = vld [vmem:[%s7077_s6 + $0x68] sm:$0xff] }
  0x9c   :  { %v234_v55 = vadd.f32 %v4674_v47, %v230_v50  ;;  %v55_v50 = vld [vmem:[%s7077_s6 + $0x78] sm:$0xff] }
  0x9d   :  { %v205_v52 = vmul.f32 0.2, %v159_v49  ;;  %v4709_v53 = vpop.eup %4708 }
  0x9e   :  { %v259_v56 = vpack.c.bf16 %v234_v55, %v233_v54  ;;  %v213_v57 = vmul.f32 %v4709_v53, %v4671_v51 }
  0x9f   :  { %4710 = vtanh.f32 %v205_v52 }
  0xa0   :  { %v285_v60 = vsel %vm140_vm0, %v259_v56, 0  ;;  %v219_v63 = vadd.f32 %v4672_v58, %v213_v57  ;;  %v80_v56 = vld [vmem:[%s7077_s6 + $0x140] sm:$0xff] }
  0xa1   :  { %294 = vmatpush.bf16.xpose.msra.mxu2 %v285_v60 }
  0xa2   :  { %v161_v59 = vpop.f32.mrf.mxu0  ;;  %v235_v9 = vmul.f32 %v219_v63, %v48_v2  ;;  %v243_v10 = vmul.f32 %v219_v63, %v56_v3  ;;  %v247_v14 = vmul.f32 %v219_v63, %v60_v4  ;;  %v239_v48 = vmul.f32 %v219_v63, %v5129_v46  ;;  %v82_v2 = vld [vmem:[%s7077_s6 + $0x150] sm:$0xff] }
  0xa3   :  { %v162_v61 = vadd.f32 %v4670_v35, %v161_v59 }
  0xa5   :  { %v4711_v62 = vpop.eup %4710  ;;  %v206_v0 = vmul.f32 0.2, %v162_v61  ;;  %v81_v61 = vld [vmem:[%s7077_s6 + $0x148] sm:$0xff] }
  0xa6   :  { %v214_v1 = vmul.f32 %v4711_v62, %v4671_v51 }
  0xa7   :  { %4712 = vtanh.f32 %v206_v0 }
  0xa8   :  { %v220_v8 = vadd.f32 %v4672_v58, %v214_v1 }
  0xaa   :  { %v163_v11 = vpop.f32.mrf.mxu0  ;;  %v236_v12 = vmul.f32 %v220_v8, %v49_v5  ;;  %v244_v13 = vmul.f32 %v220_v8, %v57_v6  ;;  %v248_v15 = vmul.f32 %v220_v8, %v61_v7  ;;  %v240_v47 = vmul.f32 %v220_v8, %v53_v45  ;;  %v83_v7 = vld [vmem:[%s7077_s6 + $0x158] sm:$0xff] }
  0xab   :  { %v164_v16 = vadd.f32 %v4670_v35, %v163_v11 }
  0xac   :  { %v251_v17 = vpack.c.bf16 %v236_v12, %v235_v9  ;;  %v255_v18 = vpack.c.bf16 %v244_v13, %v243_v10  ;;  %v257_v19 = vpack.c.bf16 %v248_v15, %v247_v14  ;;  %v253_v49 = vpack.c.bf16 %v240_v47, %v239_v48  ;;  %v84_v12 = vld [vmem:[%s7077_s6 + $0x160] sm:$0xff] }
  0xad   :  { %v207_v20 = vmul.f32 0.2, %v164_v16  ;;  %v4713_v21 = vpop.eup %4712 }
  0xae   :  { %3800 = vmatmul.msk.bf16.vlgmr.msra.gmra.mxu2 %vm140_vm0, %v251_v17  ;;  %v215_v22 = vmul.f32 %v4713_v21, %v4671_v51  ;;  %v85_v17 = vld [vmem:[%s7077_s6 + $0x168] sm:$0xff] }
  0xaf   :  { %4714 = vtanh.f32 %v207_v20 }
  0xb0   :  { %v221_v24 = vadd.f32 %v4672_v58, %v215_v22  ;;  %v86_v22 = vld [vmem:[%s7077_s6 + $0x170] sm:$0xff] }
  0xb2   :  { %v237_v34 = vmul.f32 %v221_v24, %v50_v26  ;;  %v245_v35 = vmul.f32 %v221_v24, %v58_v27  ;;  %v249_v39 = vmul.f32 %v221_v24, %v62_v28  ;;  %v87_v27 = vld [vmem:[%s7077_s6 + $0x178] sm:$0xff] }
  0xb5   :  { %v4715_v23 = vpop.eup %4714 }
  0xb6   :  { %v216_v25 = vmul.f32 %v4715_v23, %v4671_v51  ;;  %v54_v51 = vld [vmem:[%s7077_s6 + $0x70] sm:$0xff] }
  0xb7   :  { %v241_v53 = vmul.f32 %v221_v24, %v54_v51 }
  0xb8   :  { %v222_v32 = vadd.f32 %v4672_v58, %v216_v25 }
  0xba   :  { %v238_v36 = vmul.f32 %v222_v32, %v51_v29  ;;  %v246_v38 = vmul.f32 %v222_v32, %v59_v30  ;;  %v250_v40 = vmul.f32 %v222_v32, %v63_v31  ;;  %v242_v52 = vmul.f32 %v222_v32, %v55_v50  ;;  %v88_v32 = vld [vmem:[%s7077_s6 + $0x180] sm:$0xff]  ;;  %v89_v50 = vld [vmem:[%s7077_s6 + $0x188] sm:$0xff] }
  0xbc   :  { %v252_v42 = vpack.c.bf16 %v238_v36, %v237_v34  ;;  %v256_v43 = vpack.c.bf16 %v246_v38, %v245_v35  ;;  %v258_v44 = vpack.c.bf16 %v250_v40, %v249_v39  ;;  %v254_v54 = vpack.c.bf16 %v242_v52, %v241_v53 }
  0xbe   :  { %3801 = vmatmul.msk.bf16.gmra.mxu2 %vm140_vm0, %v252_v42 }
  0xce   :  { %3802 = vmatmul.msk.bf16.gmra.mxu2 %vm140_vm0, %v253_v49 }
  0xde   :  { %3803 = vmatmul.msk.bf16.gmra.mxu2 %vm140_vm0, %v254_v54 }
  0xee   :  { %3804 = vmatmul.msk.bf16.gmra.mxu2 %vm140_vm0, %v255_v18 }
  0xfe   :  { %3805 = vmatmul.msk.bf16.gmra.mxu2 %vm140_vm0, %v256_v43 }
 0x10e   :  { %3806 = vmatmul.msk.bf16.gmra.mxu2 %vm140_vm0, %v257_v19 }
 0x11e   :  { %3807 = vmatmul.msk.bf16.gmra.mxu2 %vm140_vm0, %v258_v44 }
 0x131   :  { %v296_v55 = vpop.f32.mrf.mxu2 }
 0x132   :  { %v336_v57 = vmul.f32 0.35355338, %v296_v55 }
 0x134   :  { %v352_v58 = vadd.f32 %v336_v57, %v80_v56 }
 0x136   :  { %v369_v59 = vsel %vm368_vm1, %v352_v58, -inf }
 0x137   :  { %370 = vmax.xlane.f32.xlu0 %v369_v59 }
 0x139   :  { %v298_v60 = vpop.f32.mrf.mxu2 }
 0x13a   :  { %v337_v62 = vmul.f32 0.35355338, %v298_v60 }
 0x13c   :  { %v353_v63 = vadd.f32 %v337_v62, %v81_v61 }
 0x13e   :  { %v372_v0 = vsel %vm368_vm1, %v353_v63, -inf }
 0x13f   :  { %373 = vmax.xlane.f32.xlu0 %v372_v0 }
 0x141   :  { %v301_v1 = vpop.f32.mrf.mxu2 }
 0x142   :  { %v338_v3 = vmul.f32 0.35355338, %v301_v1 }
 0x144   :  { %v354_v4 = vadd.f32 %v338_v3, %v82_v2  ;;  %v90_v2 = vld [vmem:[%s7077_s6 + $0x190] sm:$0xff] }
 0x146   :  { %v375_v5 = vsel %vm368_vm1, %v354_v4, -inf }
 0x147   :  { %376 = vmax.xlane.f32.xlu1 %v375_v5 }
 0x149   :  { %v303_v6 = vpop.f32.mrf.mxu2 }
 0x14a   :  { %v339_v8 = vmul.f32 0.35355338, %v303_v6 }
 0x14c   :  { %v355_v9 = vadd.f32 %v339_v8, %v83_v7 }
 0x14e   :  { %v378_v10 = vsel %vm368_vm1, %v355_v9, -inf }
 0x14f   :  { %379 = vmax.xlane.f32.xlu1 %v378_v10 }
 0x151   :  { %v306_v11 = vpop.f32.mrf.mxu2 }
 0x152   :  { %v340_v13 = vmul.f32 0.35355338, %v306_v11 }
 0x154   :  { %v5163_v14 = vadd.f32 %v340_v13, %v84_v12  ;;  %v91_v12 = vld [vmem:[%s7077_s6 + $0x198] sm:$0xff] }
 0x156   :  { %v381_v15 = vsel %vm368_vm1, %v5163_v14, -inf }
 0x157   :  { %382 = vmax.xlane.f32.xlu2 %v381_v15 }
 0x159   :  { %v308_v16 = vpop.f32.mrf.mxu2 }
 0x15a   :  { %v341_v18 = vmul.f32 0.35355338, %v308_v16 }
 0x15c   :  { %v5170_v19 = vadd.f32 %v341_v18, %v85_v17 }
 0x15e   :  { %v384_v20 = vsel %vm368_vm1, %v5170_v19, -inf }
 0x15f   :  { %385 = vmax.xlane.f32.xlu2 %v384_v20 }
 0x161   :  { %v311_v21 = vpop.f32.mrf.mxu2 }
 0x162   :  { %v342_v23 = vmul.f32 0.35355338, %v311_v21 }
 0x164   :  { %v5177_v24 = vadd.f32 %v342_v23, %v86_v22  ;;  %v92_v22 = vld [vmem:[%s7077_s6 + $0x1a0] sm:$0xff] }
 0x166   :  { %v387_v25 = vsel %vm368_vm1, %v5177_v24, -inf }
 0x167   :  { %388 = vmax.xlane.f32.xlu0 %v387_v25 }
 0x169   :  { %v313_v26 = vpop.f32.mrf.mxu2 }
 0x16a   :  { %v343_v28 = vmul.f32 0.35355338, %v313_v26 }
 0x16c   :  { %v5184_v29 = vadd.f32 %v343_v28, %v87_v27 }
 0x16e   :  { %v390_v30 = vsel %vm368_vm1, %v5184_v29, -inf }
 0x16f   :  { %391 = vmax.xlane.f32.xlu1 %v390_v30 }
 0x171   :  { %v316_v31 = vpop.f32.mrf.mxu2 }
 0x172   :  { %v344_v34 = vmul.f32 0.35355338, %v316_v31 }
 0x174   :  { %v5191_v35 = vadd.f32 %v344_v34, %v88_v32 }
 0x176   :  { %v393_v36 = vsel %vm368_vm1, %v5191_v35, -inf }
 0x177   :  { %394 = vmax.xlane.f32.xlu1 %v393_v36 }
 0x179   :  { %v318_v42 = vpop.f32.mrf.mxu2 }
 0x17a   :  { %v345_v48 = vmul.f32 0.35355338, %v318_v42 }
 0x17c   :  { %v5202_v53 = vadd.f32 %v345_v48, %v89_v50 }
 0x181   :  { %v321_v51 = vpop.f32.mrf.mxu2 }
 0x182   :  { %v346_v0 = vmul.f32 0.35355338, %v321_v51 }
 0x189   :  { %v323_v60 = vpop.f32.mrf.mxu2 }
 0x18a   :  { %v347_v11 = vmul.f32 0.35355338, %v323_v60 }
 0x18c   :  { %v5230_v15 = vadd.f32 %v347_v11, %v91_v12 }
 0x191   :  { %v326_v7 = vpop.f32.mrf.mxu2 }
 0x192   :  { %v348_v18 = vmul.f32 0.35355338, %v326_v7 }
 0x194   :  { %v5245_v23 = vadd.f32 %v348_v18, %v92_v22 }
 0x196   :  { %v405_v33 = vsel %vm368_vm1, %v5245_v23, -inf }
 0x199   :  { %v328_v21 = vpop.f32.mrf.mxu2 }
 0x19a   :  { %v349_v37 = vmul.f32 0.35355338, %v328_v21 }
 0x1a1   :  { %v331_v27 = vpop.f32.mrf.mxu2 }
 0x1a2   :  { %v350_v34 = vmul.f32 0.35355338, %v331_v27 }
 0x1aa   :  { %v371_v38 = vpop.xlane.xlu0 %370 }
 0x1ab   :  { %v417_v39 = vsub.f32 %v352_v58, %v371_v38  ;;  %v396_v58 = vsel %vm368_vm1, %v5202_v53, -inf  ;;  %v94_v38 = vld [vmem:[%s7077_s6 + $0x1b0] sm:$0xff] }
 0x1ad   :  { %v433_v40 = vmul.f32 1.442695, %v417_v39 }
 0x1af   :  { %4716 = vpow2.f32 %v433_v40  ;;  %v333_v40 = vpop.f32.mrf.mxu2 }
 0x1b0   :  { %v351_v48 = vmul.f32 0.35355338, %v333_v40 }
 0x1b2   :  { %v374_v43 = vpop.xlane.xlu0 %373 }
 0x1b3   :  { %v418_v44 = vsub.f32 %v353_v63, %v374_v43 }
 0x1b5   :  { %v5195_v45 = vpop.eup %4716  ;;  %v435_v47 = vmul.f32 1.442695, %v418_v44  ;;  %v5265_v44 = vadd.f32 %v350_v34, %v94_v38 }
 0x1b6   :  { %v465_v49 = vsel %vm368_vm1, %v5195_v45, 0.0 }
 0x1b7   :  { %4718 = vpow2.f32 %v435_v47  ;;  %466 = vadd.xlane.f32.xlu2 %v465_v49  ;;  %v411_v51 = vsel %vm368_vm1, %v5265_v44, -inf }
 0x1ba   :  { %v377_v52 = vpop.xlane.xlu1 %376 }
 0x1bb   :  { %v419_v54 = vsub.f32 %v354_v4, %v377_v52  ;;  %v5217_v4 = vadd.f32 %v346_v0, %v90_v2 }
 0x1bd   :  { %v5204_v55 = vpop.eup %4718  ;;  %v437_v56 = vmul.f32 1.442695, %v419_v54  ;;  %v399_v10 = vsel %vm368_vm1, %v5217_v4, -inf }
 0x1be   :  { %v468_v57 = vsel %vm368_vm1, %v5204_v55, 0.0 }
 0x1bf   :  { %4720 = vpow2.f32 %v437_v56  ;;  %469 = vadd.xlane.f32.xlu0 %v468_v57  ;;  %397 = vmax.xlane.f32.xlu2 %v396_v58 }
 0x1c2   :  { %v380_v59 = vpop.xlane.xlu1 %379 }
 0x1c3   :  { %v420_v61 = vsub.f32 %v355_v9, %v380_v59 }
 0x1c5   :  { %v5210_v62 = vpop.eup %4720  ;;  %v439_v63 = vmul.f32 1.442695, %v420_v61 }
 0x1c6   :  { %v471_v1 = vsel %vm368_vm1, %v5210_v62, 0.0 }
 0x1c7   :  { %4722 = vpow2.f32 %v439_v63  ;;  %472 = vadd.xlane.f32.xlu0 %v471_v1 }
 0x1ca   :  { %v383_v3 = vpop.xlane.xlu2 %382 }
 0x1cb   :  { %v421_v5 = vsub.f32 %v5163_v14, %v383_v3 }
 0x1cd   :  { %v5220_v6 = vpop.eup %4722  ;;  %v441_v8 = vmul.f32 1.442695, %v421_v5 }
 0x1ce   :  { %v474_v9 = vsel %vm368_vm1, %v5220_v6, 0.0 }
 0x1cf   :  { %4724 = vpow2.f32 %v441_v8  ;;  %475 = vadd.xlane.f32.xlu1 %v474_v9  ;;  %400 = vmax.xlane.f32.xlu0 %v399_v10 }
 0x1d2   :  { %v386_v13 = vpop.xlane.xlu2 %385 }
 0x1d3   :  { %v422_v14 = vsub.f32 %v5170_v19, %v386_v13  ;;  %v402_v19 = vsel %vm368_vm1, %v5230_v15, -inf }
 0x1d5   :  { %v5232_v16 = vpop.eup %4724  ;;  %v443_v17 = vmul.f32 1.442695, %v422_v14 }
 0x1d6   :  { %v477_v20 = vsel %vm368_vm1, %v5232_v16, 0.0 }
 0x1d7   :  { %4726 = vpow2.f32 %v443_v17  ;;  %763 = vrot.lane.b32.xlu2 %v761_v41, %s4964_s13  ;;  %478 = vadd.xlane.f32.xlu0 %v477_v20  ;;  %v93_v41 = vld [vmem:[%s7077_s6 + $0x1a8] sm:$0xff] }
 0x1d8   :  { %403 = vmax.xlane.f32.xlu1 %v402_v19  ;;  %v5257_v31 = vadd.f32 %v349_v37, %v93_v41 }
 0x1da   :  { %v408_v36 = vsel %vm368_vm1, %v5257_v31, -inf  ;;  %v389_v42 = vpop.xlane.xlu0 %388 }
 0x1db   :  { %v423_v49 = vsub.f32 %v5177_v24, %v389_v42 }
 0x1dd   :  { %v5247_v25 = vpop.eup %4726  ;;  %v445_v52 = vmul.f32 1.442695, %v423_v49 }
 0x1de   :  { %v480_v26 = vsel %vm368_vm1, %v5247_v25, 0.0 }
 0x1df   :  { %406 = vmax.xlane.f32.xlu0 %v405_v33 }
 0x1e0   :  { %481 = vadd.xlane.f32.xlu1 %v480_v26 }
 0x1e2   :  { %v392_v28 = vpop.xlane.xlu1 %391 }
 0x1e3   :  { %v424_v30 = vsub.f32 %v5184_v29, %v392_v28 }
 0x1e5   :  { %v447_v32 = vmul.f32 1.442695, %v424_v30 }
 0x1e7   :  { %4728 = vpow2.f32 %v447_v32 }
 0x1e8   :  { %409 = vmax.xlane.f32.xlu1 %v408_v36 }
 0x1ea   :  { %v395_v39 = vpop.xlane.xlu1 %394 }
 0x1eb   :  { %v425_v43 = vsub.f32 %v5191_v35, %v395_v39  ;;  %v95_v35 = vld [vmem:[%s7077_s6 + $0x1b8] sm:$0xff] }
 0x1ec   :  { %v5277_v54 = vadd.f32 %v351_v48, %v95_v35 }
 0x1ed   :  { %v5267_v29 = vpop.eup %4728  ;;  %v449_v47 = vmul.f32 1.442695, %v425_v43 }
 0x1ee   :  { %v486_v50 = vsel %vm368_vm1, %v5267_v29, 0.0  ;;  %v414_v57 = vsel %vm368_vm1, %v5277_v54, -inf }
 0x1ef   :  { %4730 = vpow2.f32 %v449_v47  ;;  %487 = vadd.xlane.f32.xlu0 %v486_v50 }
 0x1f0   :  { %412 = vmax.xlane.f32.xlu1 %v411_v51  ;;  %4732 = vpow2.f32 %v445_v52 }
 0x1f5   :  { %v5279_v56 = vpop.eup %4730 }
 0x1f6   :  { %v489_v24 = vsel %vm368_vm1, %v5279_v56, 0.0  ;;  %v5285_v58 = vpop.eup %4732 }
 0x1f7   :  { %415 = vmax.xlane.f32.xlu0 %v414_v57  ;;  %v483_v59 = vsel %vm368_vm1, %v5285_v58, 0.0 }
 0x1f8   :  { %490 = vadd.xlane.f32.xlu1 %v489_v24 }
 0x200   :  { %484 = vadd.xlane.f32.xlu2 %v483_v59 }
 0x22a   :  { %v467_v60 = vpop.xlane.xlu2 %466 }
 0x22b   :  { %4734 = vrcp.f32 %v467_v60  ;;  %v524_v13 = vand.u32 2147483648, %v467_v60  ;;  %vm518_vm3 = vweird.f32 %v467_v60  ;;  %v522_v17 = vand.u32 2147483647, %v467_v60 }
 0x22d   :  { %v525_v33 = vor.u32 1.1754944e-38, %v524_v13  ;;  %vm523_vm7 = vcmp.eq.f32.partialorder %v522_v17, 8.507059e+37 }
 0x231   :  { %v4735_v61 = vpop.eup %4734 }
 0x232   :  { %v514_v63 = vmul.f32 %v4735_v61, %v467_v60  ;;  %v470_v0 = vpop.xlane.xlu0 %469  ;;  %v398_v1 = vpop.xlane.xlu2 %397  ;;  %vm519_vm2 = vweird.f32 %v4735_v61 }
 0x233   :  { %4736 = vrcp.f32 %v470_v0  ;;  %v426_v3 = vsub.f32 %v5202_v53, %v398_v1  ;;  %vm5295_vm4 = vmor %vm518_vm3, %vm519_vm2  ;;  %v539_v21 = vand.u32 2147483648, %v470_v0  ;;  %v537_v19 = vand.u32 2147483647, %v470_v0 }
 0x234   :  { %v515_v2 = vsub.f32 1.0, %v514_v63  ;;  %vm533_vm6 = vweird.f32 %v470_v0 }
 0x235   :  { %v451_v5 = vmul.f32 1.442695, %v426_v3  ;;  %v540_v27 = vor.u32 1.1754944e-38, %v539_v21  ;;  %vm538_vm9 = vcmp.eq.f32.partialorder %v537_v19, 8.507059e+37 }
 0x236   :  { %v516_v7 = vmul.f32 %v4735_v61, %v515_v2 }
 0x237   :  { %4738 = vpow2.f32 %v451_v5 }
 0x238   :  { %v517_v12 = vadd.f32 %v4735_v61, %v516_v7 }
 0x239   :  { %v4737_v8 = vpop.eup %4736 }
 0x23a   :  { %v529_v9 = vmul.f32 %v4737_v8, %v470_v0  ;;  %v5290_v10 = vpop.xlane.xlu0 %472  ;;  %v764_v11 = vpop.permute.xlu2 %763  ;;  %vm534_vm5 = vweird.f32 %v4737_v8  ;;  %v521_v26 = vsel %vm5295_vm4, %v4735_v61, %v517_v12 }
 0x23b   :  { %4740 = vrcp.f32 %v5290_v10  ;;  %797 = vmatpush.bf16.msra.mxu3 %v764_v11  ;;  %vm535_vm8 = vmor %vm533_vm6, %vm534_vm5  ;;  %v526_v34 = vsel %vm523_vm7, %v525_v33, %v521_v26  ;;  %v554_v24 = vand.u32 2147483648, %v5290_v10  ;;  %vm548_vm11 = vweird.f32 %v5290_v10 }
 0x23c   :  { %v530_v14 = vsub.f32 1.0, %v529_v9  ;;  %v527_v42 = vmul.f32 %v5195_v45, %v526_v34  ;;  %v552_v57 = vand.u32 2147483647, %v5290_v10 }
 0x23d   :  { %v5293_v18 = vpop.eup %4738  ;;  %v555_v3 = vor.u32 1.1754944e-38, %v554_v24 }
 0x23e   :  { %v531_v20 = vmul.f32 %v4737_v8, %v530_v14  ;;  %v492_v22 = vsel %vm368_vm1, %v5293_v18, 0.0  ;;  %vm553_vm15 = vcmp.eq.f32.partialorder %v552_v57, 8.507059e+37 }
 0x23f   :  { %493 = vadd.xlane.f32.xlu0 %v492_v22 }
 0x240   :  { %v532_v37 = vadd.f32 %v4737_v8, %v531_v20 }
 0x241   :  { %v4741_v41 = vpop.eup %4740 }
 0x242   :  { %v544_v28 = vmul.f32 %v4741_v41, %v5290_v10  ;;  %v476_v30 = vpop.xlane.xlu1 %475  ;;  %v401_v32 = vpop.xlane.xlu0 %400  ;;  %v536_v36 = vsel %vm535_vm8, %v4737_v8, %v532_v37  ;;  %vm549_vm10 = vweird.f32 %v4741_v41 }
 0x243   :  { %4742 = vrcp.f32 %v476_v30  ;;  %v427_v39 = vsub.f32 %v5217_v4, %v401_v32  ;;  %v541_v40 = vsel %vm538_vm9, %v540_v27, %v536_v36  ;;  %v569_v59 = vand.u32 2147483648, %v476_v30  ;;  %vm5317_vm12 = vmor %vm548_vm11, %vm549_vm10 }
 0x244   :  { %v545_v38 = vsub.f32 1.0, %v544_v28  ;;  %v542_v43 = vmul.f32 %v5204_v55, %v541_v40  ;;  %v567_v0 = vand.u32 2147483647, %v476_v30  ;;  %vm563_vm14 = vweird.f32 %v476_v30 }
 0x245   :  { %v453_v47 = vmul.f32 1.442695, %v427_v39  ;;  %v570_v8 = vor.u32 1.1754944e-38, %v569_v59 }
 0x246   :  { %v546_v48 = vmul.f32 %v4741_v41, %v545_v38  ;;  %v753_v49 = vpack.c.bf16 %v542_v43, %v527_v42  ;;  %vm568_vm3 = vcmp.eq.f32.partialorder %v567_v0, 8.507059e+37 }
 0x247   :  { %4744 = vpow2.f32 %v453_v47 }
 0x248   :  { %3808 = vmatmul.msk.bf16.vlgmr.msra.gmra.mxu3 %vm368_vm1, %v753_v49  ;;  %v547_v52 = vadd.f32 %v4741_v41, %v546_v48 }
 0x249   :  { %v4743_v50 = vpop.eup %4742 }
 0x24a   :  { %v559_v51 = vmul.f32 %v4743_v50, %v476_v30  ;;  %v5308_v35 = vpop.xlane.xlu0 %478  ;;  %vm564_vm13 = vweird.f32 %v4743_v50 }
 0x24b   :  { %4746 = vrcp.f32 %v5308_v35  ;;  %v404_v4 = vpop.xlane.xlu1 %403  ;;  %vm565_vm2 = vmor %vm563_vm14, %vm564_vm13  ;;  %vm578_vm5 = vweird.f32 %v5308_v35  ;;  %v582_v34 = vand.u32 2147483647, %v5308_v35 }
 0x24c   :  { %v560_v45 = vsub.f32 1.0, %v559_v51  ;;  %v428_v55 = vsub.f32 %v5230_v15, %v404_v4  ;;  %v551_v15 = vsel %vm5317_vm12, %v4741_v41, %v547_v52 }
 0x24d   :  { %v5315_v60 = vpop.eup %4744  ;;  %v556_v11 = vsel %vm553_vm15, %v555_v3, %v551_v15  ;;  %vm583_vm8 = vcmp.eq.f32.partialorder %v582_v34, 8.507059e+37 }
 0x24e   :  { %v561_v63 = vmul.f32 %v4743_v50, %v560_v45  ;;  %v455_v1 = vmul.f32 1.442695, %v428_v55  ;;  %v495_v2 = vsel %vm368_vm1, %v5315_v60, 0.0  ;;  %v557_v21 = vmul.f32 %v5210_v62, %v556_v11 }
 0x24f   :  { %496 = vadd.xlane.f32.xlu1 %v495_v2 }
 0x250   :  { %v562_v5 = vadd.f32 %v4743_v50, %v561_v63  ;;  %4748 = vpow2.f32 %v455_v1 }
 0x251   :  { %v4747_v7 = vpop.eup %4746 }
 0x252   :  { %v574_v9 = vmul.f32 %v4747_v7, %v5308_v35  ;;  %v407_v10 = vpop.xlane.xlu0 %406  ;;  %v566_v12 = vsel %vm565_vm2, %v4743_v50, %v562_v5  ;;  %vm579_vm4 = vweird.f32 %v4747_v7 }
 0x253   :  { %v482_v13 = vpop.xlane.xlu1 %481  ;;  %v429_v14 = vsub.f32 %v5245_v23, %v407_v10  ;;  %v571_v17 = vsel %vm568_vm3, %v570_v8, %v566_v12  ;;  %vm5342_vm6 = vmor %vm578_vm5, %vm579_vm4 }
 0x254   :  { %v575_v53 = vsub.f32 1.0, %v574_v9  ;;  %4750 = vrcp.f32 %v482_v13  ;;  %v572_v19 = vmul.f32 %v5220_v6, %v571_v17  ;;  %v584_v6 = vand.u32 2147483648, %v5308_v35 }
 0x255   :  { %v457_v20 = vmul.f32 1.442695, %v429_v14  ;;  %v599_v42 = vand.u32 2147483648, %v482_v13  ;;  %vm593_vm9 = vweird.f32 %v482_v13 }
 0x256   :  { %v5329_v22 = vpop.eup %4748  ;;  %v754_v33 = vpack.c.bf16 %v572_v19, %v557_v21  ;;  %v576_v37 = vmul.f32 %v4747_v7, %v575_v53  ;;  %v585_v47 = vor.u32 1.1754944e-38, %v584_v6 }
 0x257   :  { %4752 = vpow2.f32 %v457_v20  ;;  %v498_v26 = vsel %vm368_vm1, %v5329_v22, 0.0  ;;  %v600_v50 = vor.u32 1.1754944e-38, %v599_v42 }
 0x258   :  { %499 = vadd.xlane.f32.xlu0 %v498_v26  ;;  %3809 = vmatmul.msk.bf16.gmra.mxu3 %vm368_vm1, %v754_v33  ;;  %v577_v28 = vadd.f32 %v4747_v7, %v576_v37 }
 0x25a   :  { %v4751_v23 = vpop.eup %4750  ;;  %v581_v43 = vsel %vm5342_vm6, %v4747_v7, %v577_v28 }
 0x25b   :  { %v589_v41 = vmul.f32 %v4751_v23, %v482_v13  ;;  %v410_v27 = vpop.xlane.xlu1 %409  ;;  %vm594_vm7 = vweird.f32 %v4751_v23  ;;  %v586_v35 = vsel %vm583_vm8, %v585_v47, %v581_v43 }
 0x25c   :  { %v430_v62 = vsub.f32 %v5257_v31, %v410_v27  ;;  %v597_v31 = vand.u32 2147483647, %v482_v13  ;;  %vm595_vm10 = vmor %vm593_vm9, %vm594_vm7  ;;  %v587_v57 = vmul.f32 %v5232_v16, %v586_v35 }
 0x25d   :  { %v5335_v30 = vpop.eup %4752  ;;  %v590_v32 = vsub.f32 1.0, %v589_v41 }
 0x25e   :  { %v459_v36 = vmul.f32 1.442695, %v430_v62  ;;  %v501_v38 = vsel %vm368_vm1, %v5335_v30, 0.0  ;;  %vm598_vm11 = vcmp.eq.f32.partialorder %v597_v31, 8.507059e+37 }
 0x25f   :  { %v591_v40 = vmul.f32 %v4751_v23, %v590_v32  ;;  %502 = vadd.xlane.f32.xlu1 %v501_v38 }
 0x260   :  { %4754 = vpow2.f32 %v459_v36 }
 0x261   :  { %v592_v48 = vadd.f32 %v4751_v23, %v591_v40 }
 0x262   :  { %v488_v49 = vpop.xlane.xlu0 %487 }
 0x263   :  { %v413_v51 = vpop.xlane.xlu1 %412  ;;  %v596_v4 = vsel %vm595_vm10, %v4751_v23, %v592_v48  ;;  %4756 = vrcp.f32 %v488_v49  ;;  %v629_v12 = vand.u32 2147483648, %v488_v49  ;;  %vm623_vm13 = vweird.f32 %v488_v49 }
 0x264   :  { %v431_v52 = vsub.f32 %v5265_v44, %v413_v51  ;;  %v601_v24 = vsel %vm598_vm11, %v600_v50, %v596_v4  ;;  %v627_v13 = vand.u32 2147483647, %v488_v49 }
 0x265   :  { %v602_v59 = vmul.f32 %v5247_v25, %v601_v24  ;;  %v630_v19 = vor.u32 1.1754944e-38, %v629_v12 }
 0x266   :  { %v5349_v45 = vpop.eup %4754  ;;  %v461_v55 = vmul.f32 1.442695, %v431_v52  ;;  %vm628_vm2 = vcmp.eq.f32.partialorder %v627_v13, 8.507059e+37 }
 0x267   :  { %v504_v61 = vsel %vm368_vm1, %v5349_v45, 0.0  ;;  %v755_v63 = vpack.c.bf16 %v602_v59, %v587_v57 }
 0x268   :  { %4758 = vpow2.f32 %v461_v55  ;;  %505 = vadd.xlane.f32.xlu0 %v504_v61 }
 0x269   :  { %3810 = vmatmul.msk.bf16.gmra.mxu3 %vm368_vm1, %v755_v63  ;;  %v4757_v1 = vpop.eup %4756 }
 0x26a   :  { %v416_v0 = vpop.xlane.xlu0 %415  ;;  %v619_v3 = vmul.f32 %v4757_v1, %v488_v49  ;;  %vm624_vm12 = vweird.f32 %v4757_v1 }
 0x26b   :  { %v432_v44 = vsub.f32 %v5277_v54, %v416_v0  ;;  %vm625_vm14 = vmor %vm623_vm13, %vm624_vm12  ;;  %v491_v6 = vpop.xlane.xlu1 %490 }
 0x26c   :  { %v620_v25 = vsub.f32 1.0, %v619_v3  ;;  %v644_v43 = vand.u32 2147483648, %v491_v6  ;;  %vm638_vm7 = vweird.f32 %v491_v6 }
 0x26d   :  { %v463_v2 = vmul.f32 1.442695, %v432_v44 }
 0x26e   :  { %v5357_v15 = vpop.eup %4758  ;;  %v621_v9 = vmul.f32 %v4757_v1, %v620_v25  ;;  %v645_v51 = vor.u32 1.1754944e-38, %v644_v43 }
 0x26f   :  { %4760 = vpow2.f32 %v463_v2  ;;  %v507_v16 = vsel %vm368_vm1, %v5357_v15, 0.0 }
 0x270   :  { %508 = vadd.xlane.f32.xlu1 %v507_v16  ;;  %v622_v10 = vadd.f32 %v4757_v1, %v621_v9 }
 0x272   :  { %v626_v21 = vsel %vm625_vm14, %v4757_v1, %v622_v10 }
 0x273   :  { %v485_v5 = vpop.xlane.xlu2 %484  ;;  %v631_v37 = vsel %vm628_vm2, %v630_v19, %v626_v21 }
 0x274   :  { %4762 = vrcp.f32 %v485_v5  ;;  %v614_v17 = vand.u32 2147483648, %v485_v5  ;;  %v612_v20 = vand.u32 2147483647, %v485_v5  ;;  %vm608_vm3 = vweird.f32 %v485_v5 }
 0x275   :  { %v5361_v7 = vpop.eup %4760  ;;  %v632_v28 = vmul.f32 %v5267_v29, %v631_v37  ;;  %4764 = vrcp.f32 %v491_v6 }
 0x276   :  { %v510_v8 = vsel %vm368_vm1, %v5361_v7, 0.0  ;;  %v615_v33 = vor.u32 1.1754944e-38, %v614_v17  ;;  %vm613_vm5 = vcmp.eq.f32.partialorder %v612_v20, 8.507059e+37 }
 0x277   :  { %511 = vadd.xlane.f32.xlu2 %v510_v8 }
 0x27a   :  { %v4763_v54 = vpop.eup %4762 }
 0x27b   :  { %v604_v11 = vmul.f32 %v4763_v54, %v485_v5  ;;  %vm609_vm15 = vweird.f32 %v4763_v54  ;;  %v4765_v32 = vpop.eup %4764 }
 0x27c   :  { %vm610_vm4 = vmor %vm608_vm3, %vm609_vm15  ;;  %v634_v34 = vmul.f32 %v4765_v32, %v491_v6  ;;  %vm639_vm6 = vweird.f32 %v4765_v32 }
 0x27d   :  { %v605_v14 = vsub.f32 1.0, %v604_v11  ;;  %vm640_vm8 = vmor %vm638_vm7, %vm639_vm6 }
 0x27e   :  { %v635_v38 = vsub.f32 1.0, %v634_v34 }
 0x27f   :  { %v606_v53 = vmul.f32 %v4763_v54, %v605_v14 }
 0x280   :  { %v636_v39 = vmul.f32 %v4765_v32, %v635_v38 }
 0x281   :  { %v607_v26 = vadd.f32 %v4763_v54, %v606_v53 }
 0x282   :  { %v637_v31 = vadd.f32 %v4765_v32, %v636_v39 }
 0x283   :  { %v611_v23 = vsel %vm610_vm4, %v4763_v54, %v607_v26 }
 0x284   :  { %v616_v41 = vsel %vm613_vm5, %v615_v33, %v611_v23  ;;  %v641_v50 = vsel %vm640_vm8, %v4765_v32, %v637_v31 }
 0x285   :  { %v617_v27 = vmul.f32 %v5285_v58, %v616_v41  ;;  %v642_v58 = vand.u32 2147483647, %v491_v6 }
 0x287   :  { %v756_v62 = vpack.c.bf16 %v632_v28, %v617_v27  ;;  %vm643_vm11 = vcmp.eq.f32.partialorder %v642_v58, 8.507059e+37 }
 0x288   :  { %v646_v24 = vsel %vm643_vm11, %v645_v51, %v641_v50 }
 0x289   :  { %3811 = vmatmul.msk.bf16.gmra.mxu3 %vm368_vm1, %v756_v62  ;;  %v647_v59 = vmul.f32 %v5279_v56, %v646_v24 }
 0x2b2   :  { %v494_v36 = vpop.xlane.xlu0 %493 }
 0x2b3   :  { %4766 = vrcp.f32 %v494_v36  ;;  %v659_v48 = vand.u32 2147483648, %v494_v36  ;;  %v657_v49 = vand.u32 2147483647, %v494_v36  ;;  %vm653_vm10 = vweird.f32 %v494_v36 }
 0x2b5   :  { %v660_v52 = vor.u32 1.1754944e-38, %v659_v48  ;;  %vm658_vm13 = vcmp.eq.f32.partialorder %v657_v49, 8.507059e+37 }
 0x2b9   :  { %v4767_v40 = vpop.eup %4766 }
 0x2ba   :  { %v649_v42 = vmul.f32 %v4767_v40, %v494_v36  ;;  %vm654_vm9 = vweird.f32 %v4767_v40 }
 0x2bb   :  { %vm655_vm12 = vmor %vm653_vm10, %vm654_vm9 }
 0x2bc   :  { %v650_v47 = vsub.f32 1.0, %v649_v42 }
 0x2be   :  { %v651_v29 = vmul.f32 %v4767_v40, %v650_v47 }
 0x2c0   :  { %v652_v35 = vadd.f32 %v4767_v40, %v651_v29 }
 0x2c2   :  { %v497_v4 = vpop.xlane.xlu1 %496  ;;  %v656_v55 = vsel %vm655_vm12, %v4767_v40, %v652_v35 }
 0x2c3   :  { %4768 = vrcp.f32 %v497_v4  ;;  %v661_v57 = vsel %vm658_vm13, %v660_v52, %v656_v55  ;;  %vm668_vm15 = vweird.f32 %v497_v4  ;;  %v672_v10 = vand.u32 2147483647, %v497_v4 }
 0x2c4   :  { %v662_v61 = vmul.f32 %v5293_v18, %v661_v57  ;;  %v674_v18 = vand.u32 2147483648, %v497_v4 }
 0x2c5   :  { %vm673_vm5 = vcmp.eq.f32.partialorder %v672_v10, 8.507059e+37 }
 0x2c6   :  { %v757_v63 = vpack.c.bf16 %v662_v61, %v647_v59  ;;  %v675_v20 = vor.u32 1.1754944e-38, %v674_v18 }
 0x2c8   :  { %3812 = vmatmul.msk.bf16.gmra.mxu3 %vm368_vm1, %v757_v63  ;;  %v5397_v63 = vld [vmem:[%s7077_s6 + $0x40] sm:$0xff] }
 0x2c9   :  { %v4769_v0 = vpop.eup %4768 }
 0x2ca   :  { %v664_v44 = vmul.f32 %v4769_v0, %v497_v4  ;;  %vm669_vm14 = vweird.f32 %v4769_v0 }
 0x2cb   :  { %v500_v1 = vpop.xlane.xlu0 %499  ;;  %v5371_v2 = vpop.f32.mrf.mxu3  ;;  %vm5375_vm2 = vmor %vm668_vm15, %vm669_vm14 }
 0x2cc   :  { %4770 = vrcp.f32 %v500_v1  ;;  %v665_v3 = vsub.f32 1.0, %v664_v44  ;;  %v689_v13 = vand.u32 2147483648, %v500_v1  ;;  %v687_v14 = vand.u32 2147483647, %v500_v1 }
 0x2cd   :  { %vm683_vm4 = vweird.f32 %v500_v1 }
 0x2ce   :  { %v666_v16 = vmul.f32 %v4769_v0, %v665_v3  ;;  %v690_v26 = vor.u32 1.1754944e-38, %v689_v13  ;;  %vm688_vm7 = vcmp.eq.f32.partialorder %v687_v14, 8.507059e+37  ;;  %v4523_v13 = vld [vmem:[%s7074_s3 + $0x48] sm:$0xff] }
 0x2cf   :  { %4660 = vmatpush.bf16.msrb.mxu3 %v4523_v13  ;;  %900 = vmatpush.bf16.msrb.mxu1 %v4523_v13  ;;  %v4524_v13 = vld [vmem:[%s7074_s3 + $0x60] sm:$0xff] }
 0x2d0   :  { %v667_v9 = vadd.f32 %v4769_v0, %v666_v16 }
 0x2d2   :  { %v4771_v25 = vpop.eup %4770  ;;  %v503_v5 = vpop.xlane.xlu1 %502  ;;  %v671_v17 = vsel %vm5375_vm2, %v4769_v0, %v667_v9  ;;  %v839_v0 = vmul.f32 %v5397_v63, %v5371_v2 }
 0x2d3   :  { %v679_v8 = vmul.f32 %v4771_v25, %v500_v1  ;;  %4772 = vrcp.f32 %v503_v5  ;;  %v5373_v56 = vpop.f32.mrf.mxu3  ;;  %vm684_vm3 = vweird.f32 %v4771_v25  ;;  %v676_v37 = vsel %vm673_vm5, %v675_v20, %v671_v17 }
 0x2d4   :  { %vm685_vm6 = vmor %vm683_vm4, %vm684_vm3  ;;  %v677_v62 = vmul.f32 %v5315_v60, %v676_v37  ;;  %v704_v31 = vand.u32 2147483648, %v503_v5  ;;  %vm698_vm9 = vweird.f32 %v503_v5  ;;  %v702_v47 = vand.u32 2147483647, %v503_v5  ;;  %v5443_v60 = vld [vmem:[%s7077_s6 + $0x80] sm:$0xff] }
 0x2d5   :  { %v680_v54 = vsub.f32 1.0, %v679_v8 }
 0x2d6   :  { %v705_v49 = vor.u32 1.1754944e-38, %v704_v31  ;;  %vm703_vm12 = vcmp.eq.f32.partialorder %v702_v47, 8.507059e+37 }
 0x2d7   :  { %v681_v12 = vmul.f32 %v4771_v25, %v680_v54 }
 0x2d9   :  { %v4773_v53 = vpop.eup %4772  ;;  %v682_v21 = vadd.f32 %v4771_v25, %v681_v12 }
 0x2da   :  { %v694_v19 = vmul.f32 %v4773_v53, %v503_v5  ;;  %vm699_vm8 = vweird.f32 %v4773_v53 }
 0x2db   :  { %v506_v33 = vpop.xlane.xlu0 %505  ;;  %v686_v23 = vsel %vm685_vm6, %v4771_v25, %v682_v21  ;;  %v5381_v27 = vpop.f32.mrf.mxu3  ;;  %vm5388_vm10 = vmor %vm698_vm9, %vm699_vm8 }
 0x2dc   :  { %v695_v41 = vsub.f32 1.0, %v694_v19  ;;  %4774 = vrcp.f32 %v506_v33  ;;  %v691_v28 = vsel %vm688_vm7, %v690_v26, %v686_v23  ;;  %v719_v58 = vand.u32 2147483648, %v506_v33 }
 0x2dd   :  { %v692_v6 = vmul.f32 %v5329_v22, %v691_v28  ;;  %v717_v29 = vand.u32 2147483647, %v506_v33  ;;  %vm713_vm13 = vweird.f32 %v506_v33 }
 0x2de   :  { %v696_v32 = vmul.f32 %v4773_v53, %v695_v41  ;;  %v720_v52 = vor.u32 1.1754944e-38, %v719_v58  ;;  %v5414_v41 = vld [vmem:[%s7077_s6 + $0x50] sm:$0xff]  ;;  %v5449_v58 = vld [vmem:[%s7077_s6 + $0x88] sm:$0xff] }
 0x2df   :  { %v758_v34 = vpack.c.bf16 %v692_v6, %v677_v62  ;;  %vm718_vm15 = vcmp.eq.f32.partialorder %v717_v29, 8.507059e+37  ;;  %v841_v28 = vmul.f32 %v5414_v41, %v5381_v27  ;;  %v5421_v62 = vld [vmem:[%s7077_s6 + $0x70] sm:$0xff] }
 0x2e0   :  { %v697_v40 = vadd.f32 %v4773_v53, %v696_v32  ;;  %v4522_v32 = vld [vmem:[%s7074_s3 + $0x40] sm:$0xff] }
 0x2e1   :  { %3813 = vmatmul.msk.bf16.gmra.mxu3 %vm368_vm1, %v758_v34  ;;  %901 = vmatpush.bf16.msrb.mxu1 %v4522_v32 }
 0x2e2   :  { %v4775_v36 = vpop.eup %4774  ;;  %v701_v48 = vsel %vm5388_vm10, %v4773_v53, %v697_v40  ;;  %4661 = vmatpush.bf16.msrb.mxu3 %v4522_v32  ;;  %v5430_v40 = vld [vmem:[%s7077_s6 + $0x68] sm:$0xff] }
 0x2e3   :  { %v709_v38 = vmul.f32 %v4775_v36, %v506_v33  ;;  %v509_v39 = vpop.xlane.xlu1 %508  ;;  %v5386_v42 = vpop.f32.mrf.mxu3  ;;  %vm714_vm11 = vweird.f32 %v4775_v36  ;;  %v706_v24 = vsel %vm703_vm12, %v705_v49, %v701_v48  ;;  %v5455_v49 = vld [vmem:[%s7077_s6 + $0xa0] sm:$0xff]  ;;  %v4908_v32 = vld [vmem:[%s7071_s0 + $0x8] sm:$0xff] }
 0x2e4   :  { %4776 = vrcp.f32 %v509_v39  ;;  %vm715_vm14 = vmor %vm713_vm13, %vm714_vm11  ;;  %v707_v1 = vmul.f32 %v5335_v30, %v706_v24  ;;  %v734_v54 = vand.u32 2147483648, %v509_v39  ;;  %vm728_vm3 = vweird.f32 %v509_v39 }
 0x2e5   :  { %v710_v43 = vsub.f32 1.0, %v709_v38  ;;  %v732_v10 = vand.u32 2147483647, %v509_v39 }
 0x2e7   :  { %v711_v22 = vmul.f32 %v4775_v36, %v710_v43  ;;  %vm733_vm6 = vcmp.eq.f32.partialorder %v732_v10, 8.507059e+37  ;;  %v5436_v43 = vld [vmem:[%s7077_s6 + $0x48] sm:$0xff] }
 0x2e8   :  { %v840_v47 = vmul.f32 %v5436_v43, %v5373_v56 }
 0x2e9   :  { %v712_v50 = vadd.f32 %v4775_v36, %v711_v22 }
 0x2ea   :  { %v4777_v51 = vpop.eup %4776  ;;  %v512_v35 = vpop.xlane.xlu2 %511 }
 0x2eb   :  { %v724_v4 = vmul.f32 %v4777_v51, %v509_v39  ;;  %4778 = vrcp.f32 %v512_v35  ;;  %v716_v55 = vsel %vm715_vm14, %v4775_v36, %v712_v50  ;;  %vm729_vm2 = vweird.f32 %v4777_v51 }
 0x2ec   :  { %v809_v59 = vpop.f32.mrf.mxu3  ;;  %v721_v61 = vsel %vm718_vm15, %v720_v52, %v716_v55  ;;  %vm730_vm4 = vmor %vm728_vm3, %vm729_vm2  ;;  %v749_v2 = vand.u32 2147483648, %v512_v35  ;;  %v747_v30 = vand.u32 2147483647, %v512_v35  ;;  %vm743_vm7 = vweird.f32 %v512_v35  ;;  %v5461_v52 = vld [vmem:[%s7077_s6 + $0xa8] sm:$0xff] }
 0x2ed   :  { %v725_v57 = vsub.f32 1.0, %v724_v4  ;;  %v843_v44 = vmul.f32 %v809_v59, %v5129_v46  ;;  %v722_v3 = vmul.f32 %v5349_v45, %v721_v61  ;;  %v735_v45 = vor.u32 1.1754944e-38, %v734_v54  ;;  %v5468_v61 = vld [vmem:[%s7077_s6 + $0x78] sm:$0xff] }
 0x2ee   :  { %v750_v17 = vor.u32 1.1754944e-38, %v749_v2  ;;  %vm748_vm9 = vcmp.eq.f32.partialorder %v747_v30, 8.507059e+37 }
 0x2ef   :  { %v726_v16 = vmul.f32 %v4777_v51, %v725_v57  ;;  %v855_v25 = vadd.f32 %v843_v44, %v839_v0  ;;  %v759_v5 = vpack.c.bf16 %v722_v3, %v707_v1  ;;  %v5474_v44 = vld [vmem:[%s7077_s6 + $0x58] sm:$0xff]  ;;  %v5481_v3 = vld [vmem:[%s7077_s6 + $0x90] sm:$0xff] }
 0x2f0   :  { %v842_v1 = vmul.f32 %v5474_v44, %v5386_v42 }
 0x2f1   :  { %v4779_v8 = vpop.eup %4778  ;;  %v727_v9 = vadd.f32 %v4777_v51, %v726_v16  ;;  %3814 = vmatmul.msk.bf16.gmra.mxu3 %vm368_vm1, %v759_v5 }
 0x2f2   :  { %v739_v18 = vmul.f32 %v4779_v8, %v512_v35  ;;  %vm744_vm5 = vweird.f32 %v4779_v8 }
 0x2f3   :  { %v731_v12 = vsel %vm730_vm4, %v4777_v51, %v727_v9  ;;  %vm745_vm8 = vmor %vm743_vm7, %vm744_vm5  ;;  %v5493_v9 = vld [vmem:[%s7077_s6 + $0xb0] sm:$0xff] }
 0x2f4   :  { %v740_v11 = vsub.f32 1.0, %v739_v18  ;;  %v736_v53 = vsel %vm733_vm6, %v735_v45, %v731_v12  ;;  %v811_v37 = vpop.f32.mrf.mxu3  ;;  %v4525_v45 = vld [vmem:[%s7074_s3 + $0x68] sm:$0xff] }
 0x2f5   :  { %v737_v19 = vmul.f32 %v5357_v15, %v736_v53  ;;  %v844_v31 = vmul.f32 %v5430_v40, %v811_v37  ;;  %982 = vmatpush.bf16.msrb.mxu0 %v4525_v45  ;;  %v4517_v45 = vld [vmem:[%s7075_s4 + $0x8] sm:$0xff] }
 0x2f6   :  { %v741_v46 = vmul.f32 %v4779_v8, %v740_v11  ;;  %v5499_v11 = vld [vmem:[%s7077_s6 + $0xb8] sm:$0xff]  ;;  %1073 = vmatpush.bf16.msra.mxu1 %v4517_v45 }
 0x2f7   :  { %v856_v48 = vadd.f32 %v844_v31, %v840_v47 }
 0x2f8   :  { %v742_v14 = vadd.f32 %v4779_v8, %v741_v46 }
 0x2f9   :  { %983 = vmatpush.bf16.msrb.mxu0 %v4524_v13  ;;  %v4516_v13 = vld [vmem:[%s7075_s4] sm:$0xff] }
 0x2fa   :  { %v746_v20 = vsel %vm745_vm8, %v4779_v8, %v742_v14  ;;  %v4675_v14 = vld [vmem:[%s7073_s2 + $0xe] ss:$0 sm:$0xff]  ;;  %1074 = vmatpush.bf16.msra.mxu1 %v4516_v13 }
 0x2fb   :  { %v751_v21 = vsel %vm748_vm9, %v750_v17, %v746_v20  ;;  %v4676_v17 = vld [vmem:[%s7073_s2 + $0x6] ss:$0 sm:$0xff] }
 0x2fc   :  { %v752_v26 = vmul.f32 %v5361_v7, %v751_v21  ;;  %v4677_v21 = vld [vmem:[%s7073_s2 + $0x7] ss:$0 sm:$0xff] }
 0x2fd   :  { %1112 = vmatpush.bf16.msra.mxu0 %v4517_v45  ;;  %v40_v45 = vld [vmem:[%s7077_s6] sm:$0xff] }
 0x2fe   :  { %v760_v33 = vpack.c.bf16 %v752_v26, %v737_v19 }
 0x301   :  { %3815 = vmatmul.msk.bf16.gmra.mxu3 %vm368_vm1, %v760_v33  ;;  %v4907_v33 = vld [vmem:[%s7071_s0] sm:$0xff]  ;;  %1113 = vmatpush.bf16.msra.mxu0 %v4516_v13 }
 0x30c   :  { %v814_v23 = vpop.f32.mrf.mxu3 }
 0x30d   :  { %v845_v15 = vmul.f32 %v5421_v62, %v814_v23 }
 0x30f   :  { %v857_v7 = vadd.f32 %v845_v15, %v841_v28 }
 0x314   :  { %v816_v6 = vpop.f32.mrf.mxu3 }
 0x315   :  { %v846_v0 = vmul.f32 %v5468_v61, %v816_v6 }
 0x317   :  { %v858_v8 = vadd.f32 %v846_v0, %v842_v1 }
 0x34b   :  { %v819_v34 = vpop.f32.mrf.mxu3 }
 0x34c   :  { %v847_v22 = vmul.f32 %v5443_v60, %v819_v34 }
 0x34e   :  { %v859_v51 = vadd.f32 %v855_v25, %v847_v22  ;;  %v5487_v25 = vld [vmem:[%s7077_s6 + $0x98] sm:$0xff]  ;;  %v4679_v22 = vld [vmem:[%s7073_s2 + $0x3] ss:$0 sm:$0xff] }
 0x353   :  { %v821_v36 = vpop.f32.mrf.mxu3 }
 0x354   :  { %v848_v29 = vmul.f32 %v5449_v58, %v821_v36 }
 0x356   :  { %v860_v35 = vadd.f32 %v856_v48, %v848_v29 }
 0x364   :  { %v824_v38 = vpop.f32.mrf.mxu3 }
 0x365   :  { %v849_v16 = vmul.f32 %v5481_v3, %v824_v38  ;;  %v4678_v38 = vld [vmem:[%s7073_s2 + $0x2] ss:$0 sm:$0xff] }
 0x367   :  { %v861_v54 = vadd.f32 %v857_v7, %v849_v16 }
 0x36c   :  { %v826_v39 = vpop.f32.mrf.mxu3 }
 0x36d   :  { %v850_v5 = vmul.f32 %v5487_v25, %v826_v39 }
 0x36f   :  { %v862_v10 = vadd.f32 %v858_v8, %v850_v5  ;;  %v4910_v5 = vld [vmem:[%s7071_s0 + $0x18] sm:$0xff] }
 0x374   :  { %v829_v27 = vpop.f32.mrf.mxu3 }
 0x375   :  { %v851_v56 = vmul.f32 %v5455_v49, %v829_v27 }
 0x377   :  { %v863_v24 = vadd.f32 %v859_v51, %v851_v56 }
 0x37c   :  { %v831_v50 = vpop.f32.mrf.mxu3 }
 0x37d   :  { %v852_v4 = vmul.f32 %v5461_v52, %v831_v50 }
 0x37f   :  { %v864_v55 = vadd.f32 %v860_v35, %v852_v4  ;;  %v4909_v4 = vld [vmem:[%s7071_s0 + $0x10] sm:$0xff] }
 0x381   :  { %v872_v57 = vpack.c.bf16 %v864_v55, %v863_v24 }
 0x383   :  { %3828 = vmatmul.msk.bf16.vlgmr.msrb.gmra.mxu1 %vm140_vm0, %v872_v57 }
 0x384   :  { %v834_v59 = vpop.f32.mrf.mxu3 }
 0x385   :  { %v853_v42 = vmul.f32 %v5493_v9, %v834_v59 }
 0x387   :  { %v865_v46 = vadd.f32 %v861_v54, %v853_v42 }
 0x38c   :  { %v836_v18 = vpop.f32.mrf.mxu3 }
 0x38d   :  { %v854_v2 = vmul.f32 %v5499_v11, %v836_v18 }
 0x38f   :  { %v866_v30 = vadd.f32 %v862_v10, %v854_v2 }
 0x391   :  { %v873_v12 = vpack.c.bf16 %v866_v30, %v865_v46 }
 0x393   :  { %3829 = vmatmul.msk.bf16.vlgmr.msrb.gmra.mxu3 %vm140_vm0, %v873_v12 }
 0x400   :  { %v903_v53 = vpop.f32.mrf.mxu1 }
 0x401   :  { %v904_v20 = vadd.f32 %v4675_v14, %v903_v53 }
 0x403   :  { %v916_v19 = vmul.f32 %v4676_v17, %v904_v20 }
 0x405   :  { %v921_v26 = vadd.f32 %v4677_v21, %v916_v19 }
 0x407   :  { %v5521_v37 = vadd.f32 %v4907_v33, %v921_v26 }
 0x408   :  { %v905_v23 = vpop.f32.mrf.mxu1 }
 0x409   :  { %v906_v28 = vadd.f32 %v4675_v14, %v905_v23  ;;  %v930_v15 = vmul.f32 0.2, %v5521_v37 }
 0x40b   :  { %v917_v7 = vmul.f32 %v4676_v17, %v906_v28  ;;  %4780 = vtanh.f32 %v930_v15  ;;  %v4681_v28 = vld [vmem:[%s7073_s2 + $0x15] ss:$0 sm:$0xff] }
 0x40d   :  { %v922_v6 = vadd.f32 %v4677_v21, %v917_v7  ;;  %v4682_v7 = vld [vmem:[%s7073_s2 + $0x16] ss:$0 sm:$0xff] }
 0x40f   :  { %v5527_v34 = vadd.f32 %v4908_v32, %v922_v6 }
 0x411   :  { %v931_v36 = vmul.f32 0.2, %v5527_v34  ;;  %v4781_v39 = vpop.eup %4780 }
 0x412   :  { %v939_v47 = vmul.f32 %v4781_v39, %v4678_v38 }
 0x413   :  { %4782 = vtanh.f32 %v931_v36 }
 0x414   :  { %v945_v51 = vadd.f32 %v4679_v22, %v939_v47 }
 0x416   :  { %v908_v27 = vpop.f32.mrf.mxu3 }
 0x417   :  { %v909_v31 = vadd.f32 %v4675_v14, %v908_v27 }
 0x419   :  { %v4783_v29 = vpop.eup %4782  ;;  %v918_v48 = vmul.f32 %v4676_v17, %v909_v31 }
 0x41a   :  { %v940_v56 = vmul.f32 %v4783_v29, %v4678_v38 }
 0x41b   :  { %v923_v50 = vadd.f32 %v4677_v21, %v918_v48 }
 0x41c   :  { %v946_v35 = vadd.f32 %v4679_v22, %v940_v56 }
 0x41d   :  { %v5539_v24 = vadd.f32 %v4909_v4, %v923_v50 }
 0x41e   :  { %v910_v55 = vpop.f32.mrf.mxu3  ;;  %v954_v57 = vpack.c.bf16 %v946_v35, %v945_v51 }
 0x41f   :  { %v911_v59 = vadd.f32 %v4675_v14, %v910_v55  ;;  %v932_v0 = vmul.f32 0.2, %v5539_v24  ;;  %v4680_v14 = vld [vmem:[%s7073_s2 + $0xf] ss:$0 sm:$0xff] }
 0x420   :  { %3842 = vmatmul.msk.bf16.vlgmr.msrb.gmra.mxu0 %vm140_vm0, %v954_v57 }
 0x421   :  { %v919_v1 = vmul.f32 %v4676_v17, %v911_v59  ;;  %4784 = vtanh.f32 %v932_v0 }
 0x423   :  { %v924_v16 = vadd.f32 %v4677_v21, %v919_v1  ;;  %v4683_v1 = vld [vmem:[%s7073_s2 + $0x17] ss:$0 sm:$0xff] }
 0x425   :  { %v5546_v8 = vadd.f32 %v4910_v5, %v924_v16 }
 0x427   :  { %v933_v42 = vmul.f32 0.2, %v5546_v8  ;;  %v4785_v18 = vpop.eup %4784 }
 0x428   :  { %v941_v54 = vmul.f32 %v4785_v18, %v4678_v38 }
 0x429   :  { %4786 = vtanh.f32 %v933_v42  ;;  %v4684_v42 = vld [vmem:[%s7073_s2 + $0x18] ss:$0 sm:$0xff] }
 0x42a   :  { %v947_v46 = vadd.f32 %v4679_v22, %v941_v54 }
 0x42f   :  { %v4787_v10 = vpop.eup %4786 }
 0x430   :  { %v942_v2 = vmul.f32 %v4787_v10, %v4678_v38 }
 0x432   :  { %v948_v30 = vadd.f32 %v4679_v22, %v942_v2 }
 0x434   :  { %v955_v12 = vpack.c.bf16 %v948_v30, %v947_v46 }
 0x436   :  { %3843 = vmatmul.msk.bf16.gmra.mxu0 %vm140_vm0, %v955_v12  ;;  %v44_v12 = vld [vmem:[%s7077_s6 + $0x20] sm:$0xff] }
 0x49d   :  { %v985_v17 = vpop.f32.mrf.mxu0 }
 0x49e   :  { %v5559_v53 = vadd.f32 %v4680_v14, %v985_v17 }
 0x4a0   :  { %v996_v20 = vmul.f32 0.2, %v5559_v53 }
 0x4a2   :  { %4788 = vtanh.f32 %v996_v20  ;;  %v41_v20 = vld [vmem:[%s7077_s6 + $0x8] sm:$0xff] }
 0x4a5   :  { %v987_v21 = vpop.f32.mrf.mxu0 }
 0x4a6   :  { %v5562_v19 = vadd.f32 %v4680_v14, %v987_v21 }
 0x4a8   :  { %v4789_v26 = vpop.eup %4788  ;;  %v997_v33 = vmul.f32 0.2, %v5562_v19  ;;  %v1662_v23 = vpack.c.bf16 %v5562_v19, %v5559_v53 }
 0x4a9   :  { %1021 = vrot.lane.b32.xlu0 %v4789_v26, %s4964_s13  ;;  %v1005_v15 = vmul.f32 %v4789_v26, %v4681_v28 }
 0x4aa   :  { %4790 = vtanh.f32 %v997_v33  ;;  %v45_v33 = vld [vmem:[%s7077_s6 + $0x28] sm:$0xff] }
 0x4ab   :  { %v1011_v36 = vadd.f32 %v4682_v7, %v1005_v15 }
 0x4ad   :  { %v1043_v21 = vmul.f32 %v1011_v36, %v40_v45 }
 0x4b0   :  { %v4791_v6 = vpop.eup %4790 }
 0x4b1   :  { %v1006_v32 = vmul.f32 %v4791_v6, %v4681_v28  ;;  %1023 = vrot.lane.b32.xlu1 %v4791_v6, %s4964_s13 }
 0x4b3   :  { %v1012_v38 = vadd.f32 %v4682_v7, %v1006_v32  ;;  %v990_v39 = vpop.f32.mrf.mxu0 }
 0x4b4   :  { %v5575_v27 = vadd.f32 %v4680_v14, %v990_v39 }
 0x4b5   :  { %v1047_v31 = vpack.c.bf16 %v1012_v38, %v1011_v36  ;;  %v1044_v32 = vmul.f32 %v1012_v38, %v41_v20  ;;  %v4911_v36 = vld [vmem:[%s7077_s6 + $0x60] sm:$0xff] }
 0x4b6   :  { %v998_v47 = vmul.f32 0.2, %v5575_v27 }
 0x4b7   :  { %3852 = vmatmul.msk.bf16.vlgmr.msra.gmra.mxu1 %vm140_vm0, %v1047_v31 }
 0x4b8   :  { %4792 = vtanh.f32 %v998_v47 }
 0x4bb   :  { %v992_v22 = vpop.f32.mrf.mxu0 }
 0x4bc   :  { %v5579_v29 = vadd.f32 %v4680_v14, %v992_v22 }
 0x4be   :  { %v4793_v48 = vpop.eup %4792  ;;  %v999_v56 = vmul.f32 0.2, %v5579_v29  ;;  %v1663_v50 = vpack.c.bf16 %v5579_v29, %v5575_v27 }
 0x4bf   :  { %1025 = vrot.lane.b32.xlu2 %v4793_v48, %s4964_s13  ;;  %v1007_v51 = vmul.f32 %v4793_v48, %v4681_v28 }
 0x4c0   :  { %4794 = vtanh.f32 %v999_v56 }
 0x4c1   :  { %v1013_v55 = vadd.f32 %v4682_v7, %v1007_v51 }
 0x4c6   :  { %v4795_v35 = vpop.eup %4794 }
 0x4c7   :  { %1027 = vrot.lane.b32.xlu0 %v4795_v35, %s4964_s13  ;;  %v1008_v4 = vmul.f32 %v4795_v35, %v4681_v28  ;;  %s4968_s13 = smov 8  }
 0x4c9   :  { %v1014_v57 = vadd.f32 %v4682_v7, %v1008_v4 }
 0x4cb   :  { %v1048_v59 = vpack.c.bf16 %v1014_v57, %v1013_v55 }
 0x4cd   :  { %3853 = vmatmul.msk.bf16.gmra.mxu1 %vm140_vm0, %v1048_v59 }
 0x519   :  { %v1026_v30 = vpop.permute.xlu2 %1025 }
 0x51a   :  { %v1035_v13 = vmul.f32 %v4683_v1, %v1026_v30 }
 0x51b   :  { %v1022_v0 = vpop.permute.xlu0 %1021 }
 0x51c   :  { %v1033_v16 = vmul.f32 %v4683_v1, %v1022_v0  ;;  %v1041_v28 = vadd.f32 %v4684_v42, %v1035_v13 }
 0x51e   :  { %v5593_v54 = vadd.f32 %v4684_v42, %v1033_v16 }
 0x523   :  { %v1024_v5 = vpop.permute.xlu1 %1023 }
 0x524   :  { %v1034_v18 = vmul.f32 %v4683_v1, %v1024_v5 }
 0x526   :  { %v5595_v10 = vadd.f32 %v4684_v42, %v1034_v18 }
 0x528   :  { %v1098_v2 = vpack.c.bf16 %v5595_v10, %v5593_v54 }
 0x52a   :  { %3854 = vmatmul.msk.bf16.vlgmr.msra.gmra.mxu0 %vm140_vm0, %v1098_v2 }
 0x534   :  { %v1076_v46 = vpop.f32.mrf.mxu1 }
 0x535   :  { %v1086_v14 = vmul.f32 %v1076_v46, %v44_v12 }
 0x537   :  { %v1090_v15 = vadd.f32 %v1086_v14, %v1043_v21 }
 0x539   :  { %v1028_v17 = vpop.permute.xlu0 %1027  ;;  %v1133_v22 = vmul.f32 %v5397_v63, %v1090_v15  ;;  %v1137_v48 = vmul.f32 %v4911_v36, %v1090_v15  ;;  %v1141_v56 = vmul.f32 %v5443_v60, %v1090_v15  ;;  %v1145_v51 = vmul.f32 %v5455_v49, %v1090_v15  ;;  %v42_v60 = vld [vmem:[%s7077_s6 + $0x10] sm:$0xff]  ;;  %v47_v49 = vld [vmem:[%s7077_s6 + $0x38] sm:$0xff] }
 0x53a   :  { %v1036_v26 = vmul.f32 %v4683_v1, %v1028_v17 }
 0x53c   :  { %v1042_v7 = vadd.f32 %v4684_v42, %v1036_v26  ;;  %v1078_v6 = vpop.f32.mrf.mxu1  ;;  %v46_v42 = vld [vmem:[%s7077_s6 + $0x30] sm:$0xff] }
 0x53d   :  { %v1087_v39 = vmul.f32 %v1078_v6, %v45_v33 }
 0x53e   :  { %v1099_v31 = vpack.c.bf16 %v1042_v7, %v1041_v28 }
 0x53f   :  { %v1091_v47 = vadd.f32 %v1087_v39, %v1044_v32 }
 0x540   :  { %3855 = vmatmul.msk.bf16.gmra.mxu0 %vm140_vm0, %v1099_v31 }
 0x541   :  { %v1134_v35 = vmul.f32 %v5436_v43, %v1091_v47  ;;  %v1138_v38 = vmul.f32 %v5430_v40, %v1091_v47  ;;  %v1142_v4 = vmul.f32 %v5449_v58, %v1091_v47  ;;  %v1146_v59 = vmul.f32 %v5461_v52, %v1091_v47  ;;  %v43_v40 = vld [vmem:[%s7077_s6 + $0x18] sm:$0xff] }
 0x542   :  { %v1045_v58 = vmul.f32 %v1013_v55, %v42_v60  ;;  %v1046_v2 = vmul.f32 %v1014_v57, %v43_v40 }
 0x543   :  { %v1149_v63 = vpack.c.bf16 %v1134_v35, %v1133_v22  ;;  %v1151_v0 = vpack.c.bf16 %v1138_v38, %v1137_v48  ;;  %v1153_v1 = vpack.c.bf16 %v1142_v4, %v1141_v56  ;;  %v1155_v16 = vpack.c.bf16 %v1146_v59, %v1145_v51 }
 0x544   :  { %v1097_v51 = vmul.f32 %v1042_v7, %v43_v40 }
 0x54a   :  { %v1081_v5 = vpop.f32.mrf.mxu1 }
 0x54b   :  { %v1088_v43 = vmul.f32 %v1081_v5, %v46_v42 }
 0x54d   :  { %v1092_v52 = vadd.f32 %v1088_v43, %v1045_v58 }
 0x54f   :  { %v1135_v13 = vmul.f32 %v5414_v41, %v1092_v52  ;;  %v1139_v14 = vmul.f32 %v5421_v62, %v1092_v52  ;;  %v1143_v17 = vmul.f32 %v5481_v3, %v1092_v52  ;;  %v1147_v21 = vmul.f32 %v5493_v9, %v1092_v52 }
 0x550   :  { %v1095_v62 = vmul.f32 %v5595_v10, %v41_v20  ;;  %v1094_v3 = vmul.f32 %v5593_v54, %v40_v45  ;;  %v64_v45 = vld [vmem:[%s7077_s6 + $0xc0] sm:$0xff] }
 0x552   :  { %v1083_v18 = vpop.f32.mrf.mxu1 }
 0x553   :  { %v1089_v46 = vmul.f32 %v1083_v18, %v47_v49 }
 0x555   :  { %v1093_v30 = vadd.f32 %v1089_v46, %v1046_v2 }
 0x557   :  { %v1136_v26 = vmul.f32 %v5474_v44, %v1093_v30  ;;  %v1140_v55 = vmul.f32 %v5468_v61, %v1093_v30  ;;  %v1144_v15 = vmul.f32 %v5487_v25, %v1093_v30  ;;  %v1148_v6 = vmul.f32 %v5499_v11, %v1093_v30  ;;  %v68_v30 = vld [vmem:[%s7077_s6 + $0xe0] sm:$0xff] }
 0x558   :  { %v1096_v11 = vmul.f32 %v1041_v28, %v42_v60 }
 0x559   :  { %v1150_v32 = vpack.c.bf16 %v1136_v26, %v1135_v13  ;;  %v1152_v57 = vpack.c.bf16 %v1140_v55, %v1139_v14  ;;  %v1154_v39 = vpack.c.bf16 %v1144_v15, %v1143_v17  ;;  %v1156_v31 = vpack.c.bf16 %v1148_v6, %v1147_v21  ;;  %v69_v26 = vld [vmem:[%s7077_s6 + $0xe8] sm:$0xff] }
 0x5a7   :  { %v1115_v47 = vpop.f32.mrf.mxu0 }
 0x5a8   :  { %v1125_v41 = vmul.f32 %v1115_v47, %v44_v12 }
 0x5aa   :  { %v1129_v36 = vadd.f32 %v1125_v41, %v1094_v3 }
 0x5af   :  { %v1117_v22 = vpop.f32.mrf.mxu0 }
 0x5b0   :  { %v1126_v9 = vmul.f32 %v1117_v22, %v45_v33  ;;  %v71_v22 = vld [vmem:[%s7077_s6 + $0xf8] sm:$0xff] }
 0x5b2   :  { %v1130_v44 = vadd.f32 %v1126_v9, %v1095_v62 }
 0x5b4   :  { %v1157_v48 = vpack.c.bf16 %v1130_v44, %v1129_v36  ;;  %v72_v44 = vld [vmem:[%s7077_s6 + $0x100] sm:$0xff] }
 0x5b6   :  { %v1184_v10 = vsel %vm140_vm0, %v1157_v48, 0 }
 0x5bd   :  { %v1120_v61 = vpop.f32.mrf.mxu0 }
 0x5be   :  { %v1127_v56 = vmul.f32 %v1120_v61, %v46_v42  ;;  %v66_v42 = vld [vmem:[%s7077_s6 + $0xd0] sm:$0xff] }
 0x5c0   :  { %v1131_v38 = vadd.f32 %v1127_v56, %v1096_v11 }
 0x5c5   :  { %v1122_v25 = vpop.f32.mrf.mxu0 }
 0x5c6   :  { %v1128_v35 = vmul.f32 %v1122_v25, %v47_v49  ;;  %v67_v49 = vld [vmem:[%s7077_s6 + $0xd8] sm:$0xff] }
 0x5c8   :  { %v1132_v4 = vadd.f32 %v1128_v35, %v1097_v51  ;;  %v73_v51 = vld [vmem:[%s7077_s6 + $0x108] sm:$0xff] }
 0x5ca   :  { %v1158_v59 = vpack.c.bf16 %v1132_v4, %v1131_v38 }
 0x5cc   :  { %v1187_v12 = vsel %vm140_vm0, %v1158_v59, 0 }
 0x5cd   :  { %1195 = vmatpush.bf16.xpose.msrb.mxu1 %v1187_v12 }
 0x5d5   :  { %1196 = vmatpush.bf16.xpose.msrb.mxu1 %v1184_v10 }
 0x5dc   :  { %3856 = vmatmul.msk.bf16.vlgmr.msrb.gmra.mxu1 %vm140_vm0, %v1149_v63  ;;  %v65_v63 = vld [vmem:[%s7077_s6 + $0xc8] sm:$0xff] }
 0x5ec   :  { %3857 = vmatmul.msk.bf16.gmra.mxu1 %vm140_vm0, %v1150_v32 }
 0x5fc   :  { %3858 = vmatmul.msk.bf16.gmra.mxu1 %vm140_vm0, %v1151_v0 }
 0x60c   :  { %3859 = vmatmul.msk.bf16.gmra.mxu1 %vm140_vm0, %v1152_v57  ;;  %v70_v57 = vld [vmem:[%s7077_s6 + $0xf0] sm:$0xff] }
 0x61c   :  { %3860 = vmatmul.msk.bf16.gmra.mxu1 %vm140_vm0, %v1153_v1 }
 0x62c   :  { %3861 = vmatmul.msk.bf16.gmra.mxu1 %vm140_vm0, %v1154_v39 }
 0x63c   :  { %3862 = vmatmul.msk.bf16.gmra.mxu1 %vm140_vm0, %v1155_v16 }
 0x64c   :  { %3863 = vmatmul.msk.bf16.gmra.mxu1 %vm140_vm0, %v1156_v31 }
 0x659   :  { %v1198_v54 = vpop.f32.mrf.mxu1 }
 0x65a   :  { %v1238_v20 = vmul.f32 0.35355338, %v1198_v54 }
 0x65c   :  { %v1254_v33 = vadd.f32 %v1238_v20, %v64_v45 }
 0x65e   :  { %v1270_v28 = vsel %vm140_vm0, %v1254_v33, -inf }
 0x65f   :  { %1271 = vmax.xlane.f32.xlu1 %v1270_v28 }
 0x661   :  { %v1200_v7 = vpop.f32.mrf.mxu1 }
 0x662   :  { %v1239_v0 = vmul.f32 0.35355338, %v1200_v7 }
 0x664   :  { %v1255_v1 = vadd.f32 %v1239_v0, %v65_v63 }
 0x666   :  { %v1273_v16 = vsel %vm140_vm0, %v1255_v1, -inf }
 0x667   :  { %1274 = vmax.xlane.f32.xlu2 %v1273_v16  ;;  %v74_v16 = vld [vmem:[%s7077_s6 + $0x110] sm:$0xff] }
 0x669   :  { %v1203_v5 = vpop.f32.mrf.mxu1 }
 0x66a   :  { %v1240_v60 = vmul.f32 0.35355338, %v1203_v5 }
 0x66c   :  { %v5666_v43 = vadd.f32 %v1240_v60, %v66_v42 }
 0x66e   :  { %v1276_v40 = vsel %vm140_vm0, %v5666_v43, -inf }
 0x66f   :  { %1277 = vmax.xlane.f32.xlu0 %v1276_v40 }
 0x671   :  { %v1205_v58 = vpop.f32.mrf.mxu1 }
 0x672   :  { %v1241_v52 = vmul.f32 0.35355338, %v1205_v58 }
 0x674   :  { %v5673_v18 = vadd.f32 %v1241_v52, %v67_v49  ;;  %v75_v52 = vld [vmem:[%s7077_s6 + $0x118] sm:$0xff] }
 0x676   :  { %v1279_v2 = vsel %vm140_vm0, %v5673_v18, -inf }
 0x677   :  { %1280 = vmax.xlane.f32.xlu2 %v1279_v2 }
 0x679   :  { %v1208_v46 = vpop.f32.mrf.mxu1 }
 0x67a   :  { %v1242_v13 = vmul.f32 0.35355338, %v1208_v46 }
 0x67c   :  { %v5680_v14 = vadd.f32 %v1242_v13, %v68_v30 }
 0x67e   :  { %v1282_v17 = vsel %vm140_vm0, %v5680_v14, -inf }
 0x67f   :  { %1283 = vmax.xlane.f32.xlu1 %v1282_v17 }
 0x681   :  { %v1210_v21 = vpop.f32.mrf.mxu1 }
 0x682   :  { %v1243_v55 = vmul.f32 0.35355338, %v1210_v21 }
 0x684   :  { %v5687_v15 = vadd.f32 %v1243_v55, %v69_v26 }
 0x686   :  { %v1285_v6 = vsel %vm140_vm0, %v5687_v15, -inf }
 0x687   :  { %1286 = vmax.xlane.f32.xlu0 %v1285_v6 }
 0x689   :  { %v1213_v32 = vpop.f32.mrf.mxu1 }
 0x68a   :  { %v1244_v39 = vmul.f32 0.35355338, %v1213_v32 }
 0x68c   :  { %v5694_v31 = vadd.f32 %v1244_v39, %v70_v57 }
 0x68e   :  { %v1288_v47 = vsel %vm140_vm0, %v5694_v31, -inf }
 0x68f   :  { %1289 = vmax.xlane.f32.xlu2 %v1288_v47 }
 0x691   :  { %v1215_v41 = vpop.f32.mrf.mxu1 }
 0x692   :  { %v1245_v62 = vmul.f32 0.35355338, %v1215_v41 }
 0x694   :  { %v5701_v3 = vadd.f32 %v1245_v62, %v71_v22 }
 0x696   :  { %v1291_v9 = vsel %vm140_vm0, %v5701_v3, -inf }
 0x697   :  { %1292 = vmax.xlane.f32.xlu1 %v1291_v9 }
 0x699   :  { %v1218_v36 = vpop.f32.mrf.mxu1 }
 0x69a   :  { %v1246_v48 = vmul.f32 0.35355338, %v1218_v36 }
 0x69c   :  { %v5708_v61 = vadd.f32 %v1246_v48, %v72_v44 }
 0x69e   :  { %v1294_v56 = vsel %vm140_vm0, %v5708_v61, -inf }
 0x69f   :  { %1295 = vmax.xlane.f32.xlu1 %v1294_v56 }
 0x6a1   :  { %v1220_v25 = vpop.f32.mrf.mxu1 }
 0x6a2   :  { %v1247_v11 = vmul.f32 0.35355338, %v1220_v25 }
 0x6a4   :  { %v5715_v35 = vadd.f32 %v1247_v11, %v73_v51 }
 0x6a6   :  { %v1297_v38 = vsel %vm140_vm0, %v5715_v35, -inf }
 0x6a7   :  { %1298 = vmax.xlane.f32.xlu0 %v1297_v38 }
 0x6a9   :  { %v1223_v12 = vpop.f32.mrf.mxu1 }
 0x6aa   :  { %v1248_v7 = vmul.f32 0.35355338, %v1223_v12 }
 0x6ac   :  { %v5726_v5 = vadd.f32 %v1248_v7, %v74_v16 }
 0x6ae   :  { %v1300_v49 = vsel %vm140_vm0, %v5726_v5, -inf }
 0x6b1   :  { %v1225_v0 = vpop.f32.mrf.mxu1 }
 0x6b2   :  { %v1249_v40 = vmul.f32 0.35355338, %v1225_v0 }
 0x6b4   :  { %v5740_v46 = vadd.f32 %v1249_v40, %v75_v52 }
 0x6b6   :  { %v1303_v26 = vsel %vm140_vm0, %v5740_v46, -inf }
 0x6b9   :  { %v5738_v2 = vpop.f32.mrf.mxu1 }
 0x6c1   :  { %v1230_v55 = vpop.f32.mrf.mxu1 }
 0x6c2   :  { %v1251_v32 = vmul.f32 0.35355338, %v1230_v55 }
 0x6c9   :  { %v1233_v11 = vpop.f32.mrf.mxu1 }
 0x6d2   :  { %v1272_v4 = vpop.xlane.xlu1 %1271 }
 0x6d3   :  { %v1318_v59 = vsub.f32 %v1254_v33, %v1272_v4 }
 0x6d5   :  { %v1334_v10 = vmul.f32 1.442695, %v1318_v59  ;;  %v1252_v59 = vmul.f32 0.35355338, %v1233_v11 }
 0x6d7   :  { %4796 = vpow2.f32 %v1334_v10 }
 0x6da   :  { %v1275_v54 = vpop.xlane.xlu2 %1274 }
 0x6db   :  { %v1319_v45 = vsub.f32 %v1255_v1, %v1275_v54 }
 0x6dd   :  { %v5719_v20 = vpop.eup %4796  ;;  %v1336_v28 = vmul.f32 1.442695, %v1319_v45 }
 0x6de   :  { %v1366_v63 = vsel %vm140_vm0, %v5719_v20, 0.0 }
 0x6df   :  { %4798 = vpow2.f32 %v1336_v28  ;;  %1367 = vadd.xlane.f32.xlu0 %v1366_v63  ;;  %v1235_v28 = vpop.f32.mrf.mxu1 }
 0x6e0   :  { %v1253_v0 = vmul.f32 0.35355338, %v1235_v28 }
 0x6e2   :  { %v1278_v33 = vpop.xlane.xlu0 %1277 }
 0x6e3   :  { %v1320_v42 = vsub.f32 %v5666_v43, %v1278_v33  ;;  %v79_v33 = vld [vmem:[%s7077_s6 + $0x138] sm:$0xff] }
 0x6e4   :  { %v5806_v40 = vadd.f32 %v1253_v0, %v79_v33 }
 0x6e5   :  { %v5729_v1 = vpop.eup %4798  ;;  %v1338_v60 = vmul.f32 1.442695, %v1320_v42  ;;  %v1250_v42 = vmul.f32 0.35355338, %v5738_v2 }
 0x6e6   :  { %v1369_v58 = vsel %vm140_vm0, %v5729_v1, 0.0 }
 0x6e7   :  { %4800 = vpow2.f32 %v1338_v60  ;;  %1370 = vadd.xlane.f32.xlu2 %v1369_v58  ;;  %1301 = vmax.xlane.f32.xlu0 %v1300_v49  ;;  %v1315_v49 = vsel %vm140_vm0, %v5806_v40, -inf }
 0x6ea   :  { %v1281_v43 = vpop.xlane.xlu2 %1280 }
 0x6eb   :  { %v1321_v30 = vsub.f32 %v5673_v18, %v1281_v43  ;;  %v77_v18 = vld [vmem:[%s7077_s6 + $0x128] sm:$0xff] }
 0x6ec   :  { %v5756_v47 = vadd.f32 %v1251_v32, %v77_v18 }
 0x6ed   :  { %v5743_v13 = vpop.eup %4800  ;;  %v1340_v17 = vmul.f32 1.442695, %v1321_v30 }
 0x6ee   :  { %v1372_v21 = vsel %vm140_vm0, %v5743_v13, 0.0  ;;  %v1309_v62 = vsel %vm140_vm0, %v5756_v47, -inf }
 0x6ef   :  { %4802 = vpow2.f32 %v1340_v17  ;;  %1373 = vadd.xlane.f32.xlu1 %v1372_v21  ;;  %1304 = vmax.xlane.f32.xlu0 %v1303_v26 }
 0x6f2   :  { %v1284_v9 = vpop.xlane.xlu1 %1283 }
 0x6f3   :  { %v1322_v53 = vsub.f32 %v5680_v14, %v1284_v9 }
 0x6f5   :  { %v5749_v6 = vpop.eup %4802  ;;  %v1342_v12 = vmul.f32 1.442695, %v1322_v53 }
 0x6f6   :  { %v1375_v57 = vsel %vm140_vm0, %v5749_v6, 0.0 }
 0x6f7   :  { %1376 = vadd.xlane.f32.xlu0 %v1375_v57 }
 0x6fa   :  { %v1287_v39 = vpop.xlane.xlu0 %1286 }
 0x6fb   :  { %v1323_v41 = vsub.f32 %v5687_v15, %v1287_v39 }
 0x6fd   :  { %v1344_v22 = vmul.f32 1.442695, %v1323_v41 }
 0x6ff   :  { %4804 = vpow2.f32 %v1344_v22  ;;  %1668 = vrot.lane.b32.xlu2 %v1663_v50, %s4965_s23  ;;  %1310 = vmax.xlane.f32.xlu0 %v1309_v62 }
 0x702   :  { %v1290_v36 = vpop.xlane.xlu2 %1289 }
 0x703   :  { %v1324_v44 = vsub.f32 %v5694_v31, %v1290_v36 }
 0x705   :  { %v5765_v48 = vpop.eup %4804  ;;  %v1346_v56 = vmul.f32 1.442695, %v1324_v44 }
 0x706   :  { %v1381_v15 = vsel %vm140_vm0, %v5765_v48, 0.0 }
 0x707   :  { %4806 = vpow2.f32 %v1346_v56  ;;  %1382 = vadd.xlane.f32.xlu0 %v1381_v15 }
 0x708   :  { %1666 = vrot.lane.b32.xlu1 %v1662_v23, %s4965_s23  ;;  %v78_v23 = vld [vmem:[%s7077_s6 + $0x130] sm:$0xff] }
 0x709   :  { %v5786_v10 = vadd.f32 %v1252_v59, %v78_v23 }
 0x70a   :  { %v1293_v25 = vpop.xlane.xlu1 %1292 }
 0x70b   :  { %v1325_v27 = vsub.f32 %v5701_v3, %v1293_v25 }
 0x70d   :  { %v5773_v29 = vpop.eup %4806  ;;  %v1348_v50 = vmul.f32 1.442695, %v1325_v27 }
 0x70e   :  { %v1384_v31 = vsel %vm140_vm0, %v5773_v29, 0.0 }
 0x70f   :  { %4808 = vpow2.f32 %v1348_v50  ;;  %1385 = vadd.xlane.f32.xlu0 %v1384_v31 }
 0x712   :  { %v1296_v51 = vpop.xlane.xlu1 %1295 }
 0x713   :  { %v1326_v4 = vsub.f32 %v5708_v61, %v1296_v51  ;;  %v1312_v61 = vsel %vm140_vm0, %v5786_v10, -inf }
 0x715   :  { %v5777_v38 = vpop.eup %4808  ;;  %v1350_v3 = vmul.f32 1.442695, %v1326_v4 }
 0x716   :  { %v1387_v19 = vsel %vm140_vm0, %v5777_v38, 0.0 }
 0x717   :  { %1388 = vadd.xlane.f32.xlu0 %v1387_v19  ;;  %4810 = vpow2.f32 %v1350_v3 }
 0x718   :  { %4812 = vpow2.f32 %v1342_v12 }
 0x71a   :  { %v1299_v14 = vpop.xlane.xlu0 %1298 }
 0x71b   :  { %v1327_v7 = vsub.f32 %v5715_v35, %v1299_v14  ;;  %v76_v35 = vld [vmem:[%s7077_s6 + $0x120] sm:$0xff] }
 0x71c   :  { %v5808_v58 = vadd.f32 %v1250_v42, %v76_v35 }
 0x71d   :  { %v5790_v54 = vpop.eup %4810  ;;  %v1352_v60 = vmul.f32 1.442695, %v1327_v7 }
 0x71e   :  { %v5792_v45 = vpop.eup %4812  ;;  %v1390_v63 = vsel %vm140_vm0, %v5790_v54, 0.0  ;;  %v1306_v52 = vsel %vm140_vm0, %v5808_v58, -inf }
 0x71f   :  { %1313 = vmax.xlane.f32.xlu0 %v1312_v61  ;;  %v1378_v16 = vsel %vm140_vm0, %v5792_v45, 0.0  ;;  %4814 = vpow2.f32 %v1352_v60 }
 0x725   :  { %v5814_v43 = vpop.eup %4814 }
 0x726   :  { %v1393_v2 = vsel %vm140_vm0, %v5814_v43, 0.0 }
 0x727   :  { %1391 = vadd.xlane.f32.xlu0 %v1390_v63 }
 0x728   :  { %1379 = vadd.xlane.f32.xlu2 %v1378_v16 }
 0x730   :  { %1316 = vmax.xlane.f32.xlu2 %v1315_v49 }
 0x732   :  { %1307 = vmax.xlane.f32.xlu1 %v1306_v52 }
 0x738   :  { %1394 = vadd.xlane.f32.xlu2 %v1393_v2 }
 0x752   :  { %v1368_v30 = vpop.xlane.xlu0 %1367 }
 0x753   :  { %4816 = vrcp.f32 %v1368_v30  ;;  %v1425_v19 = vand.u32 2147483648, %v1368_v30  ;;  %vm1419_vm13 = vweird.f32 %v1368_v30  ;;  %v1423_v3 = vand.u32 2147483647, %v1368_v30 }
 0x755   :  { %v1426_v16 = vor.u32 1.1754944e-38, %v1425_v19  ;;  %vm1424_vm2 = vcmp.eq.f32.partialorder %v1423_v3, 8.507059e+37 }
 0x759   :  { %v4817_v32 = vpop.eup %4816 }
 0x75a   :  { %v1371_v17 = vpop.xlane.xlu2 %1370  ;;  %v1302_v21 = vpop.xlane.xlu0 %1301  ;;  %v1415_v22 = vmul.f32 %v4817_v32, %v1368_v30  ;;  %vm1420_vm10 = vweird.f32 %v4817_v32 }
 0x75b   :  { %4818 = vrcp.f32 %v1371_v17  ;;  %v1328_v26 = vsub.f32 %v5726_v5, %v1302_v21  ;;  %v1440_v51 = vand.u32 2147483648, %v1371_v17  ;;  %vm1434_vm11 = vweird.f32 %v1371_v17  ;;  %vm1421_vm14 = vmor %vm1419_vm13, %vm1420_vm10 }
 0x75c   :  { %v1416_v15 = vsub.f32 1.0, %v1415_v22  ;;  %v1438_v59 = vand.u32 2147483647, %v1371_v17 }
 0x75d   :  { %v1354_v55 = vmul.f32 1.442695, %v1328_v26  ;;  %v1441_v61 = vor.u32 1.1754944e-38, %v1440_v51 }
 0x75e   :  { %v1417_v50 = vmul.f32 %v4817_v32, %v1416_v15  ;;  %vm1439_vm15 = vcmp.eq.f32.partialorder %v1438_v59, 8.507059e+37 }
 0x75f   :  { %4820 = vpow2.f32 %v1354_v55 }
 0x760   :  { %v1418_v4 = vadd.f32 %v4817_v32, %v1417_v50 }
 0x761   :  { %v4819_v57 = vpop.eup %4818 }
 0x762   :  { %v1430_v18 = vmul.f32 %v4819_v57, %v1371_v17  ;;  %v1669_v39 = vpop.permute.xlu2 %1668  ;;  %v1305_v41 = vpop.xlane.xlu0 %1304  ;;  %vm1435_vm1 = vweird.f32 %v4819_v57  ;;  %v1422_v7 = vsel %vm1421_vm14, %v4817_v32, %v1418_v4 }
 0x763   :  { %1702 = vmatpush.bf16.msrb.mxu0 %v1669_v39  ;;  %v1329_v62 = vsub.f32 %v5740_v46, %v1305_v41  ;;  %v5824_v5 = vpop.xlane.xlu1 %1373  ;;  %vm1436_vm12 = vmor %vm1434_vm11, %vm1435_vm1  ;;  %v1427_v35 = vsel %vm1424_vm2, %v1426_v16, %v1422_v7 }
 0x764   :  { %v1431_v36 = vsub.f32 1.0, %v1430_v18  ;;  %v1428_v2 = vmul.f32 %v5719_v20, %v1427_v35  ;;  %v1455_v39 = vand.u32 2147483648, %v5824_v5  ;;  %vm1449_vm7 = vweird.f32 %v5824_v5 }
 0x765   :  { %v5820_v9 = vpop.eup %4820  ;;  %v1356_v44 = vmul.f32 1.442695, %v1329_v62  ;;  %v1453_v41 = vand.u32 2147483647, %v5824_v5 }
 0x766   :  { %v1396_v56 = vsel %vm140_vm0, %v5820_v9, 0.0  ;;  %v1432_v25 = vmul.f32 %v4819_v57, %v1431_v36 }
 0x767   :  { %4822 = vpow2.f32 %v1356_v44  ;;  %1397 = vadd.xlane.f32.xlu0 %v1396_v56  ;;  %v1456_v56 = vor.u32 1.1754944e-38, %v1455_v39  ;;  %vm1454_vm1 = vcmp.eq.f32.partialorder %v1453_v41, 8.507059e+37 }
 0x768   :  { %4824 = vrcp.f32 %v5824_v5  ;;  %v1433_v31 = vadd.f32 %v4819_v57, %v1432_v25 }
 0x76a   :  { %v5827_v27 = vpop.xlane.xlu0 %1376  ;;  %v1437_v12 = vsel %vm1436_vm12, %v4819_v57, %v1433_v31 }
 0x76b   :  { %4826 = vrcp.f32 %v5827_v27  ;;  %v1442_v33 = vsel %vm1439_vm15, %v1441_v61, %v1437_v12  ;;  %v1470_v57 = vand.u32 2147483648, %v5827_v27  ;;  %vm1464_vm5 = vweird.f32 %v5827_v27 }
 0x76c   :  { %v1443_v49 = vmul.f32 %v5729_v1, %v1442_v33  ;;  %v1468_v20 = vand.u32 2147483647, %v5827_v27 }
 0x76d   :  { %v5830_v46 = vpop.eup %4822  ;;  %v1471_v62 = vor.u32 1.1754944e-38, %v1470_v57 }
 0x76e   :  { %v1399_v11 = vsel %vm140_vm0, %v5830_v46, 0.0  ;;  %v4825_v53 = vpop.eup %4824  ;;  %v1654_v55 = vpack.c.bf16 %v1443_v49, %v1428_v2  ;;  %vm1469_vm9 = vcmp.eq.f32.partialorder %v1468_v20, 8.507059e+37 }
 0x76f   :  { %1400 = vadd.xlane.f32.xlu1 %v1399_v11  ;;  %v1445_v63 = vmul.f32 %v4825_v53, %v5824_v5  ;;  %vm1450_vm4 = vweird.f32 %v4825_v53 }
 0x770   :  { %vm1451_vm8 = vmor %vm1449_vm7, %vm1450_vm4 }
 0x771   :  { %v4827_v23 = vpop.eup %4826  ;;  %v1446_v52 = vsub.f32 1.0, %v1445_v63 }
 0x772   :  { %v1460_v14 = vmul.f32 %v4827_v23, %v5827_v27  ;;  %v1311_v28 = vpop.xlane.xlu0 %1310  ;;  %vm1465_vm3 = vweird.f32 %v4827_v23 }
 0x773   :  { %v1331_v0 = vsub.f32 %v5756_v47, %v1311_v28  ;;  %v1447_v26 = vmul.f32 %v4825_v53, %v1446_v52  ;;  %vm1466_vm6 = vmor %vm1464_vm5, %vm1465_vm3 }
 0x774   :  { %v1461_v42 = vsub.f32 1.0, %v1460_v14 }
 0x775   :  { %v1360_v60 = vmul.f32 1.442695, %v1331_v0  ;;  %v1448_v18 = vadd.f32 %v4825_v53, %v1447_v26 }
 0x776   :  { %v1462_v30 = vmul.f32 %v4827_v23, %v1461_v42 }
 0x777   :  { %4828 = vpow2.f32 %v1360_v60  ;;  %v1452_v44 = vsel %vm1451_vm8, %v4825_v53, %v1448_v18 }
 0x778   :  { %v1463_v32 = vadd.f32 %v4827_v23, %v1462_v30  ;;  %v1457_v25 = vsel %vm1454_vm1, %v1456_v56, %v1452_v44 }
 0x779   :  { %v1458_v50 = vmul.f32 %v5743_v13, %v1457_v25 }
 0x77a   :  { %v1667_v17 = vpop.permute.xlu1 %1666  ;;  %v5839_v21 = vpop.xlane.xlu0 %1382  ;;  %v1467_v22 = vsel %vm1466_vm6, %v4827_v23, %v1463_v32 }
 0x77b   :  { %1703 = vmatpush.bf16.msrb.mxu0 %v1667_v17  ;;  %v1472_v15 = vsel %vm1469_vm9, %v1471_v62, %v1467_v22  ;;  %4830 = vrcp.f32 %v5839_v21  ;;  %v1500_v0 = vand.u32 2147483648, %v5839_v21  ;;  %vm1494_vm11 = vweird.f32 %v5839_v21 }
 0x77c   :  { %v1473_v27 = vmul.f32 %v5749_v6, %v1472_v15  ;;  %v1498_v42 = vand.u32 2147483647, %v5839_v21 }
 0x77d   :  { %v5841_v47 = vpop.eup %4828  ;;  %v1501_v26 = vor.u32 1.1754944e-38, %v1500_v0 }
 0x77e   :  { %3864 = vmatmul.msk.bf16.vlgmr.msrb.gmra.mxu0 %vm140_vm0, %v1654_v55  ;;  %v1405_v1 = vsel %vm140_vm0, %v5841_v47, 0.0  ;;  %v1655_v51 = vpack.c.bf16 %v1473_v27, %v1458_v50  ;;  %vm1499_vm14 = vcmp.eq.f32.partialorder %v1498_v42, 8.507059e+37 }
 0x77f   :  { %1406 = vadd.xlane.f32.xlu0 %v1405_v1 }
 0x781   :  { %v4831_v4 = vpop.eup %4830 }
 0x782   :  { %v5852_v36 = vpop.xlane.xlu0 %1385  ;;  %v1490_v53 = vmul.f32 %v4831_v4, %v5839_v21  ;;  %vm1495_vm10 = vweird.f32 %v4831_v4 }
 0x783   :  { %vm5878_vm12 = vmor %vm1494_vm11, %vm1495_vm10  ;;  %vm1509_vm8 = vweird.f32 %v5852_v36 }
 0x784   :  { %v1491_v23 = vsub.f32 1.0, %v1490_v53  ;;  %v1515_v53 = vand.u32 2147483648, %v5852_v36 }
 0x786   :  { %v1492_v3 = vmul.f32 %v4831_v4, %v1491_v23 }
 0x788   :  { %v1493_v28 = vadd.f32 %v4831_v4, %v1492_v3 }
 0x78a   :  { %v5856_v31 = vpop.xlane.xlu0 %1388  ;;  %v1497_v21 = vsel %vm5878_vm12, %v4831_v4, %v1493_v28 }
 0x78b   :  { %v1502_v20 = vsel %vm1499_vm14, %v1501_v26, %v1497_v21  ;;  %vm1524_vm6 = vweird.f32 %v5856_v31  ;;  %v1528_v4 = vand.u32 2147483647, %v5856_v31 }
 0x78c   :  { %v1503_v56 = vmul.f32 %v5765_v48, %v1502_v20 }
 0x78d   :  { %vm1529_vm1 = vcmp.eq.f32.partialorder %v1528_v4, 8.507059e+37 }
 0x78e   :  { %3865 = vmatmul.msk.bf16.gmra.mxu0 %vm140_vm0, %v1655_v51 }
 0x792   :  { %v1314_v5 = vpop.xlane.xlu0 %1313 }
 0x793   :  { %v1332_v11 = vsub.f32 %v5786_v10, %v1314_v5 }
 0x795   :  { %v1362_v59 = vmul.f32 1.442695, %v1332_v11 }
 0x797   :  { %4832 = vpow2.f32 %v1362_v59 }
 0x79a   :  { %v5889_v1 = vpop.xlane.xlu0 %1391 }
 0x79b   :  { %v1380_v19 = vpop.xlane.xlu2 %1379 }
 0x79c   :  { %4834 = vrcp.f32 %v1380_v19  ;;  %v1485_v52 = vand.u32 2147483648, %v1380_v19  ;;  %vm1479_vm15 = vweird.f32 %v1380_v19 }
 0x79d   :  { %v5862_v6 = vpop.eup %4832  ;;  %4836 = vrcp.f32 %v5856_v31 }
 0x79e   :  { %v1408_v13 = vsel %vm140_vm0, %v5862_v6, 0.0  ;;  %4838 = vrcp.f32 %v5852_v36 }
 0x79f   :  { %1409 = vadd.xlane.f32.xlu1 %v1408_v13 }
 0x7a2   :  { %v4835_v10 = vpop.eup %4834 }
 0x7a3   :  { %v1317_v12 = vpop.xlane.xlu2 %1316  ;;  %v5868_v61 = vpop.eup %4836  ;;  %v1475_v14 = vmul.f32 %v4835_v10, %v1380_v19  ;;  %vm1480_vm13 = vweird.f32 %v4835_v10 }
 0x7a4   :  { %v5870_v63 = vpop.eup %4838  ;;  %v1520_v60 = vmul.f32 %v5868_v61, %v5856_v31  ;;  %v1333_v2 = vsub.f32 %v5806_v40, %v1317_v12  ;;  %vm1481_vm2 = vmor %vm1479_vm15, %vm1480_vm13  ;;  %v1486_v40 = vor.u32 1.1754944e-38, %v1485_v52  ;;  %vm1525_vm4 = vweird.f32 %v5868_v61 }
 0x7a5   :  { %v1308_v7 = vpop.xlane.xlu1 %1307  ;;  %v1476_v16 = vsub.f32 1.0, %v1475_v14  ;;  %v1505_v17 = vmul.f32 %v5870_v63, %v5852_v36  ;;  %vm1510_vm5 = vweird.f32 %v5870_v63  ;;  %vm1526_vm7 = vmor %vm1524_vm6, %vm1525_vm4  ;;  %v1516_v14 = vor.u32 1.1754944e-38, %v1515_v53 }
 0x7a6   :  { %v1330_v33 = vsub.f32 %v5808_v58, %v1308_v7  ;;  %v1483_v58 = vand.u32 2147483647, %v1380_v19  ;;  %v1521_v32 = vsub.f32 1.0, %v1520_v60  ;;  %v1364_v18 = vmul.f32 1.442695, %v1333_v2  ;;  %vm1511_vm9 = vmor %vm1509_vm8, %vm1510_vm5 }
 0x7a7   :  { %v1477_v49 = vmul.f32 %v4835_v10, %v1476_v16  ;;  %v1506_v39 = vsub.f32 1.0, %v1505_v17  ;;  %v1513_v19 = vand.u32 2147483647, %v5852_v36  ;;  %v1545_v2 = vand.u32 2147483648, %v5889_v1 }
 0x7a8   :  { %v1358_v30 = vmul.f32 1.442695, %v1330_v33  ;;  %vm1484_vm3 = vcmp.eq.f32.partialorder %v1483_v58, 8.507059e+37  ;;  %v1522_v62 = vmul.f32 %v5868_v61, %v1521_v32  ;;  %vm1539_vm15 = vweird.f32 %v5889_v1 }
 0x7a9   :  { %v1478_v55 = vadd.f32 %v4835_v10, %v1477_v49  ;;  %v1507_v25 = vmul.f32 %v5870_v63, %v1506_v39  ;;  %vm1514_vm10 = vcmp.eq.f32.partialorder %v1513_v19, 8.507059e+37  ;;  %v1546_v58 = vor.u32 1.1754944e-38, %v1545_v2 }
 0x7aa   :  { %4840 = vpow2.f32 %v1358_v30  ;;  %v1523_v51 = vadd.f32 %v5868_v61, %v1522_v62 }
 0x7ab   :  { %v5887_v57 = vpop.xlane.xlu2 %1394  ;;  %v1482_v41 = vsel %vm1481_vm2, %v4835_v10, %v1478_v55  ;;  %v1508_v11 = vadd.f32 %v5870_v63, %v1507_v25 }
 0x7ac   :  { %4842 = vrcp.f32 %v5887_v57  ;;  %v1487_v22 = vsel %vm1484_vm3, %v1486_v40, %v1482_v41  ;;  %v1527_v13 = vsel %vm1526_vm7, %v5868_v61, %v1523_v51  ;;  %vm1554_vm13 = vweird.f32 %v5887_v57 }
 0x7ad   :  { %4844 = vrcp.f32 %v5889_v1  ;;  %v1488_v44 = vmul.f32 %v5792_v45, %v1487_v22  ;;  %v1530_v45 = vand.u32 2147483648, %v5856_v31  ;;  %v1512_v12 = vsel %vm1511_vm9, %v5870_v63, %v1508_v11 }
 0x7ae   :  { %4846 = vpow2.f32 %v1364_v18  ;;  %v1517_v36 = vsel %vm1514_vm10, %v1516_v14, %v1512_v12  ;;  %v1560_v63 = vand.u32 2147483648, %v5887_v57  ;;  %v1558_v52 = vand.u32 2147483647, %v5887_v57 }
 0x7af   :  { %v1656_v27 = vpack.c.bf16 %v1503_v56, %v1488_v44  ;;  %v1531_v3 = vor.u32 1.1754944e-38, %v1530_v45  ;;  %v1518_v33 = vmul.f32 %v5773_v29, %v1517_v36  ;;  %v1543_v29 = vand.u32 2147483647, %v5889_v1 }
 0x7b0   :  { %v5896_v15 = vpop.eup %4840  ;;  %v1561_v30 = vor.u32 1.1754944e-38, %v1560_v63  ;;  %vm1559_vm3 = vcmp.eq.f32.partialorder %v1558_v52, 8.507059e+37 }
 0x7b1   :  { %v1402_v50 = vsel %vm140_vm0, %v5896_v15, 0.0  ;;  %3866 = vmatmul.msk.bf16.gmra.mxu0 %vm140_vm0, %v1656_v27  ;;  %v1532_v28 = vsel %vm1529_vm1, %v1531_v3, %v1527_v13  ;;  %vm1544_vm4 = vcmp.eq.f32.partialorder %v1543_v29, 8.507059e+37  ;;  %v4912_v29 = vld [vmem:[%s7077_s6 + $0x40] sm:$0xff] }
 0x7b2   :  { %1403 = vadd.xlane.f32.xlu2 %v1402_v50  ;;  %v4843_v5 = vpop.eup %4842  ;;  %v1533_v16 = vmul.f32 %v5777_v38, %v1532_v28 }
 0x7b3   :  { %v4845_v48 = vpop.eup %4844  ;;  %v1550_v23 = vmul.f32 %v4843_v5, %v5887_v57  ;;  %vm1555_vm11 = vweird.f32 %v4843_v5 }
 0x7b4   :  { %v5909_v59 = vpop.eup %4846  ;;  %v1535_v10 = vmul.f32 %v4845_v48, %v5889_v1  ;;  %v1657_v60 = vpack.c.bf16 %v1533_v16, %v1518_v33  ;;  %vm1540_vm12 = vweird.f32 %v4845_v48  ;;  %vm1556_vm14 = vmor %vm1554_vm13, %vm1555_vm11 }
 0x7b5   :  { %v1411_v31 = vsel %vm140_vm0, %v5909_v59, 0.0  ;;  %v1551_v7 = vsub.f32 1.0, %v1550_v23  ;;  %vm1541_vm2 = vmor %vm1539_vm15, %vm1540_vm12 }
 0x7b6   :  { %v1536_v0 = vsub.f32 1.0, %v1535_v10 }
 0x7b7   :  { %v1552_v61 = vmul.f32 %v4843_v5, %v1551_v7 }
 0x7b8   :  { %v1537_v42 = vmul.f32 %v4845_v48, %v1536_v0 }
 0x7b9   :  { %v1553_v35 = vadd.f32 %v4843_v5, %v1552_v61 }
 0x7ba   :  { %1412 = vadd.xlane.f32.xlu2 %v1411_v31  ;;  %v1538_v49 = vadd.f32 %v4845_v48, %v1537_v42 }
 0x7bb   :  { %v1557_v38 = vsel %vm1556_vm14, %v4843_v5, %v1553_v35 }
 0x7bc   :  { %v1542_v17 = vsel %vm1541_vm2, %v4845_v48, %v1538_v49  ;;  %v1562_v21 = vsel %vm1559_vm3, %v1561_v30, %v1557_v38 }
 0x7bd   :  { %v1547_v26 = vsel %vm1544_vm4, %v1546_v58, %v1542_v17  ;;  %v1563_v55 = vmul.f32 %v5814_v43, %v1562_v21 }
 0x7be   :  { %v1548_v32 = vmul.f32 %v5790_v54, %v1547_v26 }
 0x7c0   :  { %v1658_v57 = vpack.c.bf16 %v1563_v55, %v1548_v32  ;;  %v4913_v55 = vld [vmem:[%s7077_s6 + $0x60] sm:$0xff] }
 0x7c1   :  { %3867 = vmatmul.msk.bf16.gmra.mxu0 %vm140_vm0, %v1657_v60 }
 0x7d1   :  { %3868 = vmatmul.msk.bf16.gmra.mxu0 %vm140_vm0, %v1658_v57 }
 0x7da   :  { %v1398_v40 = vpop.xlane.xlu0 %1397 }
 0x7db   :  { %4848 = vrcp.f32 %v1398_v40  ;;  %v1575_v56 = vand.u32 2147483648, %v1398_v40  ;;  %vm1569_vm6 = vweird.f32 %v1398_v40  ;;  %v1573_v43 = vand.u32 2147483647, %v1398_v40 }
 0x7dd   :  { %v1576_v5 = vor.u32 1.1754944e-38, %v1575_v56  ;;  %vm1574_vm1 = vcmp.eq.f32.partialorder %v1573_v43, 8.507059e+37 }
 0x7e1   :  { %v4849_v18 = vpop.eup %4848 }
 0x7e2   :  { %v1565_v1 = vmul.f32 %v4849_v18, %v1398_v40  ;;  %v1401_v20 = vpop.xlane.xlu1 %1400  ;;  %vm1570_vm5 = vweird.f32 %v4849_v18 }
 0x7e3   :  { %4850 = vrcp.f32 %v1401_v20  ;;  %vm1571_vm7 = vmor %vm1569_vm6, %vm1570_vm5  ;;  %v1590_v27 = vand.u32 2147483648, %v1401_v20  ;;  %v1588_v50 = vand.u32 2147483647, %v1401_v20  ;;  %vm1584_vm9 = vweird.f32 %v1401_v20 }
 0x7e4   :  { %v1566_v39 = vsub.f32 1.0, %v1565_v1 }
 0x7e5   :  { %v1591_v48 = vor.u32 1.1754944e-38, %v1590_v27  ;;  %vm1589_vm11 = vcmp.eq.f32.partialorder %v1588_v50, 8.507059e+37 }
 0x7e6   :  { %v1567_v41 = vmul.f32 %v4849_v18, %v1566_v39 }
 0x7e8   :  { %v1568_v44 = vadd.f32 %v4849_v18, %v1567_v41 }
 0x7e9   :  { %v4851_v22 = vpop.eup %4850 }
 0x7ea   :  { %v1580_v62 = vmul.f32 %v4851_v22, %v1401_v20  ;;  %vm1585_vm8 = vweird.f32 %v4851_v22  ;;  %v1572_v51 = vsel %vm1571_vm7, %v4849_v18, %v1568_v44 }
 0x7eb   :  { %vm1586_vm10 = vmor %vm1584_vm9, %vm1585_vm8  ;;  %v1577_v11 = vsel %vm1574_vm1, %v1576_v5, %v1572_v51 }
 0x7ec   :  { %v1581_v25 = vsub.f32 1.0, %v1580_v62  ;;  %v1578_v19 = vmul.f32 %v5820_v9, %v1577_v11 }
 0x7ee   :  { %v1582_v54 = vmul.f32 %v4851_v22, %v1581_v25 }
 0x7f0   :  { %v1583_v45 = vadd.f32 %v4851_v22, %v1582_v54 }
 0x7f2   :  { %v1587_v4 = vsel %vm1586_vm10, %v4851_v22, %v1583_v45  ;;  %v1407_v10 = vpop.xlane.xlu0 %1406 }
 0x7f3   :  { %v1592_v53 = vsel %vm1589_vm11, %v1591_v48, %v1587_v4  ;;  %4852 = vrcp.f32 %v1407_v10  ;;  %vm1614_vm13 = vweird.f32 %v1407_v10  ;;  %v1620_v35 = vand.u32 2147483648, %v1407_v10 }
 0x7f4   :  { %v1593_v23 = vmul.f32 %v5830_v46, %v1592_v53  ;;  %v1618_v49 = vand.u32 2147483647, %v1407_v10 }
 0x7f5   :  { %v1621_v57 = vor.u32 1.1754944e-38, %v1620_v35  ;;  %v4526_v35 = vld [vmem:[%s7074_s3 + $0x80] sm:$0xff] }
 0x7f6   :  { %v1659_v13 = vpack.c.bf16 %v1593_v23, %v1578_v19  ;;  %vm1619_vm2 = vcmp.eq.f32.partialorder %v1618_v49, 8.507059e+37  ;;  %v4914_v23 = vld [vmem:[%s7077_s6 + $0x50] sm:$0xff] }
 0x7f8   :  { %3869 = vmatmul.msk.bf16.gmra.mxu0 %vm140_vm0, %v1659_v13 }
 0x7f9   :  { %v4853_v12 = vpop.eup %4852 }
 0x7fa   :  { %v1610_v28 = vmul.f32 %v4853_v12, %v1407_v10  ;;  %vm1615_vm12 = vweird.f32 %v4853_v12  ;;  %v4915_v10 = vld [vmem:[%s7077_s6 + $0x70] sm:$0xff] }
 0x7fb   :  { %v1705_v3 = vpop.f32.mrf.mxu0  ;;  %vm5946_vm14 = vmor %vm1614_vm13, %vm1615_vm12  ;;  %vm2163_vm13 = vcmask 523264  }
 0x7fc   :  { %v1611_v7 = vsub.f32 1.0, %v1610_v28  ;;  %v1745_v38 = vmul.f32 %v4912_v29, %v1705_v3 }
 0x7fe   :  { %v1612_v9 = vmul.f32 %v4853_v12, %v1611_v7 }
 0x800   :  { %v1613_v61 = vadd.f32 %v4853_v12, %v1612_v9 }
 0x802   :  { %v1617_v2 = vsel %vm5946_vm14, %v4853_v12, %v1613_v61 }
 0x803   :  { %v5935_v31 = vpop.f32.mrf.mxu0  ;;  %v1622_v20 = vsel %vm1619_vm2, %v1621_v57, %v1617_v2  ;;  %v4916_v2 = vld [vmem:[%s7077_s6 + $0x68] sm:$0xff] }
 0x804   :  { %v1623_v43 = vmul.f32 %v5841_v47, %v1622_v20  ;;  %v4921_v20 = vld [vmem:[%s7077_s6 + $0xa8] sm:$0xff] }
 0x80b   :  { %v5937_v14 = vpop.f32.mrf.mxu0 }
 0x80c   :  { %v1747_v13 = vmul.f32 %v4914_v23, %v5937_v14 }
 0x812   :  { %v5939_v36 = vpop.xlane.xlu1 %1409 }
 0x813   :  { %v5942_v46 = vpop.f32.mrf.mxu0  ;;  %vm1629_vm1 = vweird.f32 %v5939_v36  ;;  %v1633_v47 = vand.u32 2147483647, %v5939_v36 }
 0x815   :  { %vm1634_vm12 = vcmp.eq.f32.partialorder %v1633_v47, 8.507059e+37 }
 0x825   :  { %v1404_v0 = vpop.xlane.xlu2 %1403 }
 0x826   :  { %4854 = vrcp.f32 %v1404_v0  ;;  %v1605_v17 = vand.u32 2147483648, %v1404_v0  ;;  %v1603_v26 = vand.u32 2147483647, %v1404_v0  ;;  %vm1599_vm3 = vweird.f32 %v1404_v0 }
 0x827   :  { %4856 = vrcp.f32 %v5939_v36 }
 0x828   :  { %v1606_v39 = vor.u32 1.1754944e-38, %v1605_v17  ;;  %vm1604_vm5 = vcmp.eq.f32.partialorder %v1603_v26, 8.507059e+37  ;;  %v4918_v17 = vld [vmem:[%s7077_s6 + $0x80] sm:$0xff] }
 0x82c   :  { %v4855_v16 = vpop.eup %4854 }
 0x82d   :  { %v5944_v33 = vpop.eup %4856  ;;  %v1595_v42 = vmul.f32 %v4855_v16, %v1404_v0  ;;  %v1413_v60 = vpop.xlane.xlu2 %1412  ;;  %vm1600_vm15 = vweird.f32 %v4855_v16 }
 0x82e   :  { %4858 = vrcp.f32 %v1413_v60  ;;  %v1625_v30 = vmul.f32 %v5944_v33, %v5939_v36  ;;  %v1715_v58 = vpop.f32.mrf.mxu0  ;;  %vm1601_vm4 = vmor %vm1599_vm3, %vm1600_vm15  ;;  %v1650_v45 = vand.u32 2147483648, %v1413_v60  ;;  %vm1630_vm7 = vweird.f32 %v5944_v33 }
 0x82f   :  { %v1596_v52 = vsub.f32 1.0, %v1595_v42  ;;  %v1749_v32 = vmul.f32 %v4913_v55, %v1715_v58  ;;  %vm1644_vm8 = vweird.f32 %v1413_v60  ;;  %v1648_v11 = vand.u32 2147483647, %v1413_v60  ;;  %vm1631_vm10 = vmor %vm1629_vm1, %vm1630_vm7 }
 0x830   :  { %v1626_v41 = vsub.f32 1.0, %v1625_v30  ;;  %v1651_v53 = vor.u32 1.1754944e-38, %v1650_v45  ;;  %v4926_v45 = vld [vmem:[%s7077_s6 + $0xb0] sm:$0xff] }
 0x831   :  { %v1597_v21 = vmul.f32 %v4855_v16, %v1596_v52  ;;  %v5960_v18 = vadd.f32 %v1749_v32, %v1745_v38  ;;  %vm1649_vm11 = vcmp.eq.f32.partialorder %v1648_v11, 8.507059e+37  ;;  %v4528_v52 = vld [vmem:[%s7074_s3 + $0xa0] sm:$0xff]  ;;  %v4917_v38 = vld [vmem:[%s7077_s6 + $0x48] sm:$0xff] }
 0x832   :  { %v1627_v27 = vmul.f32 %v5944_v33, %v1626_v41  ;;  %v1746_v30 = vmul.f32 %v4917_v38, %v5935_v31  ;;  %v4920_v32 = vld [vmem:[%s7077_s6 + $0xa0] sm:$0xff] }
 0x833   :  { %v1598_v40 = vadd.f32 %v4855_v16, %v1597_v21  ;;  %v4919_v21 = vld [vmem:[%s7077_s6 + $0x88] sm:$0xff] }
 0x834   :  { %v4859_v1 = vpop.eup %4858  ;;  %v1628_v48 = vadd.f32 %v5944_v33, %v1627_v27 }
 0x835   :  { %v1602_v22 = vsel %vm1601_vm4, %v4855_v16, %v1598_v40  ;;  %v1640_v62 = vmul.f32 %v4859_v1, %v1413_v60  ;;  %vm1645_vm6 = vweird.f32 %v4859_v1  ;;  %v4527_v60 = vld [vmem:[%s7074_s3 + $0x88] sm:$0xff] }
 0x836   :  { %v1607_v44 = vsel %vm1604_vm5, %v1606_v39, %v1602_v22  ;;  %v1717_v54 = vpop.f32.mrf.mxu0  ;;  %vm1646_vm9 = vmor %vm1644_vm8, %vm1645_vm6  ;;  %v1632_v3 = vsel %vm1631_vm10, %v5944_v33, %v1628_v48  ;;  %1806 = vmatpush.bf16.msra.mxu3 %v4527_v60 }
 0x837   :  { %v1641_v56 = vsub.f32 1.0, %v1640_v62  ;;  %v1608_v25 = vmul.f32 %v5896_v15, %v1607_v44  ;;  %v1635_v15 = vand.u32 2147483648, %v5939_v36  ;;  %v1750_v29 = vmul.f32 %v4916_v2, %v1717_v54  ;;  %v4924_v54 = vld [vmem:[%s7077_s6 + $0x90] sm:$0xff] }
 0x839   :  { %v1642_v50 = vmul.f32 %v4859_v1, %v1641_v56  ;;  %v1660_v51 = vpack.c.bf16 %v1623_v43, %v1608_v25  ;;  %v1636_v28 = vor.u32 1.1754944e-38, %v1635_v15  ;;  %v1762_v55 = vadd.f32 %v1750_v29, %v1746_v30  ;;  %v4922_v56 = vld [vmem:[%s7077_s6 + $0x78] sm:$0xff] }
 0x83a   :  { %1807 = vmatpush.bf16.msra.mxu3 %v4526_v35  ;;  %v4026_v35 = vld [vmem:[%s7078_s7 + $0xe8] sm:$0xf] }
 0x83b   :  { %v1643_v5 = vadd.f32 %v4859_v1, %v1642_v50  ;;  %3870 = vmatmul.msk.bf16.gmra.mxu0 %vm140_vm0, %v1660_v51  ;;  %v1637_v0 = vsel %vm1634_vm12, %v1636_v28, %v1632_v3  ;;  %v4925_v50 = vld [vmem:[%s7077_s6 + $0x98] sm:$0xff]  ;;  %v4686_v3 = vld [vmem:[%s7073_s2 + $0x8] ss:$0 sm:$0xff]  ;;  %v4687_v28 = vld [vmem:[%s7073_s2 + $0x9] ss:$0 sm:$0xff] }
 0x83c   :  { %v1638_v16 = vmul.f32 %v5862_v6, %v1637_v0  ;;  %v4529_v6 = vld [vmem:[%s7074_s3 + $0xa8] sm:$0xff] }
 0x83d   :  { %v1647_v4 = vsel %vm1646_vm9, %v4859_v1, %v1643_v5  ;;  %1888 = vmatpush.bf16.msrb.mxu2 %v4529_v6 }
 0x83e   :  { %v1720_v19 = vpop.f32.mrf.mxu0  ;;  %v1652_v7 = vsel %vm1649_vm11, %v1651_v53, %v1647_v4 }
 0x83f   :  { %v1751_v12 = vmul.f32 %v4915_v10, %v1720_v19  ;;  %v1653_v9 = vmul.f32 %v5909_v59, %v1652_v7 }
 0x841   :  { %v1763_v36 = vadd.f32 %v1751_v12, %v1747_v13  ;;  %v1661_v61 = vpack.c.bf16 %v1653_v9, %v1638_v16  ;;  %1889 = vmatpush.bf16.msrb.mxu2 %v4528_v52  ;;  %v4685_v13 = vld [vmem:[%s7073_s2 + $0x10] ss:$0 sm:$0xff] }
 0x846   :  { %v1722_v14 = vpop.f32.mrf.mxu0 }
 0x847   :  { %v1752_v25 = vmul.f32 %v4922_v56, %v1722_v14 }
 0x84b   :  { %3871 = vmatmul.msk.bf16.gmra.mxu0 %vm140_vm0, %v1661_v61 }
 0x84e   :  { %v1725_v33 = vpop.f32.mrf.mxu0 }
 0x84f   :  { %v1753_v58 = vmul.f32 %v4918_v17, %v1725_v33  ;;  %v4689_v17 = vld [vmem:[%s7073_s2 + $0x5] ss:$0 sm:$0xff] }
 0x851   :  { %v1765_v31 = vadd.f32 %v5960_v18, %v1753_v58  ;;  %v4923_v18 = vld [vmem:[%s7077_s6 + $0x58] sm:$0xff] }
 0x852   :  { %v1748_v43 = vmul.f32 %v4923_v18, %v5942_v46  ;;  %v4927_v46 = vld [vmem:[%s7077_s6 + $0xb8] sm:$0xff]  ;;  %v4034_v18 = vld [vmem:[%s7078_s7 + $0xf0] sm:$0xf] }
 0x854   :  { %v1764_v5 = vadd.f32 %v1752_v25, %v1748_v43  ;;  %v4010_v43 = vld [vmem:[%s7078_s7 + $0xd8] sm:$0xf] }
 0x856   :  { %v1727_v42 = vpop.f32.mrf.mxu0 }
 0x857   :  { %v1754_v26 = vmul.f32 %v4919_v21, %v1727_v42 }
 0x859   :  { %v1766_v1 = vadd.f32 %v1762_v55, %v1754_v26 }
 0x875   :  { %v1730_v63 = vpop.f32.mrf.mxu0 }
 0x876   :  { %v1755_v27 = vmul.f32 %v4924_v54, %v1730_v63 }
 0x878   :  { %v1767_v15 = vadd.f32 %v1763_v36, %v1755_v27  ;;  %v4561_v27 = vld [vmem:[%s7078_s7 + $0xf8] sm:$0xf0] }
 0x87d   :  { %v1732_v59 = vpop.f32.mrf.mxu0 }
 0x87e   :  { %v1756_v51 = vmul.f32 %v4925_v50, %v1732_v59  ;;  %v4557_v50 = vld [vmem:[%s7078_s7 + $0xdc] sm:$0xf] }
 0x880   :  { %v1768_v47 = vadd.f32 %v1764_v5, %v1756_v51  ;;  %v4012_v51 = vld [vmem:[%s7078_s7 + $0xfc] sm:$0xf0]  ;;  %v4011_v5 = vor.u32 %v4561_v27, %v4010_v43  ;;  %v4562_v27 = vld [vmem:[%s7078_s7 + $0x100] sm:$0xf0] }
 0x882   :  { %2174 = vmatpush.bf16.msrb.mxu3 %v4011_v5  ;;  %v4558_v5 = vld [vmem:[%s7078_s7 + $0xe4] sm:$0xf] }
 0x8b8   :  { %v1735_v49 = vpop.f32.mrf.mxu0 }
 0x8b9   :  { %v1757_v57 = vmul.f32 %v4920_v32, %v1735_v49 }
 0x8bb   :  { %v1769_v41 = vadd.f32 %v1765_v31, %v1757_v57 }
 0x8c0   :  { %v1737_v40 = vpop.f32.mrf.mxu0 }
 0x8c1   :  { %v1758_v39 = vmul.f32 %v4921_v20, %v1737_v40 }
 0x8c3   :  { %v1770_v22 = vadd.f32 %v1766_v1, %v1758_v39 }
 0x8c5   :  { %v1778_v62 = vpack.c.bf16 %v1770_v22, %v1769_v41 }
 0x8c7   :  { %3884 = vmatmul.msk.bf16.vlgmr.msra.gmra.mxu3 %vm140_vm0, %v1778_v62 }
 0x8c8   :  { %v1740_v44 = vpop.f32.mrf.mxu0 }
 0x8c9   :  { %v1759_v48 = vmul.f32 %v4926_v45, %v1740_v44  ;;  %v4015_v45 = vor.u32 %v4557_v50, %v4012_v51 }
 0x8cb   :  { %v1771_v53 = vadd.f32 %v1767_v15, %v1759_v48  ;;  %v3990_v48 = vld [vmem:[%s7078_s7 + $0xa0] sm:$0xf]  ;;  %2193 = vmatpush.bf16.msra.mxu2 %v4015_v45  ;;  %v4020_v45 = vld [vmem:[%s7078_s7 + $0x104] sm:$0xf0] }
 0x8d0   :  { %v1742_v11 = vpop.f32.mrf.mxu0 }
 0x8d1   :  { %v1760_v4 = vmul.f32 %v4927_v46, %v1742_v11  ;;  %v4554_v11 = vld [vmem:[%s7078_s7 + $0xc0] sm:$0xf0]  ;;  %v4552_v46 = vld [vmem:[%s7078_s7 + $0xb0] sm:$0xf0] }
 0x8d2   :  { %v3991_v15 = vor.u32 %v4554_v11, %v3990_v48  ;;  %v4042_v48 = vld [vmem:[%s7078_s7 + $0xf8] sm:$0xf]  ;;  %v4023_v11 = vor.u32 %v4558_v5, %v4020_v45 }
 0x8d3   :  { %v1772_v19 = vadd.f32 %v1768_v47, %v1760_v4  ;;  %v3974_v47 = vld [vmem:[%s7078_s7 + $0x90] sm:$0xf]  ;;  %v4548_v4 = vld [vmem:[%s7078_s7 + $0x94] sm:$0xf] }
 0x8d5   :  { %v1779_v23 = vpack.c.bf16 %v1772_v19, %v1771_v53  ;;  %v3975_v53 = vor.u32 %v4552_v46, %v3974_v47  ;;  %v3976_v19 = vld [vmem:[%s7078_s7 + $0xb4] sm:$0xf0]  ;;  %v4553_v46 = vld [vmem:[%s7078_s7 + $0xb8] sm:$0xf0] }
 0x8d6   :  { %v3982_v47 = vld [vmem:[%s7078_s7 + $0x98] sm:$0xf] }
 0x8d7   :  { %3885 = vmatmul.msk.bf16.gmra.mxu3 %vm140_vm0, %v1779_v23  ;;  %v3998_v23 = vld [vmem:[%s7078_s7 + $0xa8] sm:$0xf] }
 0x8d8   :  { %2175 = vmatpush.bf16.msrb.mxu3 %v3975_v53 }
 0x94a   :  { %v1809_v10 = vpop.f32.mrf.mxu3 }
 0x94b   :  { %v1810_v12 = vadd.f32 %v4685_v13, %v1809_v10 }
 0x94d   :  { %v1822_v7 = vmul.f32 %v4686_v3, %v1810_v12  ;;  %v3938_v12 = vld [vmem:[%s7078_s7 + $0x48] sm:$0xf] }
 0x94f   :  { %v1827_v36 = vadd.f32 %v4687_v28, %v1822_v7  ;;  %v4539_v7 = vld [vmem:[%s7078_s7 + $0x4c] sm:$0xf] }
 0x951   :  { %v6045_v0 = vadd.f32 %v1827_v36, %v5521_v37  ;;  %v4563_v37 = vld [vmem:[%s7078_s7 + $0x108] sm:$0xf0] }
 0x952   :  { %v1811_v9 = vpop.f32.mrf.mxu3  ;;  %v4027_v6 = vor.u32 %v4563_v37, %v4026_v35  ;;  %v3962_v35 = vld [vmem:[%s7078_s7 + $0x60] sm:$0xf]  ;;  %v4546_v37 = vld [vmem:[%s7078_s7 + $0x80] sm:$0xf0] }
 0x953   :  { %v1812_v16 = vadd.f32 %v4685_v13, %v1811_v9  ;;  %v1836_v61 = vmul.f32 0.2, %v6045_v0  ;;  %v3940_v9 = vld [vmem:[%s7078_s7 + $0x6c] sm:$0xf0] }
 0x954   :  { %2250 = vmatpush.bf16.msra.mxu1 %v4027_v6  ;;  %v4534_v6 = vld [vmem:[%s7078_s7 + $0x20] sm:$0xf0] }
 0x955   :  { %v1823_v14 = vmul.f32 %v4686_v3, %v1812_v16  ;;  %4860 = vtanh.f32 %v1836_v61  ;;  %v3954_v16 = vld [vmem:[%s7078_s7 + $0x58] sm:$0xf]  ;;  %v4545_v61 = vld [vmem:[%s7078_s7 + $0x78] sm:$0xf0] }
 0x957   :  { %v1828_v33 = vadd.f32 %v4687_v28, %v1823_v14  ;;  %v6137_v14 = vld [vmem:[%s7073_s2 + $0x19] ss:$0 sm:$0xff] }
 0x958   :  { %2251 = vmatpush.bf16.msra.mxu1 %v3991_v15  ;;  %v4565_v15 = vld [vmem:[%s7078_s7 + $0x118] sm:$0xf0] }
 0x959   :  { %v6049_v42 = vadd.f32 %v1828_v33, %v5527_v34  ;;  %v4688_v34 = vld [vmem:[%s7073_s2 + $0x4] ss:$0 sm:$0xff]  ;;  %v3943_v33 = vor.u32 %v4539_v7, %v3940_v9  ;;  %v4556_v7 = vld [vmem:[%s7078_s7 + $0xd0] sm:$0xf0] }
 0x95a   :  { %v1814_v60 = vpop.f32.mrf.mxu3  ;;  %v4544_v9 = vld [vmem:[%s7078_s7 + $0x70] sm:$0xf0] }
 0x95b   :  { %v1837_v63 = vmul.f32 0.2, %v6049_v42  ;;  %v1815_v59 = vadd.f32 %v4685_v13, %v1814_v60  ;;  %v4861_v52 = vpop.eup %4860  ;;  %v3955_v60 = vor.u32 %v4545_v61, %v3954_v16 }
 0x95c   :  { %v1845_v30 = vmul.f32 %v4861_v52, %v4688_v34 }
 0x95d   :  { %4862 = vtanh.f32 %v1837_v63  ;;  %v1824_v49 = vmul.f32 %v4686_v3, %v1815_v59  ;;  %v3963_v63 = vor.u32 %v4546_v37, %v3962_v35  ;;  %v3902_v59 = vld [vmem:[%s7078_s7] sm:$0xf]  ;;  %2252 = vmatpush.bf16.msra.mxu1 %v3955_v60  ;;  %v4540_v60 = vld [vmem:[%s7078_s7 + $0x54] sm:$0xf]  ;;  %v3948_v35 = vld [vmem:[%s7078_s7 + $0x74] sm:$0xf0] }
 0x95e   :  { %v1851_v57 = vadd.f32 %v4689_v17, %v1845_v30  ;;  %v3903_v52 = vor.u32 %v4534_v6, %v3902_v59  ;;  %v4536_v30 = vld [vmem:[%s7078_s7 + $0x30] sm:$0xf0]  ;;  %v4547_v59 = vld [vmem:[%s7078_s7 + $0x88] sm:$0xf0] }
 0x95f   :  { %v1829_v2 = vadd.f32 %v4687_v28, %v1824_v49  ;;  %v4530_v49 = vld [vmem:[%s7078_s7 + $0x4] sm:$0xf] }
 0x961   :  { %v6062_v29 = vadd.f32 %v1829_v2, %v5539_v24  ;;  %v3904_v2 = vld [vmem:[%s7078_s7 + $0x24] sm:$0xf0] }
 0x962   :  { %v1816_v38 = vpop.f32.mrf.mxu3 }
 0x963   :  { %v4863_v58 = vpop.eup %4862  ;;  %v1817_v21 = vadd.f32 %v4685_v13, %v1816_v38  ;;  %v1838_v55 = vmul.f32 0.2, %v6062_v29  ;;  %v4555_v13 = vld [vmem:[%s7078_s7 + $0xc8] sm:$0xf0]  ;;  %v3918_v38 = vld [vmem:[%s7078_s7 + $0x10] sm:$0xf] }
 0x964   :  { %v1846_v26 = vmul.f32 %v4863_v58, %v4688_v34  ;;  %v3999_v10 = vor.u32 %v4555_v13, %v3998_v23  ;;  %v3907_v58 = vor.u32 %v4530_v49, %v3904_v2  ;;  %v3983_v23 = vor.u32 %v4553_v46, %v3982_v47  ;;  %v4549_v13 = vld [vmem:[%s7078_s7 + $0x9c] sm:$0xf]  ;;  %v4036_v47 = vld [vmem:[%s7078_s7 + $0x114] sm:$0xf0]  ;;  %v4550_v46 = vld [vmem:[%s7078_s7 + $0xa4] sm:$0xf] }
 0x965   :  { %v1825_v32 = vmul.f32 %v4686_v3, %v1817_v21  ;;  %4864 = vtanh.f32 %v1838_v55  ;;  %v3979_v3 = vor.u32 %v4548_v4, %v3976_v19  ;;  %v3919_v21 = vor.u32 %v4536_v30, %v3918_v38  ;;  %v4537_v55 = vld [vmem:[%s7078_s7 + $0x38] sm:$0xf0]  ;;  %v3910_v30 = vld [vmem:[%s7078_s7 + $0x8] sm:$0xf] }
 0x966   :  { %v1852_v40 = vadd.f32 %v4689_v17, %v1846_v26  ;;  %v3926_v26 = vld [vmem:[%s7078_s7 + $0x18] sm:$0xf]  ;;  %v4043_v19 = vor.u32 %v4565_v15, %v4042_v48  ;;  %v3951_v38 = vor.u32 %v4540_v60, %v3948_v35  ;;  %v4028_v48 = vld [vmem:[%s7078_s7 + $0x10c] sm:$0xf0]  ;;  %v3928_v60 = vld [vmem:[%s7078_s7 + $0x3c] sm:$0xf0] }
 0x967   :  { %v1830_v31 = vadd.f32 %v4687_v28, %v1825_v32  ;;  %2194 = vmatpush.bf16.msra.mxu2 %v3979_v3  ;;  %v4543_v28 = vld [vmem:[%s7078_s7 + $0x68] sm:$0xf0]  ;;  %v3927_v32 = vor.u32 %v4537_v55, %v3926_v26  ;;  %2253 = vmatpush.bf16.msra.mxu1 %v3919_v21  ;;  %v3984_v3 = vld [vmem:[%s7078_s7 + $0xbc] sm:$0xf0] }
 0x968   :  { %v1860_v1 = vpack.c.bf16 %v1852_v40, %v1851_v57  ;;  %v3939_v36 = vor.u32 %v4543_v28, %v3938_v12  ;;  %v3987_v28 = vor.u32 %v4549_v13, %v3984_v3 }
 0x969   :  { %v6069_v24 = vadd.f32 %v1830_v31, %v5546_v8  ;;  %v4564_v8 = vld [vmem:[%s7078_s7 + $0x110] sm:$0xf0] }
 0x96a   :  { %3898 = vmatmul.msk.bf16.vlgmr.msrb.gmra.mxu2 %vm140_vm0, %v1860_v1  ;;  %v4035_v54 = vor.u32 %v4564_v8, %v4034_v18  ;;  %2176 = vmatpush.bf16.msrb.mxu3 %v3939_v36  ;;  %v3946_v36 = vld [vmem:[%s7078_s7 + $0x50] sm:$0xf] }
 0x96b   :  { %v1839_v20 = vmul.f32 0.2, %v6069_v24  ;;  %v4865_v39 = vpop.eup %4864  ;;  %2195 = vmatpush.bf16.msra.mxu2 %v3943_v33  ;;  %2326 = vmatpush.bf16.msrb.mxu1 %v4043_v19  ;;  %v4551_v19 = vld [vmem:[%s7078_s7 + $0xac] sm:$0xf] }
 0x96c   :  { %v1847_v41 = vmul.f32 %v4865_v39, %v4688_v34  ;;  %2288 = vmatpush.bf16.msra.mxu0 %v4035_v54  ;;  %v4018_v54 = vld [vmem:[%s7078_s7 + $0xe0] sm:$0xf] }
 0x96d   :  { %4866 = vtanh.f32 %v1839_v20  ;;  %v4019_v51 = vor.u32 %v4562_v27, %v4018_v54 }
 0x96e   :  { %v1853_v44 = vadd.f32 %v4689_v17, %v1847_v41  ;;  %2177 = vmatpush.bf16.msrb.mxu3 %v3903_v52 }
 0x96f   :  { %2196 = vmatpush.bf16.msra.mxu2 %v3907_v58  ;;  %v4535_v58 = vld [vmem:[%s7078_s7 + $0x28] sm:$0xf0] }
 0x970   :  { %2289 = vmatpush.bf16.msra.mxu0 %v3999_v10  ;;  %v4006_v10 = vld [vmem:[%s7078_s7 + $0xb0] sm:$0xf] }
 0x971   :  { %v4007_v33 = vor.u32 %v4556_v7, %v4006_v10  ;;  %v4541_v10 = vld [vmem:[%s7078_s7 + $0x5c] sm:$0xf]  ;;  %v3964_v7 = vld [vmem:[%s7078_s7 + $0x84] sm:$0xf0] }
 0x972   :  { %2212 = vmatpush.bf16.msra.mxu3 %v4019_v51 }
 0x973   :  { %v4867_v22 = vpop.eup %4866  ;;  %2231 = vmatpush.bf16.msrb.mxu2 %v4023_v11  ;;  %2327 = vmatpush.bf16.msrb.mxu1 %v4007_v33  ;;  %v4560_v11 = vld [vmem:[%s7078_s7 + $0xf4] sm:$0xf]  ;;  %v4533_v33 = vld [vmem:[%s7078_s7 + $0x1c] sm:$0xf] }
 0x974   :  { %v1848_v62 = vmul.f32 %v4867_v22, %v4688_v34  ;;  %2290 = vmatpush.bf16.msra.mxu0 %v3963_v63  ;;  %v3970_v63 = vld [vmem:[%s7078_s7 + $0x68] sm:$0xf] }
 0x975   :  { %v3971_v55 = vor.u32 %v4547_v59, %v3970_v63 }
 0x976   :  { %v1854_v56 = vadd.f32 %v4689_v17, %v1848_v62  ;;  %2213 = vmatpush.bf16.msra.mxu3 %v3983_v23  ;;  %v4000_v23 = vld [vmem:[%s7078_s7 + $0xcc] sm:$0xf0] }
 0x977   :  { %2232 = vmatpush.bf16.msrb.mxu2 %v3987_v28  ;;  %2328 = vmatpush.bf16.msrb.mxu1 %v3971_v55  ;;  %v4003_v3 = vor.u32 %v4551_v19, %v4000_v23  ;;  %v4542_v28 = vld [vmem:[%s7078_s7 + $0x64] sm:$0xf] }
 0x978   :  { %v1861_v25 = vpack.c.bf16 %v1854_v56, %v1853_v44  ;;  %2291 = vmatpush.bf16.msra.mxu0 %v3927_v32  ;;  %v3912_v32 = vld [vmem:[%s7078_s7 + $0x2c] sm:$0xf0] }
 0x97a   :  { %3899 = vmatmul.msk.bf16.gmra.mxu2 %vm140_vm0, %v1861_v25 }
 0x97b   :  { %2233 = vmatpush.bf16.msrb.mxu2 %v3951_v38 }
 0x9ed   :  { %v1891_v34 = vpop.f32.mrf.mxu2 }
 0x9ee   :  { %v1892_v17 = vadd.f32 %v6137_v14, %v1891_v34  ;;  %v3947_v34 = vor.u32 %v4544_v9, %v3946_v36  ;;  %v3967_v9 = vor.u32 %v4542_v28, %v3964_v7  ;;  %v6365_v28 = vld [vmem:[%s7076_s5 + $0x30] sm:$0xff]  ;;  %v4574_v7 = vld [vmem:[%s7076_s5 + $0x40] sm:$0xff] }
 0x9f0   :  { %v1905_v57 = vmul.f32 0.044715, %v1892_v17  ;;  %v1901_v6 = vmul.f32 0.5, %v1892_v17  ;;  %2214 = vmatpush.bf16.msra.mxu3 %v3947_v34 }
 0x9f2   :  { %v1909_v40 = vmul.f32 %v1905_v57, %v1892_v17 }
 0x9f4   :  { %v1913_v31 = vmul.f32 %v1909_v40, %v1892_v17 }
 0x9f5   :  { %v1893_v1 = vpop.f32.mrf.mxu2 }
 0x9f6   :  { %v1917_v20 = vadd.f32 %v1913_v31, %v1892_v17  ;;  %v1894_v39 = vadd.f32 %v6137_v14, %v1893_v1  ;;  %v4531_v17 = vld [vmem:[%s7078_s7 + $0xc] sm:$0xf]  ;;  %v3934_v31 = vld [vmem:[%s7078_s7 + $0x20] sm:$0xf]  ;;  %v4538_v1 = vld [vmem:[%s7078_s7 + $0x40] sm:$0xf0] }
 0x9f8   :  { %v1906_v41 = vmul.f32 0.044715, %v1894_v39  ;;  %v1921_v22 = vmul.f32 0.7978846, %v1917_v20  ;;  %v1902_v52 = vmul.f32 0.5, %v1894_v39 }
 0x9fa   :  { %v1910_v62 = vmul.f32 %v1906_v41, %v1894_v39  ;;  %4868 = vtanh.f32 %v1921_v22  ;;  %v3911_v41 = vor.u32 %v4535_v58, %v3910_v30  ;;  %v3915_v22 = vor.u32 %v4531_v17, %v3912_v32 }
 0x9fc   :  { %v1914_v44 = vmul.f32 %v1910_v62, %v1894_v39  ;;  %2215 = vmatpush.bf16.msra.mxu3 %v3911_v41  ;;  %2234 = vmatpush.bf16.msrb.mxu2 %v3915_v22  ;;  %v4568_v41 = vld [vmem:[%s7076_s5 + $0x10] sm:$0xff] }
 0x9fd   :  { %v1896_v56 = vpop.f32.mrf.mxu2 }
 0x9fe   :  { %v1918_v25 = vadd.f32 %v1914_v44, %v1894_v39  ;;  %v6172_v18 = vadd.f32 %v6137_v14, %v1896_v56  ;;  %v3935_v44 = vor.u32 %v4538_v1, %v3934_v31 }
 0xa00   :  { %v1922_v8 = vmul.f32 0.7978846, %v1918_v25  ;;  %v1907_v43 = vmul.f32 0.044715, %v6172_v18  ;;  %v4869_v4 = vpop.eup %4868  ;;  %2329 = vmatpush.bf16.msrb.mxu1 %v3935_v44  ;;  %v1903_v54 = vmul.f32 0.5, %v6172_v18 }
 0xa01   :  { %v1929_v37 = vadd.f32 1.0, %v4869_v4  ;;  %v3992_v4 = vld [vmem:[%s7078_s7 + $0xc4] sm:$0xf0] }
 0xa02   :  { %4870 = vtanh.f32 %v1922_v8  ;;  %v1911_v50 = vmul.f32 %v1907_v43, %v6172_v18  ;;  %v3995_v13 = vor.u32 %v4550_v46, %v3992_v4 }
 0xa03   :  { %v6245_v57 = vmul.f32 %v1929_v37, %v1901_v6  ;;  %v3931_v37 = vor.u32 %v4533_v33, %v3928_v60  ;;  %v6378_v60 = vld [vmem:[%s7076_s5 + $0x28] sm:$0xff] }
 0xa04   :  { %v1915_v53 = vmul.f32 %v1911_v50, %v6172_v18 }
 0xa05   :  { %v1898_v12 = vpop.f32.mrf.mxu2 }
 0xa06   :  { %v1919_v16 = vadd.f32 %v1915_v53, %v6172_v18  ;;  %v1899_v61 = vadd.f32 %v6137_v14, %v1898_v12  ;;  %v4559_v18 = vld [vmem:[%s7078_s7 + $0xec] sm:$0xf]  ;;  %v4039_v53 = vor.u32 %v4560_v11, %v4036_v47  ;;  %v3956_v12 = vld [vmem:[%s7078_s7 + $0x7c] sm:$0xf0] }
 0xa07   :  { %v4031_v15 = vor.u32 %v4559_v18, %v4028_v48  ;;  %v3959_v36 = vor.u32 %v4541_v10, %v3956_v12  ;;  %v6360_v12 = vld [vmem:[%s7076_s5 + $0x20] sm:$0xff] }
 0xa08   :  { %v4871_v14 = vpop.eup %4870  ;;  %v1908_v49 = vmul.f32 0.044715, %v1899_v61  ;;  %v1923_v21 = vmul.f32 0.7978846, %v1919_v16  ;;  %v1904_v27 = vmul.f32 0.5, %v1899_v61 }
 0xa09   :  { %v1930_v2 = vadd.f32 1.0, %v4871_v14  ;;  %v4532_v16 = vld [vmem:[%s7078_s7 + $0x14] sm:$0xf] }
 0xa0a   :  { %v1912_v26 = vmul.f32 %v1908_v49, %v1899_v61  ;;  %4872 = vtanh.f32 %v1923_v21 }
 0xa0b   :  { %v6247_v40 = vmul.f32 %v1930_v2, %v1902_v52 }
 0xa0c   :  { %v1916_v20 = vmul.f32 %v1912_v26, %v1899_v61 }
 0xa0d   :  { %v6257_v39 = vpack.c.bf16 %v6247_v40, %v6245_v57 }
 0xa0e   :  { %v1920_v62 = vadd.f32 %v1916_v20, %v1899_v61  ;;  %v3920_v61 = vld [vmem:[%s7078_s7 + $0x34] sm:$0xf0] }
 0xa0f   :  { %4044 = vmatmul.msk.bf16.vlgmr.msrb.gmra.mxu3 %vm2163_vm13, %v6257_v39  ;;  %4046 = vmatmul.msk.bf16.vlgmr.msra.gmra.mxu2 %vm2163_vm13, %v6257_v39  ;;  %v3923_v35 = vor.u32 %v4532_v16, %v3920_v61 }
 0xa10   :  { %v1924_v56 = vmul.f32 0.7978846, %v1920_v62  ;;  %4052 = vmatmul.msk.bf16.vlgmr.msra.gmra.mxu1 %vm2163_vm13, %v6257_v39  ;;  %4056 = vmatmul.msk.bf16.vlgmr.msra.gmra.mxu0 %vm2163_vm13, %v6257_v39  ;;  %v4873_v25 = vpop.eup %4872 }
 0xa11   :  { %v1931_v8 = vadd.f32 1.0, %v4873_v25  ;;  %2269 = vmatpush.bf16.msrb.mxu3 %v4031_v15  ;;  %2307 = vmatpush.bf16.msra.mxu2 %v4039_v53 }
 0xa12   :  { %4874 = vtanh.f32 %v1924_v56 }
 0xa13   :  { %v6268_v51 = vmul.f32 %v1931_v8, %v1903_v54 }
 0xa15   :  { %2270 = vmatpush.bf16.msrb.mxu3 %v3995_v13  ;;  %2308 = vmatpush.bf16.msra.mxu2 %v4003_v3 }
 0xa18   :  { %v4875_v43 = vpop.eup %4874 }
 0xa19   :  { %v1932_v50 = vadd.f32 1.0, %v4875_v43  ;;  %2271 = vmatpush.bf16.msrb.mxu3 %v3959_v36  ;;  %2309 = vmatpush.bf16.msra.mxu2 %v3967_v9 }
 0xa1b   :  { %v6270_v5 = vmul.f32 %v1932_v50, %v1904_v27  ;;  %v4567_v27 = vld [vmem:[%s7076_s5 + $0x8] sm:$0xff]  ;;  %v4569_v50 = vld [vmem:[%s7076_s5 + $0x18] sm:$0xff] }
 0xa1d   :  { %v1978_v45 = vpack.c.bf16 %v6270_v5, %v6268_v51  ;;  %2272 = vmatpush.bf16.msrb.mxu3 %v3923_v35  ;;  %2310 = vmatpush.bf16.msra.mxu2 %v3931_v37  ;;  %v6383_v35 = vld [vmem:[%s7076_s5 + $0x38] sm:$0xff]  ;;  %v4575_v37 = vld [vmem:[%s7076_s5 + $0x48] sm:$0xff] }
 0xa1f   :  { %4045 = vmatmul.msk.bf16.gmra.mxu3 %vm2163_vm13, %v1978_v45  ;;  %4047 = vmatmul.msk.bf16.gmra.mxu2 %vm2163_vm13, %v1978_v45 }
 0xa20   :  { %4053 = vmatmul.msk.bf16.gmra.mxu1 %vm2163_vm13, %v1978_v45  ;;  %4057 = vmatmul.msk.bf16.gmra.mxu0 %vm2163_vm13, %v1978_v45 }
 0xa2f   :  { %4048 = vmatmul.msk.bf16.vlgmr.msra.gmra.mxu3 %vm2163_vm13, %v6257_v39  ;;  %4050 = vmatmul.msk.bf16.vlgmr.msrb.gmra.mxu2 %vm2163_vm13, %v6257_v39 }
 0xa30   :  { %4060 = vmatmul.msk.bf16.vlgmr.msrb.gmra.mxu1 %vm2163_vm13, %v6257_v39 }
 0xa3f   :  { %4049 = vmatmul.msk.bf16.gmra.mxu3 %vm2163_vm13, %v1978_v45  ;;  %4051 = vmatmul.msk.bf16.gmra.mxu2 %vm2163_vm13, %v1978_v45 }
 0xa40   :  { %4061 = vmatmul.msk.bf16.gmra.mxu1 %vm2163_vm13, %v1978_v45 }
 0xa4f   :  { %4054 = vmatmul.msk.bf16.vlgmr.msrb.gmra.mxu3 %vm2163_vm13, %v6257_v39  ;;  %4058 = vmatmul.msk.bf16.vlgmr.msra.gmra.mxu2 %vm2163_vm13, %v6257_v39  ;;  %v4566_v39 = vld [vmem:[%s7076_s5] sm:$0xff] }
 0xa5f   :  { %4055 = vmatmul.msk.bf16.gmra.mxu3 %vm2163_vm13, %v1978_v45  ;;  %4059 = vmatmul.msk.bf16.gmra.mxu2 %vm2163_vm13, %v1978_v45 }
 0xa8d   :  { %v2255_v63 = vpop.f32.mrf.mxu1  ;;  %v2293_v32 = vpop.f32.mrf.mxu0 }
 0xa92   :  { %v2179_v59 = vpop.f32.mrf.mxu3  ;;  %v2198_v14 = vpop.f32.mrf.mxu2 }
 0xa95   :  { %v2257_v6 = vpop.f32.mrf.mxu1  ;;  %v2295_v25 = vpop.f32.mrf.mxu0 }
 0xa96   :  { %v2532_v44 = vpack.c.bf16 %v2257_v6, %v2255_v63  ;;  %v2624_v16 = vpack.c.bf16 %v2295_v25, %v2293_v32  ;;  %v4583_v32 = vld [vmem:[%s7076_s5 + $0x88] sm:$0xff] }
 0xa9a   :  { %v2181_v49 = vpop.f32.mrf.mxu3  ;;  %v2200_v34 = vpop.f32.mrf.mxu2 }
 0xa9b   :  { %v2348_v31 = vpack.c.bf16 %v2181_v49, %v2179_v59  ;;  %v2394_v1 = vpack.c.bf16 %v2200_v34, %v2198_v14 }
 0xa9d   :  { %v2260_v52 = vpop.f32.mrf.mxu1  ;;  %v2298_v48 = vpop.f32.mrf.mxu0 }
 0xaa2   :  { %v2184_v2 = vpop.f32.mrf.mxu3  ;;  %v2203_v38 = vpop.f32.mrf.mxu2 }
 0xaa5   :  { %v2262_v30 = vpop.f32.mrf.mxu1  ;;  %v2300_v23 = vpop.f32.mrf.mxu0 }
 0xaa6   :  { %v2533_v20 = vpack.c.bf16 %v2262_v30, %v2260_v52  ;;  %v2625_v10 = vpack.c.bf16 %v2300_v23, %v2298_v48  ;;  %v6399_v30 = vld [vmem:[%s7076_s5 + $0x60] sm:$0xff] }
 0xaa7   :  { %v4446_v48 = vld [vmem:[%s7079_s8 + $0x200] sm:$0xf] }
 0xaaa   :  { %v2186_v58 = vpop.f32.mrf.mxu3  ;;  %v2205_v21 = vpop.f32.mrf.mxu2 }
 0xaab   :  { %v2349_v26 = vpack.c.bf16 %v2186_v58, %v2184_v2  ;;  %v2395_v55 = vpack.c.bf16 %v2205_v21, %v2203_v38  ;;  %v4576_v38 = vld [vmem:[%s7076_s5 + $0x50] sm:$0xff]  ;;  %v4582_v21 = vld [vmem:[%s7076_s5 + $0x80] sm:$0xff] }
 0xaac   :  { %v4580_v58 = vld [vmem:[%s7076_s5 + $0x70] sm:$0xff] }
 0xaad   :  { %v2331_v17 = vpop.f32.mrf.mxu1  ;;  %2372 = vmatpush.bf16.msra.mxu3 %v2349_v26  ;;  %2418 = vmatpush.bf16.msrb.mxu0 %v2395_v55  ;;  %v6415_v26 = vld [vmem:[%s7076_s5 + $0x58] sm:$0xff]  ;;  %v6420_v55 = vld [vmem:[%s7076_s5 + $0x68] sm:$0xff] }
 0xab1   :  { %2373 = vmatpush.bf16.msra.mxu3 %v2348_v31  ;;  %2419 = vmatpush.bf16.msrb.mxu0 %v2394_v1 }
 0xab2   :  { %v2217_v22 = vpop.f32.mrf.mxu3  ;;  %v2236_v62 = vpop.f32.mrf.mxu2 }
 0xab4   :  { %4070 = vmatmul.msk.bf16.vlgmr.msra.gmra.mxu3 %vm140_vm0, %v4566_v39  ;;  %4084 = vmatmul.msk.bf16.vlgmr.msrb.gmra.mxu0 %vm140_vm0, %v4568_v41 }
 0xab5   :  { %2556 = vmatpush.bf16.msrb.mxu3 %v2533_v20  ;;  %v2333_v56 = vpop.f32.mrf.mxu1 }
 0xab6   :  { %v2716_v47 = vpack.c.bf16 %v2333_v56, %v2331_v17  ;;  %v6425_v17 = vld [vmem:[%s7076_s5 + $0x78] sm:$0xff] }
 0xab9   :  { %2557 = vmatpush.bf16.msrb.mxu3 %v2532_v44 }
 0xaba   :  { %v2219_v8 = vpop.f32.mrf.mxu3  ;;  %v2238_v43 = vpop.f32.mrf.mxu2 }
 0xabb   :  { %v2440_v13 = vpack.c.bf16 %v2219_v8, %v2217_v22  ;;  %v2486_v3 = vpack.c.bf16 %v2238_v43, %v2236_v62  ;;  %v4438_v8 = vld [vmem:[%s7079_s8 + $0x1f8] sm:$0xf]  ;;  %v4651_v43 = vld [vmem:[%s7079_s8 + $0x218] sm:$0xf0] }
 0xabd   :  { %v2336_v54 = vpop.f32.mrf.mxu1 }
 0xac2   :  { %v2222_v45 = vpop.f32.mrf.mxu3  ;;  %v2241_v18 = vpop.f32.mrf.mxu2 }
 0xac4   :  { %4071 = vmatmul.msk.bf16.gmra.mxu3 %vm140_vm0, %v4567_v27  ;;  %4085 = vmatmul.msk.bf16.gmra.mxu0 %vm140_vm0, %v4569_v50 }
 0xac5   :  { %v2338_v11 = vpop.f32.mrf.mxu1 }
 0xac6   :  { %v2717_v15 = vpack.c.bf16 %v2338_v11, %v2336_v54  ;;  %v4647_v54 = vld [vmem:[%s7079_s8 + $0x1fc] sm:$0xf]  ;;  %v4652_v11 = vld [vmem:[%s7079_s8 + $0x220] sm:$0xf0] }
 0xac8   :  { %2740 = vmatpush.bf16.msra.mxu3 %v2717_v15 }
 0xaca   :  { %v2224_v46 = vpop.f32.mrf.mxu3  ;;  %v2243_v4 = vpop.f32.mrf.mxu2 }
 0xacb   :  { %v2441_v53 = vpack.c.bf16 %v2224_v46, %v2222_v45  ;;  %v2487_v19 = vpack.c.bf16 %v2243_v4, %v2241_v18  ;;  %v4439_v45 = vor.u32 %v4651_v43, %v4438_v8  ;;  %v4440_v18 = vld [vmem:[%s7079_s8 + $0x21c] sm:$0xf0]  ;;  %v4447_v46 = vor.u32 %v4652_v11, %v4446_v48  ;;  %v4648_v4 = vld [vmem:[%s7079_s8 + $0x204] sm:$0xf] }
 0xacc   :  { %2741 = vmatpush.bf16.msra.mxu3 %v2716_v47  ;;  %v4443_v47 = vor.u32 %v4647_v54, %v4440_v18  ;;  %v4630_v54 = vld [vmem:[%s7079_s8 + $0x174] sm:$0xf] }
 0xacd   :  { %2464 = vmatpush.bf16.msrb.mxu2 %v2441_v53  ;;  %2510 = vmatpush.bf16.msra.mxu1 %v2487_v19  ;;  %v4448_v53 = vld [vmem:[%s7079_s8 + $0x224] sm:$0xf0]  ;;  %v6486_v19 = vld [vmem:[%s7073_s2 + $0x1a] ss:$0 sm:$0xff] }
 0xad1   :  { %2465 = vmatpush.bf16.msrb.mxu2 %v2440_v13  ;;  %2511 = vmatpush.bf16.msra.mxu1 %v2486_v3  ;;  %v4451_v13 = vor.u32 %v4648_v4, %v4448_v53  ;;  %v4402_v3 = vld [vmem:[%s7079_s8 + $0x1b0] sm:$0xf]  ;;  %v4624_v4 = vld [vmem:[%s7079_s8 + $0x140] sm:$0xf0] }
 0xad2   :  { %v2274_v36 = vpop.f32.mrf.mxu3  ;;  %v2312_v9 = vpop.f32.mrf.mxu2  ;;  %v4620_v53 = vld [vmem:[%s7079_s8 + $0x124] sm:$0xf] }
 0xad4   :  { %4098 = vmatmul.msk.bf16.vlgmr.msrb.gmra.mxu2 %vm140_vm0, %v6360_v12  ;;  %4112 = vmatmul.msk.bf16.vlgmr.msra.gmra.mxu1 %vm140_vm0, %v6365_v28 }
 0xad5   :  { %2648 = vmatpush.bf16.msra.mxu2 %v2625_v10  ;;  %4126 = vmatmul.msk.bf16.vlgmr.msrb.gmra.mxu3 %vm140_vm0, %v4574_v7  ;;  %v4642_v10 = vld [vmem:[%s7079_s8 + $0x1d0] sm:$0xf0] }
 0xad6   :  { %v4638_v7 = vld [vmem:[%s7079_s8 + $0x1b4] sm:$0xf]  ;;  %3300 = vmatpush.bf16.msrb.mxu3 %v4451_v13 }
 0xad9   :  { %2649 = vmatpush.bf16.msra.mxu2 %v2624_v16  ;;  %v4410_v16 = vld [vmem:[%s7079_s8 + $0x1b8] sm:$0xf] }
 0xada   :  { %v2276_v61 = vpop.f32.mrf.mxu3  ;;  %v2314_v33 = vpop.f32.mrf.mxu2 }
 0xadb   :  { %v2578_v52 = vpack.c.bf16 %v2276_v61, %v2274_v36  ;;  %v2670_v2 = vpack.c.bf16 %v2314_v33, %v2312_v9  ;;  %v4403_v36 = vor.u32 %v4642_v10, %v4402_v3  ;;  %v4404_v9 = vld [vmem:[%s7079_s8 + $0x1d4] sm:$0xf0]  ;;  %v4643_v61 = vld [vmem:[%s7079_s8 + $0x1d8] sm:$0xf0]  ;;  %v4338_v3 = vld [vmem:[%s7079_s8 + $0x128] sm:$0xf] }
 0xadc   :  { %v4407_v33 = vor.u32 %v4638_v7, %v4404_v9  ;;  %v4625_v10 = vld [vmem:[%s7079_s8 + $0x148] sm:$0xf0] }
 0xadd   :  { %3262 = vmatpush.bf16.msrb.mxu2 %v4443_v47  ;;  %v4339_v9 = vor.u32 %v4625_v10, %v4338_v3 }
 0xae1   :  { %3263 = vmatpush.bf16.msrb.mxu2 %v4407_v33 }
 0xae2   :  { %v2279_v63 = vpop.f32.mrf.mxu3  ;;  %v2317_v59 = vpop.f32.mrf.mxu2 }
 0xae4   :  { %4099 = vmatmul.msk.bf16.gmra.mxu2 %vm140_vm0, %v6378_v60  ;;  %4113 = vmatmul.msk.bf16.gmra.mxu1 %vm140_vm0, %v6383_v35 }
 0xae5   :  { %4127 = vmatmul.msk.bf16.gmra.mxu3 %vm140_vm0, %v4575_v37  ;;  %v4411_v37 = vor.u32 %v4643_v61, %v4410_v16  ;;  %v4621_v16 = vld [vmem:[%s7079_s8 + $0x12c] sm:$0xf]  ;;  %v4340_v61 = vld [vmem:[%s7079_s8 + $0x14c] sm:$0xf0] }
 0xae6   :  { %v4343_v33 = vor.u32 %v4621_v16, %v4340_v61 }
 0xaea   :  { %v2281_v14 = vpop.f32.mrf.mxu3  ;;  %v2319_v6 = vpop.f32.mrf.mxu2 }
 0xaeb   :  { %v2579_v49 = vpack.c.bf16 %v2281_v14, %v2279_v63  ;;  %v2671_v34 = vpack.c.bf16 %v2319_v6, %v2317_v59  ;;  %v4639_v63 = vld [vmem:[%s7079_s8 + $0x1bc] sm:$0xf]  ;;  %v4412_v59 = vld [vmem:[%s7079_s8 + $0x1dc] sm:$0xf0] }
 0xaec   :  { %v4415_v14 = vor.u32 %v4639_v63, %v4412_v59  ;;  %v4615_v63 = vld [vmem:[%s7079_s8 + $0xf8] sm:$0xf0] }
 0xaed   :  { %2602 = vmatpush.bf16.msra.mxu0 %v2579_v49  ;;  %2694 = vmatpush.bf16.msrb.mxu1 %v2671_v34  ;;  %v4366_v49 = vld [vmem:[%s7079_s8 + $0x168] sm:$0xf]  ;;  %v4633_v34 = vld [vmem:[%s7079_s8 + $0x188] sm:$0xf0]  ;;  %v4611_v59 = vld [vmem:[%s7079_s8 + $0xdc] sm:$0xf] }
 0xaee   :  { %3301 = vmatpush.bf16.msrb.mxu3 %v4415_v14 }
 0xaf1   :  { %2603 = vmatpush.bf16.msra.mxu0 %v2578_v52  ;;  %2695 = vmatpush.bf16.msrb.mxu1 %v2670_v2  ;;  %v4629_v52 = vld [vmem:[%s7079_s8 + $0x16c] sm:$0xf] }
 0xaf4   :  { %4140 = vmatmul.msk.bf16.vlgmr.msra.gmra.mxu0 %vm140_vm0, %v4576_v38  ;;  %4154 = vmatmul.msk.bf16.vlgmr.msra.gmra.mxu2 %vm140_vm0, %v6399_v30  ;;  %v4367_v38 = vor.u32 %v4633_v34, %v4366_v49  ;;  %v4302_v49 = vld [vmem:[%s7079_s8 + $0xe0] sm:$0xf]  ;;  %v4616_v34 = vld [vmem:[%s7079_s8 + $0x100] sm:$0xf0] }
 0xaf5   :  { %4168 = vmatmul.msk.bf16.vlgmr.msrb.gmra.mxu1 %vm140_vm0, %v4580_v58  ;;  %4182 = vmatmul.msk.bf16.vlgmr.msra.gmra.mxu3 %vm140_vm0, %v4582_v21  ;;  %v4368_v58 = vld [vmem:[%s7079_s8 + $0x18c] sm:$0xf0] }
 0xaf6   :  { %3243 = vmatpush.bf16.msrb.mxu0 %v4439_v45  ;;  %3281 = vmatpush.bf16.msra.mxu1 %v4447_v46  ;;  %v4374_v21 = vld [vmem:[%s7079_s8 + $0x170] sm:$0xf]  ;;  %v4371_v8 = vor.u32 %v4629_v52, %v4368_v58  ;;  %v4376_v45 = vld [vmem:[%s7079_s8 + $0x194] sm:$0xf0]  ;;  %v4330_v46 = vld [vmem:[%s7079_s8 + $0x120] sm:$0xf] }
 0xaf7   :  { %v4379_v11 = vor.u32 %v4630_v54, %v4376_v45  ;;  %v4331_v13 = vor.u32 %v4624_v4, %v4330_v46 }
 0xaf8   :  { %3264 = vmatpush.bf16.msrb.mxu2 %v4371_v8  ;;  %v4304_v8 = vld [vmem:[%s7079_s8 + $0x104] sm:$0xf0] }
 0xaf9   :  { %3302 = vmatpush.bf16.msrb.mxu3 %v4379_v11  ;;  %v4606_v11 = vld [vmem:[%s7079_s8 + $0xb0] sm:$0xf0] }
 0xafa   :  { %3244 = vmatpush.bf16.msrb.mxu0 %v4403_v36  ;;  %3282 = vmatpush.bf16.msra.mxu1 %v4411_v37 }
 0xafd   :  { %3303 = vmatpush.bf16.msrb.mxu3 %v4343_v33 }
 0xafe   :  { %3245 = vmatpush.bf16.msrb.mxu0 %v4367_v38 }
 0xb02   :  { %3246 = vmatpush.bf16.msrb.mxu0 %v4331_v13  ;;  %v4607_v13 = vld [vmem:[%s7079_s8 + $0xb8] sm:$0xf0] }
 0xb04   :  { %4141 = vmatmul.msk.bf16.gmra.mxu0 %vm140_vm0, %v6415_v26  ;;  %4155 = vmatmul.msk.bf16.gmra.mxu2 %vm140_vm0, %v6420_v55 }
 0xb05   :  { %4169 = vmatmul.msk.bf16.gmra.mxu1 %vm140_vm0, %v6425_v17  ;;  %4183 = vmatmul.msk.bf16.gmra.mxu3 %vm140_vm0, %v4583_v32  ;;  %v4634_v32 = vld [vmem:[%s7079_s8 + $0x190] sm:$0xf0] }
 0xb06   :  { %v4375_v43 = vor.u32 %v4634_v32, %v4374_v21  ;;  %v4303_v21 = vor.u32 %v4616_v34, %v4302_v49  ;;  %v4612_v32 = vld [vmem:[%s7079_s8 + $0xe4] sm:$0xf] }
 0xb07   :  { %v4307_v54 = vor.u32 %v4612_v32, %v4304_v8  ;;  %v4232_v32 = vld [vmem:[%s7079_s8 + $0x74] sm:$0xf0] }
 0xb08   :  { %3283 = vmatpush.bf16.msra.mxu1 %v4375_v43 }
 0xb09   :  { %3304 = vmatpush.bf16.msrb.mxu3 %v4307_v54 }
 0xb0c   :  { %3284 = vmatpush.bf16.msra.mxu1 %v4339_v9  ;;  %v4268_v9 = vld [vmem:[%s7079_s8 + $0xbc] sm:$0xf0] }
 0xb10   :  { %3285 = vmatpush.bf16.msra.mxu1 %v4303_v21  ;;  %v4594_v21 = vld [vmem:[%s7079_s8 + $0x54] sm:$0xf] }
 0xb11   :  { %v4235_v54 = vor.u32 %v4594_v21, %v4232_v32 }
 0xb31   :  { %v2421_v39 = vpop.f32.mrf.mxu0 }
 0xb37   :  { %v2375_v31 = vpop.f32.mrf.mxu3 }
 0xb38   :  { %v2385_v6 = vadd.f32 %v6486_v19, %v2375_v31 }
 0xb39   :  { %v6445_v62 = vpop.f32.mrf.mxu0 }
 0xb3a   :  { %v2431_v47 = vadd.f32 %v2421_v39, %v2385_v6  ;;  %v4332_v39 = vld [vmem:[%s7079_s8 + $0x144] sm:$0xf0] }
 0xb3b   :  { %v4335_v36 = vor.u32 %v4620_v53, %v4332_v39  ;;  %v4266_v53 = vld [vmem:[%s7079_s8 + $0x98] sm:$0xf] }
 0xb3d   :  { %3265 = vmatpush.bf16.msrb.mxu2 %v4335_v36  ;;  %v4603_v36 = vld [vmem:[%s7079_s8 + $0x9c] sm:$0xf] }
 0xb3e   :  { %v4271_v61 = vor.u32 %v4603_v36, %v4268_v9 }
 0xb3f   :  { %v6437_v1 = vpop.f32.mrf.mxu3 }
 0xb40   :  { %v2386_v37 = vadd.f32 %v6486_v19, %v6437_v1  ;;  %v4296_v1 = vld [vmem:[%s7079_s8 + $0xfc] sm:$0xf0]  ;;  %3305 = vmatpush.bf16.msrb.mxu3 %v4271_v61  ;;  %v4454_v61 = vld [vmem:[%s7079_s8 + $0x208] sm:$0xf] }
 0xb41   :  { %v6462_v27 = vpop.f32.mrf.mxu0  ;;  %v4299_v58 = vor.u32 %v4611_v59, %v4296_v1  ;;  %v4230_v59 = vld [vmem:[%s7079_s8 + $0x50] sm:$0xf] }
 0xb42   :  { %v2432_v45 = vadd.f32 %v6445_v62, %v2386_v37  ;;  %v4260_v62 = vld [vmem:[%s7079_s8 + $0xb4] sm:$0xf0]  ;;  %v4593_v37 = vld [vmem:[%s7079_s8 + $0x4c] sm:$0xf] }
 0xb43   :  { %3266 = vmatpush.bf16.msrb.mxu2 %v4299_v58 }
 0xb44   :  { %3306 = vmatpush.bf16.msrb.mxu3 %v4235_v54 }
 0xb47   :  { %v6439_v20 = vpop.f32.mrf.mxu3 }
 0xb48   :  { %v2387_v16 = vadd.f32 %v6486_v19, %v6439_v20 }
 0xb49   :  { %v6543_v18 = vpop.f32.mrf.mxu0 }
 0xb4a   :  { %v2433_v8 = vadd.f32 %v6462_v27, %v2387_v16 }
 0xb4f   :  { %v6441_v41 = vpop.f32.mrf.mxu3 }
 0xb51   :  { %v6443_v22 = vpop.f32.mrf.mxu1 }
 0xb57   :  { %v6447_v44 = vpop.f32.mrf.mxu2 }
 0xb58   :  { %v6449_v56 = vpop.f32.mrf.mxu3  ;;  %v2477_v7 = vadd.f32 %v6447_v44, %v2431_v47  ;;  %v4294_v44 = vld [vmem:[%s7079_s8 + $0xd8] sm:$0xf]  ;;  %v4602_v47 = vld [vmem:[%s7079_s8 + $0x94] sm:$0xf] }
 0xb59   :  { %v6451_v25 = vpop.f32.mrf.mxu1  ;;  %v4295_v6 = vor.u32 %v4615_v63, %v4294_v44  ;;  %v4263_v10 = vor.u32 %v4602_v47, %v4260_v62  ;;  %v4224_v63 = vld [vmem:[%s7079_s8 + $0x6c] sm:$0xf0]  ;;  %v4589_v62 = vld [vmem:[%s7079_s8 + $0x28] sm:$0xf0] }
 0xb5a   :  { %v2523_v52 = vadd.f32 %v6443_v22, %v2477_v7  ;;  %v4258_v22 = vld [vmem:[%s7079_s8 + $0x90] sm:$0xf]  ;;  %v4267_v7 = vor.u32 %v4607_v13, %v4266_v53 }
 0xb5b   :  { %3247 = vmatpush.bf16.msrb.mxu0 %v4295_v6  ;;  %v4259_v4 = vor.u32 %v4606_v11, %v4258_v22  ;;  %3267 = vmatpush.bf16.msrb.mxu2 %v4263_v10  ;;  %v4598_v6 = vld [vmem:[%s7079_s8 + $0x70] sm:$0xf0]  ;;  %v4588_v22 = vld [vmem:[%s7079_s8 + $0x20] sm:$0xf0]  ;;  %v4196_v10 = vld [vmem:[%s7079_s8 + $0x2c] sm:$0xf0] }
 0xb5c   :  { %v2569_v39 = vadd.f32 %v6449_v56, %v2523_v52  ;;  %3286 = vmatpush.bf16.msra.mxu1 %v4267_v7  ;;  %v4222_v56 = vld [vmem:[%s7079_s8 + $0x48] sm:$0xf]  ;;  %v4227_v52 = vor.u32 %v4593_v37, %v4224_v63  ;;  %v4231_v58 = vor.u32 %v4598_v6, %v4230_v59  ;;  %v4584_v11 = vld [vmem:[%s7079_s8 + $0x4] sm:$0xf]  ;;  %v2388_v7 = vadd.f32 %v6486_v19, %v6441_v41  ;;  %v4653_v41 = vld [vmem:[%s7079_s8 + $0x228] sm:$0xf0] }
 0xb5d   :  { %v4649_v19 = vld [vmem:[%s7079_s8 + $0x20c] sm:$0xf]  ;;  %v4455_v63 = vor.u32 %v4653_v41, %v4454_v61  ;;  %v4462_v59 = vld [vmem:[%s7079_s8 + $0x210] sm:$0xf]  ;;  %v4654_v6 = vld [vmem:[%s7079_s8 + $0x230] sm:$0xf0] }
 0xb5e   :  { %v4631_v61 = vld [vmem:[%s7079_s8 + $0x17c] sm:$0xf]  ;;  %v4384_v41 = vld [vmem:[%s7079_s8 + $0x19c] sm:$0xf0] }
 0xb5f   :  { %v6464_v50 = vpop.f32.mrf.mxu2  ;;  %3248 = vmatpush.bf16.msrb.mxu0 %v4259_v4  ;;  %3268 = vmatpush.bf16.msrb.mxu2 %v4227_v52  ;;  %v4194_v4 = vld [vmem:[%s7079_s8 + $0x8] sm:$0xf]  ;;  %v4463_v52 = vor.u32 %v4654_v6, %v4462_v59 }
 0xb60   :  { %v6475_v15 = vpop.f32.mrf.mxu3  ;;  %v2478_v3 = vadd.f32 %v6464_v50, %v2432_v45  ;;  %v4597_v50 = vld [vmem:[%s7079_s8 + $0x68] sm:$0xf0]  ;;  %3287 = vmatpush.bf16.msra.mxu1 %v4231_v58  ;;  %v4464_v58 = vld [vmem:[%s7079_s8 + $0x234] sm:$0xf0] }
 0xb61   :  { %v6488_v23 = vpop.f32.mrf.mxu1  ;;  %v4223_v20 = vor.u32 %v4597_v50, %v4222_v56  ;;  %v4456_v50 = vld [vmem:[%s7079_s8 + $0x22c] sm:$0xf0] }
 0xb62   :  { %v2524_v1 = vadd.f32 %v6451_v25, %v2478_v3  ;;  %v4186_v25 = vld [vmem:[%s7079_s8] sm:$0xf]  ;;  %v4585_v3 = vld [vmem:[%s7079_s8 + $0xc] sm:$0xf] }
 0xb63   :  { %3249 = vmatpush.bf16.msrb.mxu0 %v4223_v20  ;;  %v4187_v47 = vor.u32 %v4588_v22, %v4186_v25  ;;  %v4199_v9 = vor.u32 %v4585_v3, %v4196_v10 }
 0xb64   :  { %v2570_v53 = vadd.f32 %v6475_v15, %v2524_v1  ;;  %v4650_v1 = vld [vmem:[%s7079_s8 + $0x214] sm:$0xf] }
 0xb65   :  { %3307 = vmatpush.bf16.msrb.mxu3 %v4199_v9  ;;  %v4467_v25 = vor.u32 %v4650_v1, %v4464_v58 }
 0xb67   :  { %v6524_v2 = vpop.f32.mrf.mxu2  ;;  %3250 = vmatpush.bf16.msrb.mxu0 %v4187_v47  ;;  %v4645_v47 = vld [vmem:[%s7079_s8 + $0x1e8] sm:$0xf0] }
 0xb68   :  { %v6535_v31 = vpop.f32.mrf.mxu3  ;;  %v2479_v27 = vadd.f32 %v6524_v2, %v2433_v8  ;;  %v4195_v2 = vor.u32 %v4589_v62, %v4194_v4  ;;  %v4418_v8 = vld [vmem:[%s7079_s8 + $0x1c0] sm:$0xf]  ;;  %v4641_v62 = vld [vmem:[%s7079_s8 + $0x1cc] sm:$0xf] }
 0xb69   :  { %v6545_v48 = vpop.f32.mrf.mxu1  ;;  %3376 = vmatpush.bf16.msra.mxu3 %v4467_v25 }
 0xb6a   :  { %3288 = vmatpush.bf16.msra.mxu1 %v4195_v2 }
 0xb6b   :  { %3319 = vmatpush.bf16.msra.mxu0 %v4455_v63  ;;  %v4632_v63 = vld [vmem:[%s7079_s8 + $0x184] sm:$0xf] }
 0xb6e   :  { %3357 = vmatpush.bf16.msrb.mxu1 %v4463_v52  ;;  %v4622_v52 = vld [vmem:[%s7079_s8 + $0x134] sm:$0xf] }
 0xb6f   :  { %v6583_v14 = vpop.f32.mrf.mxu2 }
 0xb70   :  { %v6595_v38 = vpop.f32.mrf.mxu3 }
 0xb71   :  { %v2605_v43 = vpop.f32.mrf.mxu0 }
 0xb72   :  { %v2697_v46 = vpop.f32.mrf.mxu1  ;;  %v2615_v33 = vadd.f32 %v2605_v43, %v2569_v39 }
 0xb77   :  { %v2651_v44 = vpop.f32.mrf.mxu2 }
 0xb78   :  { %v2661_v49 = vadd.f32 %v2651_v44, %v2615_v33  ;;  %v2743_v34 = vpop.f32.mrf.mxu3  ;;  %v2525_v33 = vadd.f32 %v6488_v23, %v2479_v27  ;;  %v4459_v23 = vor.u32 %v4649_v19, %v4456_v50  ;;  %v4426_v27 = vld [vmem:[%s7079_s8 + $0x1c8] sm:$0xf]  ;;  %v4390_v19 = vld [vmem:[%s7079_s8 + $0x180] sm:$0xf]  ;;  %v4636_v50 = vld [vmem:[%s7079_s8 + $0x1a0] sm:$0xf0] }
 0xb79   :  { %v2607_v43 = vpop.f32.mrf.mxu0  ;;  %v4427_v4 = vor.u32 %v4645_v47, %v4426_v27 }
 0xb7a   :  { %v2707_v45 = vadd.f32 %v2697_v46, %v2661_v49  ;;  %v4188_v46 = vld [vmem:[%s7079_s8 + $0x24] sm:$0xf0]  ;;  %v2699_v36 = vpop.f32.mrf.mxu1  ;;  %v2616_v16 = vadd.f32 %v2607_v43, %v2570_v53  ;;  %v2434_v49 = vadd.f32 %v6543_v18, %v2388_v7  ;;  %v4644_v43 = vld [vmem:[%s7079_s8 + $0x1e0] sm:$0xf0]  ;;  %v2571_v54 = vadd.f32 %v6535_v31, %v2525_v33  ;;  %v4428_v53 = vld [vmem:[%s7079_s8 + $0x1ec] sm:$0xf0] }
 0xb7b   :  { %v4191_v39 = vor.u32 %v4584_v11, %v4188_v46  ;;  %v4640_v18 = vld [vmem:[%s7079_s8 + $0x1c4] sm:$0xf]  ;;  %v4419_v22 = vor.u32 %v4644_v43, %v4418_v8  ;;  %v4420_v11 = vld [vmem:[%s7079_s8 + $0x1e4] sm:$0xf0]  ;;  %3358 = vmatpush.bf16.msrb.mxu1 %v4427_v4  ;;  %v4348_v8 = vld [vmem:[%s7079_s8 + $0x154] sm:$0xf0] }
 0xb7c   :  { %v6678_v13 = vadd.f32 %v2743_v34, %v2707_v45  ;;  %v2480_v45 = vadd.f32 %v6583_v14, %v2434_v49  ;;  %v4423_v14 = vor.u32 %v4640_v18, %v4420_v11  ;;  %v4346_v49 = vld [vmem:[%s7079_s8 + $0x130] sm:$0xf]  ;;  %v4354_v43 = vld [vmem:[%s7079_s8 + $0x138] sm:$0xf]  ;;  %v4627_v18 = vld [vmem:[%s7079_s8 + $0x158] sm:$0xf0] }
 0xb7d   :  { %3269 = vmatpush.bf16.msrb.mxu2 %v4191_v39  ;;  %v4431_v39 = vor.u32 %v4641_v62, %v4428_v53  ;;  %3320 = vmatpush.bf16.msra.mxu0 %v4419_v22  ;;  %v4355_v25 = vor.u32 %v4627_v18, %v4354_v43  ;;  %v4623_v22 = vld [vmem:[%s7079_s8 + $0x13c] sm:$0xf]  ;;  %v4356_v11 = vld [vmem:[%s7079_s8 + $0x15c] sm:$0xf0]  ;;  %v4238_v43 = vld [vmem:[%s7079_s8 + $0x58] sm:$0xf] }
 0xb7e   :  { %v2761_v15 = vmul.f32 0.044715, %v6678_v13  ;;  %v2526_v7 = vadd.f32 %v6545_v48, %v2480_v45  ;;  %v4359_v27 = vor.u32 %v4623_v22, %v4356_v11  ;;  %v2757_v11 = vmul.f32 0.5, %v6678_v13 }
 0xb7f   :  { %v2653_v56 = vpop.f32.mrf.mxu2  ;;  %3377 = vmatpush.bf16.msra.mxu3 %v4431_v39  ;;  %v4310_v39 = vld [vmem:[%s7079_s8 + $0xe8] sm:$0xf] }
 0xb80   :  { %v2765_v37 = vmul.f32 %v2761_v15, %v6678_v13  ;;  %v2662_v44 = vadd.f32 %v2653_v56, %v2616_v16  ;;  %v2745_v20 = vpop.f32.mrf.mxu3  ;;  %v4382_v15 = vld [vmem:[%s7079_s8 + $0x178] sm:$0xf]  ;;  %v4635_v16 = vld [vmem:[%s7079_s8 + $0x198] sm:$0xf0]  ;;  %v2572_v58 = vadd.f32 %v6595_v38, %v2526_v7  ;;  %v4351_v38 = vor.u32 %v4622_v52, %v4348_v8  ;;  %v4284_v8 = vld [vmem:[%s7079_s8 + $0xcc] sm:$0xf0] }
 0xb81   :  { %v2610_v34 = vpop.f32.mrf.mxu0  ;;  %3338 = vmatpush.bf16.msra.mxu2 %v4459_v23  ;;  %v4383_v48 = vor.u32 %v4635_v16, %v4382_v15  ;;  %v4392_v23 = vld [vmem:[%s7079_s8 + $0x1a4] sm:$0xf0]  ;;  %v4318_v15 = vld [vmem:[%s7079_s8 + $0xf0] sm:$0xf] }
 0xb82   :  { %v2769_v21 = vmul.f32 %v2765_v37, %v6678_v13  ;;  %v2708_v32 = vadd.f32 %v2699_v36, %v2662_v44  ;;  %v2617_v10 = vadd.f32 %v2610_v34, %v2571_v54  ;;  %v2702_v36 = vpop.f32.mrf.mxu1  ;;  %v4387_v44 = vor.u32 %v4631_v61, %v4384_v41  ;;  %v4626_v34 = vld [vmem:[%s7079_s8 + $0x150] sm:$0xf0] }
 0xb83   :  { %3321 = vmatpush.bf16.msra.mxu0 %v4383_v48  ;;  %v4395_v1 = vor.u32 %v4632_v63, %v4392_v23  ;;  %v4320_v48 = vld [vmem:[%s7079_s8 + $0x114] sm:$0xf0]  ;;  %v4604_v63 = vld [vmem:[%s7079_s8 + $0xa4] sm:$0xf] }
 0xb84   :  { %v2773_v46 = vadd.f32 %v2769_v21, %v6678_v13  ;;  %v6738_v31 = vadd.f32 %v2745_v20, %v2708_v32  ;;  %v4391_v20 = vor.u32 %v4636_v50, %v4390_v19  ;;  %v4347_v32 = vor.u32 %v4626_v34, %v4346_v49  ;;  %v4609_v49 = vld [vmem:[%s7079_s8 + $0xc8] sm:$0xf0] }
 0xb85   :  { %3339 = vmatpush.bf16.msra.mxu2 %v4423_v14  ;;  %3378 = vmatpush.bf16.msra.mxu3 %v4395_v1  ;;  %v4282_v1 = vld [vmem:[%s7079_s8 + $0xa8] sm:$0xf] }
 0xb86   :  { %v2777_v2 = vmul.f32 0.7978846, %v2773_v46  ;;  %v2762_v3 = vmul.f32 0.044715, %v6738_v31  ;;  %3359 = vmatpush.bf16.msrb.mxu1 %v4391_v20  ;;  %v4608_v20 = vld [vmem:[%s7079_s8 + $0xc0] sm:$0xf0] }
 0xb87   :  { %v2656_v9 = vpop.f32.mrf.mxu2  ;;  %3322 = vmatpush.bf16.msra.mxu0 %v4347_v32  ;;  %v4605_v32 = vld [vmem:[%s7079_s8 + $0xac] sm:$0xf] }
 0xb88   :  { %4876 = vtanh.f32 %v2777_v2  ;;  %v2766_v33 = vmul.f32 %v2762_v3, %v6738_v31  ;;  %v2663_v56 = vadd.f32 %v2656_v9, %v2617_v10  ;;  %v2748_v37 = vpop.f32.mrf.mxu3  ;;  %v4617_v2 = vld [vmem:[%s7079_s8 + $0x108] sm:$0xf0]  ;;  %v4312_v9 = vld [vmem:[%s7079_s8 + $0x10c] sm:$0xf0]  ;;  %v4287_v18 = vor.u32 %v4605_v32, %v4284_v8  ;;  %v4398_v8 = vld [vmem:[%s7079_s8 + $0x188] sm:$0xf] }
 0xb89   :  { %v2612_v21 = vpop.f32.mrf.mxu0  ;;  %3340 = vmatpush.bf16.msra.mxu2 %v4387_v44  ;;  %v4311_v7 = vor.u32 %v4617_v2, %v4310_v39  ;;  %3379 = vmatpush.bf16.msra.mxu3 %v4359_v27  ;;  %v4274_v44 = vld [vmem:[%s7079_s8 + $0xa0] sm:$0xf]  ;;  %v4600_v2 = vld [vmem:[%s7079_s8 + $0x80] sm:$0xf0] }
 0xb8a   :  { %v2770_v59 = vmul.f32 %v2766_v33, %v6738_v31  ;;  %v2709_v6 = vadd.f32 %v2702_v36, %v2663_v56  ;;  %v2618_v4 = vadd.f32 %v2612_v21, %v2572_v58  ;;  %3360 = vmatpush.bf16.msrb.mxu1 %v4355_v25  ;;  %v4613_v36 = vld [vmem:[%s7079_s8 + $0xec] sm:$0xf]  ;;  %v2704_v16 = vpop.f32.mrf.mxu1  ;;  %v4618_v33 = vld [vmem:[%s7079_s8 + $0x110] sm:$0xf0]  ;;  %v4283_v21 = vor.u32 %v4609_v49, %v4282_v1  ;;  %v4240_v25 = vld [vmem:[%s7079_s8 + $0x7c] sm:$0xf0] }
 0xb8b   :  { %v4315_v61 = vor.u32 %v4613_v36, %v4312_v9  ;;  %v4614_v56 = vld [vmem:[%s7079_s8 + $0xf4] sm:$0xf]  ;;  %3323 = vmatpush.bf16.msra.mxu0 %v4311_v7  ;;  %v4319_v50 = vor.u32 %v4618_v33, %v4318_v15  ;;  %v4246_v39 = vld [vmem:[%s7079_s8 + $0x60] sm:$0xf]  ;;  %v4202_v7 = vld [vmem:[%s7079_s8 + $0x10] sm:$0xf] }
 0xb8c   :  { %v2774_v54 = vadd.f32 %v2770_v59, %v6738_v31  ;;  %v6794_v45 = vadd.f32 %v2748_v37, %v2709_v6  ;;  %v4323_v37 = vor.u32 %v4614_v56, %v4320_v48  ;;  %v4275_v59 = vor.u32 %v4608_v20, %v4274_v44  ;;  %v4276_v6 = vld [vmem:[%s7079_s8 + $0xc4] sm:$0xf0]  ;;  %v4590_v15 = vld [vmem:[%s7079_s8 + $0x30] sm:$0xf0]  ;;  %v4591_v56 = vld [vmem:[%s7079_s8 + $0x38] sm:$0xf0] }
 0xb8d   :  { %3341 = vmatpush.bf16.msra.mxu2 %v4351_v38  ;;  %v4279_v58 = vor.u32 %v4604_v63, %v4276_v6  ;;  %v4595_v38 = vld [vmem:[%s7079_s8 + $0x5c] sm:$0xf]  ;;  %v4212_v63 = vld [vmem:[%s7079_s8 + $0x3c] sm:$0xf0] }
 0xb8e   :  { %v4877_v47 = vpop.eup %4876  ;;  %v2778_v46 = vmul.f32 0.7978846, %v2774_v54  ;;  %v2763_v14 = vmul.f32 0.044715, %v6794_v45  ;;  %3361 = vmatpush.bf16.msrb.mxu1 %v4319_v50  ;;  %3380 = vmatpush.bf16.msra.mxu3 %v4323_v37  ;;  %v4599_v54 = vld [vmem:[%s7079_s8 + $0x78] sm:$0xf0] }
 0xb8f   :  { %v6803_v62 = vadd.f32 1.0, %v4877_v47  ;;  %v2658_v53 = vpop.f32.mrf.mxu2  ;;  %3324 = vmatpush.bf16.msra.mxu0 %v4275_v59  ;;  %v4587_v20 = vld [vmem:[%s7079_s8 + $0x1c] sm:$0xf]  ;;  %v4470_v59 = vld [vmem:[%s7079_s8 + $0x218] sm:$0xf] }
 0xb90   :  { %4878 = vtanh.f32 %v2778_v46  ;;  %v2767_v3 = vmul.f32 %v2763_v14, %v6794_v45  ;;  %v2664_v10 = vadd.f32 %v2658_v53, %v2618_v4  ;;  %v2750_v23 = vpop.f32.mrf.mxu3  ;;  %v4239_v46 = vor.u32 %v4599_v54, %v4238_v43  ;;  %v4655_v6 = vld [vmem:[%s7079_s8 + $0x238] sm:$0xf0]  ;;  %v4637_v43 = vld [vmem:[%s7079_s8 + $0x1a8] sm:$0xf0] }
 0xb91   :  { %3342 = vmatpush.bf16.msra.mxu2 %v4315_v61  ;;  %v2758_v14 = vmul.f32 0.5, %v6738_v31  ;;  %v4243_v53 = vor.u32 %v4595_v38, %v4240_v25  ;;  %v4248_v31 = vld [vmem:[%s7079_s8 + $0x84] sm:$0xf0]  ;;  %v2789_v36 = vmul.f32 %v6803_v62, %v2757_v11  ;;  %v4204_v61 = vld [vmem:[%s7079_s8 + $0x34] sm:$0xf0]  ;;  %v4215_v1 = vor.u32 %v4587_v20, %v4212_v63 }
 0xb92   :  { %v2771_v41 = vmul.f32 %v2767_v3, %v6794_v45  ;;  %v2710_v19 = vadd.f32 %v2704_v16, %v2664_v10  ;;  %3362 = vmatpush.bf16.msrb.mxu1 %v4283_v21  ;;  %v4247_v3 = vor.u32 %v4600_v2, %v4246_v39  ;;  %v4596_v10 = vld [vmem:[%s7079_s8 + $0x64] sm:$0xf]  ;;  %3381 = vmatpush.bf16.msra.mxu3 %v4287_v18  ;;  %v4586_v16 = vld [vmem:[%s7079_s8 + $0x14] sm:$0xf]  ;;  %v4210_v62 = vld [vmem:[%s7079_s8 + $0x18] sm:$0xf] }
 0xb93   :  { %3325 = vmatpush.bf16.msra.mxu0 %v4239_v46  ;;  %v4207_v37 = vor.u32 %v4586_v16, %v4204_v61  ;;  %v4211_v44 = vor.u32 %v4591_v56, %v4210_v62  ;;  %v4471_v49 = vor.u32 %v4655_v6, %v4470_v59  ;;  %v4399_v54 = vor.u32 %v4637_v43, %v4398_v8  ;;  %v4290_v2 = vld [vmem:[%s7079_s8 + $0xb0] sm:$0xf] }
 0xb94   :  { %v2775_v34 = vadd.f32 %v2771_v41, %v6794_v45  ;;  %v6850_v52 = vadd.f32 %v2750_v23, %v2710_v19  ;;  %v4251_v41 = vor.u32 %v4596_v10, %v4248_v31  ;;  %v4203_v19 = vor.u32 %v4590_v15, %v4202_v7  ;;  %v4254_v10 = vld [vmem:[%s7079_s8 + $0x68] sm:$0xf]  ;;  %v4601_v31 = vld [vmem:[%s7079_s8 + $0x88] sm:$0xf0] }
 0xb95   :  { %3343 = vmatpush.bf16.msra.mxu2 %v4279_v58  ;;  %v4646_v58 = vld [vmem:[%s7079_s8 + $0x1f0] sm:$0xf0]  ;;  %v2759_v25 = vmul.f32 0.5, %v6794_v45  ;;  %v4326_v45 = vld [vmem:[%s7079_s8 + $0xf8] sm:$0xf]  ;;  %v4255_v7 = vor.u32 %v4601_v31, %v4254_v10 }
 0xb96   :  { %v4879_v22 = vpop.eup %4878  ;;  %v2779_v27 = vmul.f32 0.7978846, %v2775_v34  ;;  %v2764_v47 = vmul.f32 0.044715, %v6850_v52  ;;  %3363 = vmatpush.bf16.msrb.mxu1 %v4247_v3  ;;  %3382 = vmatpush.bf16.msra.mxu3 %v4251_v41  ;;  %v4434_v34 = vld [vmem:[%s7079_s8 + $0x1d0] sm:$0xf] }
 0xb97   :  { %v2786_v4 = vadd.f32 1.0, %v4879_v22  ;;  %3326 = vmatpush.bf16.msra.mxu0 %v4203_v19  ;;  %v4435_v21 = vor.u32 %v4646_v58, %v4434_v34  ;;  %v2760_v22 = vmul.f32 0.5, %v6850_v52 }
 0xb98   :  { %v2768_v13 = vmul.f32 %v2764_v47, %v6850_v52  ;;  %4880 = vtanh.f32 %v2779_v27  ;;  %v4362_v27 = vld [vmem:[%s7079_s8 + $0x140] sm:$0xf]  ;;  %v4628_v47 = vld [vmem:[%s7079_s8 + $0x160] sm:$0xf0] }
 0xb99   :  { %v2790_v9 = vmul.f32 %v2786_v4, %v2758_v14  ;;  %3344 = vmatpush.bf16.msra.mxu2 %v4243_v53  ;;  %v4363_v53 = vor.u32 %v4628_v47, %v4362_v27  ;;  %v4929_v27 = vld [vmem:[%s7076_s5 + $0x10] sm:$0xff] }
 0xb9a   :  { %v2772_v33 = vmul.f32 %v2768_v13, %v6850_v52  ;;  %3364 = vmatpush.bf16.msrb.mxu1 %v4211_v44  ;;  %3383 = vmatpush.bf16.msra.mxu3 %v4215_v1  ;;  %v4610_v13 = vld [vmem:[%s7079_s8 + $0xd0] sm:$0xf0] }
 0xb9b   :  { %v6906_v48 = vpack.c.bf16 %v2790_v9, %v2789_v36  ;;  %v4291_v3 = vor.u32 %v4610_v13, %v4290_v2  ;;  %v4218_v36 = vld [vmem:[%s7079_s8 + $0x20] sm:$0xf]  ;;  %v4592_v9 = vld [vmem:[%s7079_s8 + $0x40] sm:$0xf0] }
 0xb9c   :  { %v2776_v50 = vadd.f32 %v2772_v33, %v6850_v52  ;;  %v4619_v52 = vld [vmem:[%s7079_s8 + $0x118] sm:$0xf0]  ;;  %v4219_v15 = vor.u32 %v4592_v9, %v4218_v36 }
 0xb9d   :  { %3251 = vmatmul.bf16.vlgmr.msrb.gmra.mxu0 %v6906_v48  ;;  %3270 = vmatmul.bf16.vlgmr.msrb.gmra.mxu2 %v6906_v48  ;;  %v4327_v39 = vor.u32 %v4619_v52, %v4326_v45 }
 0xb9e   :  { %v2780_v23 = vmul.f32 0.7978846, %v2776_v50  ;;  %3289 = vmatmul.bf16.vlgmr.msra.gmra.mxu1 %v6906_v48  ;;  %3308 = vmatmul.bf16.vlgmr.msrb.gmra.mxu3 %v6906_v48  ;;  %v4881_v32 = vpop.eup %4880 }
 0xb9f   :  { %3345 = vmatpush.bf16.msra.mxu2 %v4207_v37  ;;  %3395 = vmatpush.bf16.msrb.mxu0 %v4471_v49  ;;  %v2787_v18 = vadd.f32 1.0, %v4881_v32 }
 0xba0   :  { %4882 = vtanh.f32 %v2780_v23 }
 0xba1   :  { %v2791_v46 = vmul.f32 %v2787_v18, %v2759_v25  ;;  %v4928_v18 = vld [vmem:[%s7076_s5] sm:$0xff] }
 0xba3   :  { %3396 = vmatpush.bf16.msrb.mxu0 %v4435_v21 }
 0xba6   :  { %v4883_v38 = vpop.eup %4882 }
 0xba7   :  { %v2788_v11 = vadd.f32 1.0, %v4883_v38  ;;  %3397 = vmatpush.bf16.msrb.mxu0 %v4399_v54 }
 0xba9   :  { %v2792_v14 = vmul.f32 %v2788_v11, %v2760_v22 }
 0xbab   :  { %v2874_v4 = vpack.c.bf16 %v2792_v14, %v2791_v46  ;;  %3398 = vmatpush.bf16.msrb.mxu0 %v4363_v53  ;;  %v4930_v53 = vld [vmem:[%s7076_s5 + $0x8] sm:$0xff] }
 0xbad   :  { %3256 = vmatmul.bf16.gmra.mxu0 %v2874_v4  ;;  %3275 = vmatmul.bf16.gmra.mxu2 %v2874_v4 }
 0xbae   :  { %3294 = vmatmul.bf16.gmra.mxu1 %v2874_v4  ;;  %3313 = vmatmul.bf16.gmra.mxu3 %v2874_v4 }
 0xbaf   :  { %3399 = vmatpush.bf16.msrb.mxu0 %v4327_v39 }
 0xbb3   :  { %3400 = vmatpush.bf16.msrb.mxu0 %v4291_v3 }
 0xbb7   :  { %3401 = vmatpush.bf16.msrb.mxu0 %v4255_v7 }
 0xbbb   :  { %3402 = vmatpush.bf16.msrb.mxu0 %v4219_v15 }
 0xbbd   :  { %3327 = vmatmul.bf16.vlgmr.msra.gmra.mxu0 %v6906_v48  ;;  %3346 = vmatmul.bf16.vlgmr.msra.gmra.mxu2 %v6906_v48 }
 0xbbe   :  { %3365 = vmatmul.bf16.vlgmr.msrb.gmra.mxu1 %v6906_v48  ;;  %3384 = vmatmul.bf16.vlgmr.msra.gmra.mxu3 %v6906_v48 }
 0xbcd   :  { %3332 = vmatmul.bf16.gmra.mxu0 %v2874_v4  ;;  %3351 = vmatmul.bf16.gmra.mxu2 %v2874_v4 }
 0xbce   :  { %3370 = vmatmul.bf16.gmra.mxu1 %v2874_v4  ;;  %3389 = vmatmul.bf16.gmra.mxu3 %v2874_v4 }
 0xbdd   :  { %3403 = vmatmul.bf16.vlgmr.msrb.gmra.mxu0 %v6906_v48 }
 0xbed   :  { %3408 = vmatmul.bf16.gmra.mxu0 %v2874_v4 }
 0xc1a   :  { %v3252_v16 = vpop.f32.mrf.mxu0 }
 0xc1b   :  { %v3290_v61 = vpop.f32.mrf.mxu1 }
 0xc20   :  { %v3271_v33 = vpop.f32.mrf.mxu2 }
 0xc21   :  { %v3309_v62 = vpop.f32.mrf.mxu3 }
 0xc22   :  { %v3254_v56 = vpop.f32.mrf.mxu0 }
 0xc23   :  { %v3292_v41 = vpop.f32.mrf.mxu1  ;;  %v3414_v48 = vpack.c.bf16 %v3254_v56, %v3252_v16 }
 0xc24   :  { %v3456_v49 = vpack.c.bf16 %v3292_v41, %v3290_v61 }
 0xc28   :  { %v3273_v19 = vpop.f32.mrf.mxu2 }
 0xc29   :  { %v3311_v50 = vpop.f32.mrf.mxu3  ;;  %v3416_v54 = vpack.c.bf16 %v3273_v19, %v3271_v33  ;;  %v4932_v33 = vld [vmem:[%s7076_s5 + $0x40] sm:$0xff]  ;;  %v4935_v19 = vld [vmem:[%s7076_s5 + $0x48] sm:$0xff] }
 0xc2a   :  { %v3257_v37 = vpop.f32.mrf.mxu0  ;;  %v3481_v38 = vpack.c.bf16 %v3311_v50, %v3309_v62  ;;  %v4933_v62 = vld [vmem:[%s7076_s5 + $0x50] sm:$0xff] }
 0xc2b   :  { %v3295_v44 = vpop.f32.mrf.mxu1 }
 0xc30   :  { %v3276_v20 = vpop.f32.mrf.mxu2 }
 0xc31   :  { %v3314_v63 = vpop.f32.mrf.mxu3 }
 0xc32   :  { %v3259_v23 = vpop.f32.mrf.mxu0 }
 0xc33   :  { %v3415_v59 = vpack.c.bf16 %v3259_v23, %v3257_v37  ;;  %v3297_v6 = vpop.f32.mrf.mxu1 }
 0xc34   :  { %v3457_v1 = vpack.c.bf16 %v3297_v6, %v3295_v44  ;;  %v4937_v44 = vld [vmem:[%s7076_s5 + $0x88] sm:$0xff] }
 0xc35   :  { %3443 = vmatpush.bf16.msra.mxu1 %v3415_v59 }
 0xc36   :  { %3464 = vmatpush.bf16.msrb.mxu3 %v3457_v1 }
 0xc38   :  { %v3278_v34 = vpop.f32.mrf.mxu2 }
 0xc39   :  { %v3417_v58 = vpack.c.bf16 %v3278_v34, %v3276_v20  ;;  %v3316_v21 = vpop.f32.mrf.mxu3  ;;  %3444 = vmatpush.bf16.msra.mxu1 %v3414_v48 }
 0xc3a   :  { %v3482_v32 = vpack.c.bf16 %v3316_v21, %v3314_v63  ;;  %3465 = vmatpush.bf16.msrb.mxu3 %v3456_v49  ;;  %v3328_v8 = vpop.f32.mrf.mxu0 }
 0xc3b   :  { %v3366_v43 = vpop.f32.mrf.mxu1  ;;  %3424 = vmatpush.bf16.msrb.mxu2 %v3417_v58 }
 0xc3c   :  { %3489 = vmatpush.bf16.msra.mxu0 %v3482_v32  ;;  %4474 = vmatmul.msk.bf16.vlgmr.msra.gmra.mxu1 %vm140_vm0, %v4928_v18 }
 0xc3d   :  { %4476 = vmatmul.msk.bf16.vlgmr.msrb.gmra.mxu3 %vm140_vm0, %v6360_v12 }
 0xc3f   :  { %3425 = vmatpush.bf16.msrb.mxu2 %v3416_v54 }
 0xc40   :  { %3490 = vmatpush.bf16.msra.mxu0 %v3481_v38  ;;  %v3347_v25 = vpop.f32.mrf.mxu2 }
 0xc41   :  { %v3385_v22 = vpop.f32.mrf.mxu3 }
 0xc42   :  { %v3330_v11 = vpop.f32.mrf.mxu0  ;;  %4472 = vmatmul.msk.bf16.vlgmr.msrb.gmra.mxu2 %vm140_vm0, %v4929_v27 }
 0xc43   :  { %v3368_v47 = vpop.f32.mrf.mxu1  ;;  %4478 = vmatmul.msk.bf16.vlgmr.msra.gmra.mxu0 %vm140_vm0, %v6365_v28  ;;  %v4931_v28 = vld [vmem:[%s7076_s5 + $0x18] sm:$0xff]  ;;  %v3506_v10 = vpack.c.bf16 %v3330_v11, %v3328_v8 }
 0xc44   :  { %v3556_v31 = vpack.c.bf16 %v3368_v47, %v3366_v43 }
 0xc48   :  { %v3349_v46 = vpop.f32.mrf.mxu2 }
 0xc49   :  { %v3387_v14 = vpop.f32.mrf.mxu3  ;;  %v3531_v16 = vpack.c.bf16 %v3349_v46, %v3347_v25 }
 0xc4a   :  { %v3333_v4 = vpop.f32.mrf.mxu0  ;;  %v3581_v61 = vpack.c.bf16 %v3387_v14, %v3385_v22 }
 0xc4b   :  { %v3371_v12 = vpop.f32.mrf.mxu1 }
 0xc4c   :  { %4475 = vmatmul.msk.bf16.gmra.mxu1 %vm140_vm0, %v4930_v53 }
 0xc4d   :  { %4477 = vmatmul.msk.bf16.gmra.mxu3 %vm140_vm0, %v6378_v60 }
 0xc50   :  { %v3352_v45 = vpop.f32.mrf.mxu2 }
 0xc51   :  { %v3390_v52 = vpop.f32.mrf.mxu3 }
 0xc52   :  { %v3335_v39 = vpop.f32.mrf.mxu0  ;;  %4473 = vmatmul.msk.bf16.gmra.mxu2 %vm140_vm0, %v4931_v28 }
 0xc53   :  { %v3507_v2 = vpack.c.bf16 %v3335_v39, %v3333_v4  ;;  %v3373_v13 = vpop.f32.mrf.mxu1  ;;  %4479 = vmatmul.msk.bf16.gmra.mxu0 %vm140_vm0, %v6383_v35  ;;  %v4659_v39 = vld [vmem:[%s7074_s3 + $0xd8] sm:$0xff] }
 0xc54   :  { %v3557_v3 = vpack.c.bf16 %v3373_v13, %v3371_v12 }
 0xc55   :  { %3514 = vmatpush.bf16.msra.mxu2 %v3507_v2 }
 0xc56   :  { %3564 = vmatpush.bf16.msra.mxu3 %v3557_v3 }
 0xc58   :  { %v3354_v60 = vpop.f32.mrf.mxu2 }
 0xc59   :  { %v3532_v7 = vpack.c.bf16 %v3354_v60, %v3352_v45  ;;  %v3392_v36 = vpop.f32.mrf.mxu3  ;;  %3515 = vmatpush.bf16.msra.mxu2 %v3506_v10 }
 0xc5a   :  { %v3582_v9 = vpack.c.bf16 %v3392_v36, %v3390_v52  ;;  %3565 = vmatpush.bf16.msra.mxu3 %v3556_v31  ;;  %v3404_v15 = vpop.f32.mrf.mxu0  ;;  %v4658_v31 = vld [vmem:[%s7074_s3 + $0xd0] sm:$0xff] }
 0xc5b   :  { %3539 = vmatpush.bf16.msrb.mxu1 %v3532_v7 }
 0xc5c   :  { %3589 = vmatpush.bf16.msrb.mxu0 %v3582_v9  ;;  %v4692_v9 = vld [vmem:[%s7073_s2 + $0x1b] ss:$0 sm:$0xff] }
 0xc5d   :  { %4484 = vmatmul.msk.bf16.vlgmr.msra.gmra.mxu3 %vm140_vm0, %v6399_v30  ;;  %v4934_v30 = vld [vmem:[%s7076_s5 + $0x70] sm:$0xff] }
 0xc5f   :  { %3540 = vmatpush.bf16.msrb.mxu1 %v3531_v16 }
 0xc60   :  { %3590 = vmatpush.bf16.msrb.mxu0 %v3581_v61  ;;  %v4657_v61 = vld [vmem:[%s7074_s3 + $0xc8] sm:$0xff] }
 0xc62   :  { %v3406_v35 = vpop.f32.mrf.mxu0  ;;  %4480 = vmatmul.msk.bf16.vlgmr.msra.gmra.mxu2 %vm140_vm0, %v4932_v33  ;;  %4482 = vmatmul.msk.bf16.vlgmr.msrb.gmra.mxu1 %vm140_vm0, %v4933_v62 }
 0xc63   :  { %4486 = vmatmul.msk.bf16.vlgmr.msrb.gmra.mxu0 %vm140_vm0, %v4934_v30  ;;  %v3606_v37 = vpack.c.bf16 %v3406_v35, %v3404_v15  ;;  %3724 = vmatpush.bf16.msra.mxu1 %v4659_v39 }
 0xc67   :  { %3725 = vmatpush.bf16.msra.mxu1 %v4658_v31 }
 0xc6a   :  { %v3409_v56 = vpop.f32.mrf.mxu0 }
 0xc6b   :  { %3726 = vmatpush.bf16.msra.mxu1 %v4657_v61 }
 0xc6d   :  { %4485 = vmatmul.msk.bf16.gmra.mxu3 %vm140_vm0, %v6420_v55  ;;  %v4936_v55 = vld [vmem:[%s7076_s5 + $0x80] sm:$0xff] }
 0xc72   :  { %v3411_v41 = vpop.f32.mrf.mxu0  ;;  %4481 = vmatmul.msk.bf16.gmra.mxu2 %vm140_vm0, %v4935_v19  ;;  %4483 = vmatmul.msk.bf16.gmra.mxu1 %vm140_vm0, %v6415_v26 }
 0xc73   :  { %v3607_v50 = vpack.c.bf16 %v3411_v41, %v3409_v56  ;;  %4487 = vmatmul.msk.bf16.gmra.mxu0 %vm140_vm0, %v6425_v17  ;;  %v4656_v56 = vld [vmem:[%s7074_s3 + $0xc0] sm:$0xff] }
 0xc74   :  { %3727 = vmatpush.bf16.msra.mxu1 %v4656_v56 }
 0xc75   :  { %3614 = vmatpush.bf16.msrb.mxu2 %v3607_v50 }
 0xc79   :  { %3615 = vmatpush.bf16.msrb.mxu2 %v3606_v37 }
 0xc82   :  { %4488 = vmatmul.msk.bf16.vlgmr.msrb.gmra.mxu2 %vm140_vm0, %v4936_v55 }
 0xc92   :  { %4489 = vmatmul.msk.bf16.gmra.mxu2 %vm140_vm0, %v4937_v44 }
 0xcb9   :  { %v3446_v20 = vpop.f32.mrf.mxu1 }
 0xcc0   :  { %v3467_v23 = vpop.f32.mrf.mxu3  ;;  %v3492_v17 = vpop.f32.mrf.mxu0 }
 0xcc1   :  { %v3448_v6 = vpop.f32.mrf.mxu1 }
 0xcc5   :  { %v3427_v26 = vpop.f32.mrf.mxu2 }
 0xcc6   :  { %v3447_v18 = vadd.f32 %v3446_v20, %v3427_v26 }
 0xcc8   :  { %v3469_v1 = vpop.f32.mrf.mxu3  ;;  %v3494_v49 = vpop.f32.mrf.mxu0  ;;  %v3477_v38 = vadd.f32 %v3467_v23, %v3447_v18 }
 0xcc9   :  { %v3451_v34 = vpop.f32.mrf.mxu1 }
 0xcca   :  { %v3502_v27 = vadd.f32 %v3492_v17, %v3477_v38 }
 0xccd   :  { %v3429_v63 = vpop.f32.mrf.mxu2 }
 0xcce   :  { %v3449_v47 = vadd.f32 %v3448_v6, %v3429_v63 }
 0xcd0   :  { %v3472_v58 = vpop.f32.mrf.mxu3  ;;  %v3497_v32 = vpop.f32.mrf.mxu0  ;;  %v3478_v4 = vadd.f32 %v3469_v1, %v3449_v47 }
 0xcd1   :  { %v3453_v8 = vpop.f32.mrf.mxu1 }
 0xcd2   :  { %v3503_v28 = vadd.f32 %v3494_v49, %v3478_v4 }
 0xcd5   :  { %v3432_v59 = vpop.f32.mrf.mxu2 }
 0xcd6   :  { %v3452_v2 = vadd.f32 %v3451_v34, %v3432_v59 }
 0xcd8   :  { %v3474_v54 = vpop.f32.mrf.mxu3  ;;  %v3499_v25 = vpop.f32.mrf.mxu0  ;;  %v3479_v60 = vadd.f32 %v3472_v58, %v3452_v2 }
 0xcda   :  { %v3504_v35 = vadd.f32 %v3497_v32, %v3479_v60 }
 0xcdd   :  { %v3434_v48 = vpop.f32.mrf.mxu2 }
 0xcde   :  { %v3454_v33 = vadd.f32 %v3453_v8, %v3434_v48 }
 0xcdf   :  { %v3542_v22 = vpop.f32.mrf.mxu1 }
 0xce0   :  { %v3567_v46 = vpop.f32.mrf.mxu3  ;;  %v3592_v12 = vpop.f32.mrf.mxu0  ;;  %v3480_v37 = vadd.f32 %v3474_v54, %v3454_v33 }
 0xce2   :  { %v3505_v17 = vadd.f32 %v3499_v25, %v3480_v37 }
 0xce5   :  { %v3517_v21 = vpop.f32.mrf.mxu2 }
 0xce6   :  { %v3527_v14 = vadd.f32 %v3517_v21, %v3502_v27 }
 0xce7   :  { %v3544_v45 = vpop.f32.mrf.mxu1 }
 0xce8   :  { %v3552_v53 = vadd.f32 %v3542_v22, %v3527_v14  ;;  %v3569_v10 = vpop.f32.mrf.mxu3  ;;  %v3594_v15 = vpop.f32.mrf.mxu0 }
 0xcea   :  { %v3577_v13 = vadd.f32 %v3567_v46, %v3552_v53 }
 0xcec   :  { %v3602_v7 = vadd.f32 %v3592_v12, %v3577_v13 }
 0xced   :  { %v3519_v43 = vpop.f32.mrf.mxu2 }
 0xcee   :  { %v3528_v3 = vadd.f32 %v3519_v43, %v3503_v28 }
 0xcef   :  { %v3547_v30 = vpop.f32.mrf.mxu1 }
 0xcf0   :  { %v3553_v36 = vadd.f32 %v3544_v45, %v3528_v3  ;;  %v3572_v44 = vpop.f32.mrf.mxu3  ;;  %v3597_v1 = vpop.f32.mrf.mxu0 }
 0xcf2   :  { %v3578_v41 = vadd.f32 %v3569_v10, %v3553_v36 }
 0xcf4   :  { %v3603_v26 = vadd.f32 %v3594_v15, %v3578_v41 }
 0xcf5   :  { %v3522_v11 = vpop.f32.mrf.mxu2 }
 0xcf6   :  { %v3529_v19 = vadd.f32 %v3522_v11, %v3504_v35 }
 0xcf7   :  { %v3549_v21 = vpop.f32.mrf.mxu1 }
 0xcf8   :  { %v3554_v20 = vadd.f32 %v3547_v30, %v3529_v19  ;;  %v3574_v54 = vpop.f32.mrf.mxu3  ;;  %v3599_v14 = vpop.f32.mrf.mxu0 }
 0xcfa   :  { %v3579_v48 = vadd.f32 %v3572_v44, %v3554_v20 }
 0xcfc   :  { %v3604_v43 = vadd.f32 %v3597_v1, %v3579_v48  ;;  %v4695_v1 = vld [vmem:[%s7073_s2 + $0xb] ss:$0 sm:$0xff] }
 0xcfd   :  { %v3524_v52 = vpop.f32.mrf.mxu2 }
 0xcfe   :  { %v3530_v49 = vadd.f32 %v3524_v52, %v3505_v17  ;;  %v4694_v17 = vld [vmem:[%s7073_s2 + $0xa] ss:$0 sm:$0xff] }
 0xd05   :  { %v3617_v16 = vpop.f32.mrf.mxu2 }
 0xd06   :  { %v3627_v62 = vadd.f32 %v3617_v16, %v3602_v7 }
 0xd08   :  { %v3633_v50 = vadd.f32 %v4692_v9, %v3627_v62 }
 0xd0a   :  { %v3637_v55 = vadd.f32 %v3633_v50, %v6245_v57  ;;  %v3555_v57 = vadd.f32 %v3549_v21, %v3530_v49 }
 0xd0c   :  { %v3645_v63 = vmul.f32 0.044715, %v3637_v55  ;;  %v3580_v25 = vadd.f32 %v3574_v54, %v3555_v57  ;;  %v3641_v15 = vmul.f32 0.5, %v3637_v55 }
 0xd0d   :  { %v3619_v23 = vpop.f32.mrf.mxu2 }
 0xd0e   :  { %v3649_v59 = vmul.f32 %v3645_v63, %v3637_v55  ;;  %v3628_v6 = vadd.f32 %v3619_v23, %v3603_v26  ;;  %v3605_v53 = vadd.f32 %v3599_v14, %v3580_v25  ;;  %v4693_v23 = vld [vmem:[%s7073_s2 + $0x1c] ss:$0 sm:$0xff]  ;;  %s4966_s2 = smov [#allocation2]  }
 0xd0f   :  { %s3763_s22 = sshll.u32 %s4966_s2, 4  ;;  %s3764_s22 = int_to_ptr.vmem [resolvable:$true] %s3763_s22 }
 0xd10   :  { %v3653_v34 = vmul.f32 %v3649_v59, %v3637_v55  ;;  %v3634_v58 = vadd.f32 %v4692_v9, %v3628_v6 }
 0xd12   :  { %v3657_v32 = vadd.f32 %v3653_v34, %v3637_v55  ;;  %v3638_v8 = vadd.f32 %v3634_v58, %v6247_v40 }
 0xd14   :  { %v3646_v18 = vmul.f32 0.044715, %v3638_v8  ;;  %v3661_v22 = vmul.f32 0.7978846, %v3657_v32  ;;  %v3642_v16 = vmul.f32 0.5, %v3638_v8 }
 0xd15   :  { %v3622_v38 = vpop.f32.mrf.mxu2 }
 0xd16   :  { %v3650_v11 = vmul.f32 %v3646_v18, %v3638_v8  ;;  %v3629_v27 = vadd.f32 %v3622_v38, %v3604_v43  ;;  %4884 = vtanh.f32 %v3661_v22 }
 0xd18   :  { %v3654_v47 = vmul.f32 %v3650_v11, %v3638_v8  ;;  %v3635_v46 = vadd.f32 %v4692_v9, %v3629_v27 }
 0xd1a   :  { %v3658_v4 = vadd.f32 %v3654_v47, %v3638_v8  ;;  %v3639_v12 = vadd.f32 %v3635_v46, %v6268_v51 }
 0xd1c   :  { %v3662_v45 = vmul.f32 0.7978846, %v3658_v4  ;;  %v3647_v52 = vmul.f32 0.044715, %v3639_v12  ;;  %v4885_v2 = vpop.eup %4884  ;;  %v3643_v37 = vmul.f32 0.5, %v3639_v12 }
 0xd1d   :  { %v3624_v40 = vpop.f32.mrf.mxu2  ;;  %v3669_v60 = vadd.f32 1.0, %v4885_v2 }
 0xd1e   :  { %4886 = vtanh.f32 %v3662_v45  ;;  %v3651_v39 = vmul.f32 %v3647_v52, %v3639_v12  ;;  %v3630_v28 = vadd.f32 %v3624_v40, %v3605_v53 }
 0xd1f   :  { %v3673_v33 = vmul.f32 %v3669_v60, %v3641_v15 }
 0xd20   :  { %v3636_v13 = vadd.f32 %v4692_v9, %v3630_v28  ;;  %v3655_v3 = vmul.f32 %v3651_v39, %v3639_v12 }
 0xd22   :  { %v3640_v10 = vadd.f32 %v3636_v13, %v6270_v5  ;;  %v3659_v31 = vadd.f32 %v3655_v3, %v3639_v12 }
 0xd24   :  { %v4887_v7 = vpop.eup %4886  ;;  %v3648_v36 = vmul.f32 0.044715, %v3640_v10  ;;  %v3663_v35 = vmul.f32 0.7978846, %v3659_v31  ;;  %v3644_v44 = vmul.f32 0.5, %v3640_v10 }
 0xd25   :  { %v3670_v61 = vadd.f32 1.0, %v4887_v7 }
 0xd26   :  { %v3652_v51 = vmul.f32 %v3648_v36, %v3640_v10  ;;  %4888 = vtanh.f32 %v3663_v35 }
 0xd27   :  { %v3674_v62 = vmul.f32 %v3670_v61, %v3642_v16 }
 0xd28   :  { %v3656_v30 = vmul.f32 %v3652_v51, %v3640_v10 }
 0xd29   :  { %v3686_v56 = vpack.c.bf16 %v3674_v62, %v3673_v33 }
 0xd2a   :  { %v3660_v41 = vadd.f32 %v3656_v30, %v3640_v10 }
 0xd2b   :  { %4514 = vmatmul.msk.bf16.vlgmr.msra.gmra.mxu1 %vm2163_vm13, %v3686_v56 }
 0xd2c   :  { %v3664_v9 = vmul.f32 0.7978846, %v3660_v41  ;;  %v4889_v5 = vpop.eup %4888 }
 0xd2d   :  { %v3671_v19 = vadd.f32 1.0, %v4889_v5 }
 0xd2e   :  { %4890 = vtanh.f32 %v3664_v9 }
 0xd2f   :  { %v3675_v26 = vmul.f32 %v3671_v19, %v3643_v37 }
 0xd34   :  { %v4891_v50 = vpop.eup %4890 }
 0xd35   :  { %v3672_v55 = vadd.f32 1.0, %v4891_v50 }
 0xd37   :  { %v3676_v20 = vmul.f32 %v3672_v55, %v3644_v44 }
 0xd39   :  { %v3687_v63 = vpack.c.bf16 %v3676_v20, %v3675_v26 }
 0xd3b   :  { %4515 = vmatmul.msk.bf16.gmra.mxu1 %vm2163_vm13, %v3687_v63 }
 0xda8   :  { %v3729_v59 = vpop.f32.mrf.mxu1 }
 0xda9   :  { %v3730_v6 = vadd.f32 %v4693_v23, %v3729_v59 }
 0xdab   :  { %v3742_v48 = vmul.f32 %v4694_v17, %v3730_v6 }
 0xdad   :  { %v3747_v49 = vadd.f32 %v4695_v1, %v3742_v48 }
 0xdaf   :  { %v3751_v34 = vadd.f32 %v3747_v49, %v6045_v0 }
 0xdb0   :  { %v3731_v58 = vpop.f32.mrf.mxu1 }
 0xdb1   :  { %3755 = vst.msk [vmem:[#allocation2] sm:$0xff] %vm140_vm0, %v3751_v34  ;;  %v3732_v21 = vadd.f32 %v4693_v23, %v3731_v58 }
 0xdb3   :  { %v3743_v32 = vmul.f32 %v4694_v17, %v3732_v21 }
 0xdb5   :  { %v3748_v8 = vadd.f32 %v4695_v1, %v3743_v32 }
 0xdb7   :  { %v3752_v43 = vadd.f32 %v3748_v8, %v6049_v42 }
 0xdb8   :  { %v3734_v57 = vpop.f32.mrf.mxu1 }
 0xdb9   :  { %3756 = vst.msk [vmem:[#allocation2 + $0x8] sm:$0xff] %vm140_vm0, %v3752_v43  ;;  %v3735_v18 = vadd.f32 %v4693_v23, %v3734_v57 }
 0xdbb   :  { %v3744_v54 = vmul.f32 %v4694_v17, %v3735_v18 }
 0xdbd   :  { %v3749_v38 = vadd.f32 %v4695_v1, %v3744_v54 }
 0xdbf   :  { %v3753_v22 = vadd.f32 %v3749_v38, %v6062_v29 }
 0xdc0   :  { %v3736_v11 = vpop.f32.mrf.mxu1 }
 0xdc1   :  { %3757 = vst.msk [vmem:[#allocation2 + $0x10] sm:$0xff] %vm140_vm0, %v3753_v22  ;;  %v3737_v0 = vadd.f32 %v4693_v23, %v3736_v11 }
 0xdc3   :  { %v3745_v27 = vmul.f32 %v4694_v17, %v3737_v0 }
 0xdc5   :  { %v3750_v42 = vadd.f32 %v4695_v1, %v3745_v27 }
 0xdc7   :  { %v3754_v25 = vadd.f32 %v3750_v42, %v6069_v24 }
 0xdc9   :  { %3758 = vst.msk [vmem:[#allocation2 + $0x18] sm:$0xff] %vm140_vm0, %v3754_v25 }
 0xdca   :  { %3771 = dma.vmem_to_hbm [thread:$0]  %s3764_s22, 512, %s3766_s25, [#allocation3], %s4967_s26, %s4967_s26, %s4968_s13  }
 0xdcb   :  { %4962 = dma.done.wait [#allocation3], 512  }
 0xdcc   :  { %4963 = vsyncadd [#allocation3], 4294966784 }
 0xdcd   :  { %3776 = vsyncpa [#allocation3], 1 }

</bundles_post_ra>
